<compile_context>
chip_gen: v5e
topology: v5e:2x2
jax: 0.10.0
libtpu: 0.0.40
codegen_flags: <defaults>
</compile_context>

<pallas_src>
import math
from functools import partial

import jax
import jax.numpy as jnp
from jax import lax
from jax.experimental import pallas as pl
from jax.experimental.pallas import tpu as pltpu


BATCH_TILE = 8  # sublane tile: batch rows handled per grid step


def _round_up(x, m):
    return (x + m - 1) // m * m


# ------------------------------ fused kernel -------------------------------

def make_encoder_kernel(num_layers, seq_len, hid_pad, mm_dtype):
    """Embedding + multi-layer LSTM over the full sequence, one batch tile."""
    Hp = hid_pad
    BT = BATCH_TILE
    SB = seq_len * BT

    def kernel(*refs):
        tok_ref = refs[0]                                     # (1, SB, 1) i32
        embproj_ref = refs[1]                                 # (Vp, 4Hp)
        w_ih_refs = refs[2:2 + num_layers - 1]                # (Hp, 4Hp) l>=1
        w_hh_refs = refs[1 + num_layers:1 + 2 * num_layers]   # (Hp, 4Hp) all l
        b_refs = refs[1 + 2 * num_layers:1 + 3 * num_layers]  # (1, 4Hp) f32
        h_out = refs[1 + 3 * num_layers]                      # (L, BT, Hp) f32
        c_out = refs[2 + 3 * num_layers]                      # (L, BT, Hp) f32
        proj_ref = refs[3 + 3 * num_layers]                   # (SB, 4Hp) f32
        hseq_ref = refs[4 + 3 * num_layers] if num_layers > 1 else None

        Vp = embproj_ref.shape[0]

        # ---- Embedding + layer-0 input projection for the WHOLE sequence as
        # one MXU-shaped matmul (exact row-select via one-hot; Emb @ W_ih0 was
        # folded at param-prep time).  Bias folded in here, not per step.
        tok = tok_ref[0]                                           # (SB, 1)
        lane_iota = lax.broadcasted_iota(jnp.int32, (SB, Vp), 1)
        onehot = (tok == lane_iota).astype(mm_dtype)               # (SB, Vp)
        proj_ref[...] = (
            jnp.dot(onehot, embproj_ref[...],
                    preferred_element_type=jnp.float32)
            + b_refs[0][...])

        for l in range(num_layers):
            if l > 0:
                # Input projection for layer l, all timesteps at once.
                proj_ref[...] = (
                    jnp.dot(hseq_ref[...].astype(mm_dtype),
                            w_ih_refs[l - 1][...],
                            preferred_element_type=jnp.float32)
                    + b_refs[l][...])

            last_layer = (l + 1 == num_layers)
            w_hh_ref = w_hh_refs[l]

            def step(t, carry, _w_hh=w_hh_ref, _last=last_layer):
                h, c = carry                                   # (BT, Hp) f32
                row0 = pl.multiple_of(t * BT, BT)
                gates = (proj_ref[pl.ds(row0, BT), :]
                         + jnp.dot(h.astype(mm_dtype), _w_hh[...],
                                   preferred_element_type=jnp.float32))
                # PyTorch gate order i, f, g, o; each gate is a lane-aligned
                # Hp block.  Padded hidden lanes stay exactly 0 through the
                # recurrence (i,f,o -> 0.5, g -> 0, state starts at 0);
                # padded batch rows compute token-0 values and are cropped by
                # the wrapper.
                i = jax.nn.sigmoid(gates[:, 0 * Hp:1 * Hp])
                f = jax.nn.sigmoid(gates[:, 1 * Hp:2 * Hp])
                g = jnp.tanh(gates[:, 2 * Hp:3 * Hp])
                o = jax.nn.sigmoid(gates[:, 3 * Hp:4 * Hp])
                c_new = f * c + i * g
                h_new = o * jnp.tanh(c_new)
                if not _last:
                    # sequence output feeds the next layer's big matmul
                    hseq_ref[pl.ds(row0, BT), :] = h_new
                return (h_new, c_new)

            init = (jnp.zeros((BT, Hp), jnp.float32),
                    jnp.zeros((BT, Hp), jnp.float32))
            h_l, c_l = lax.fori_loop(0, seq_len, step, init,
                                     unroll=min(seq_len, 8))
            h_out[l] = h_l
            c_out[l] = c_l
            # TODO(synk): inter-layer dropout omitted (PyTorch LSTM dropout is
            # only active in training mode; this is the inference forward).

    return kernel


# ------------------------------ param prep ---------------------------------

def prepare_kernel_params(params, vocab_pad, hid_pad, mm_dtype):
    """Pad / transpose / fold PyTorch-layout weights for the kernel (one-time)."""
    V, E = params["embedding"].shape
    H = params["lstm"][0]["w_hh"].shape[1]
    Hp = hid_pad

    def pad_gates(w_t, in_dim, in_pad):
        # w_t: (in_dim, 4H), gate order i,f,g,o along the 4H axis.
        out = jnp.zeros((in_pad, 4, Hp), jnp.float32)
        out = out.at[:in_dim, :, :H].set(w_t.reshape(in_dim, 4, H))
        return out.reshape(in_pad, 4 * Hp)

    # Layer 0: fold the embedding into the input projection:
    #   table[v] = Emb[v] @ W_ih0^T   -> (V, 4H)
    # (default matmul precision on purpose: keeps rounding correlated with
    #  the pure-JAX reference for the f32-operand parity check).
    table = params["embedding"] @ params["lstm"][0]["w_ih"].T           # (V,4H)
    embproj = jnp.zeros((vocab_pad, 4, Hp), jnp.float32)
    embproj = embproj.at[:V, :, :H].set(table.reshape(V, 4, H))
    embproj = embproj.reshape(vocab_pad, 4 * Hp).astype(mm_dtype)

    w_ih_list, w_hh_list, b_list = [], [], []
    for l, p in enumerate(params["lstm"]):
        if l > 0:
            w_ih_list.append(pad_gates(p["w_ih"].T, H, Hp).astype(mm_dtype))
        w_hh_list.append(pad_gates(p["w_hh"].T, H, Hp).astype(mm_dtype))
        b = (p["b_ih"] + p["b_hh"]).reshape(4, H)
        b_p = jnp.zeros((4, Hp), jnp.float32).at[:, :H].set(b)
        b_list.append(b_p.reshape(1, 4 * Hp))          # stays f32 (added to f32)
    return embproj, w_ih_list, w_hh_list, b_list


# ------------------------------ forward pass -------------------------------

@partial(jax.jit, static_argnames=("matmul_dtype",))
def encoder_forward(params, src, matmul_dtype=jnp.bfloat16):
    """Mirrors Encoder.forward(src) -> (hidden, cell); src: (B, S) int ids."""
    V, E = params["embedding"].shape
    L = len(params["lstm"])
    H = params["lstm"][0]["w_hh"].shape[1]
    B, S = src.shape

    BT = BATCH_TILE
    n_tiles = pl.cdiv(B, BT)
    Bp = n_tiles * BT
    Vp = _round_up(V, 128)
    Hp = _round_up(H, 128)
    SB = S * BT

    embproj, w_ih_list, w_hh_list, b_list = prepare_kernel_params(
        params, Vp, Hp, matmul_dtype)

    # Token ids: pad batch to Bp rows (padded rows use token 0; cropped
    # later).  Per batch-tile layout is time-major (row index = t*BT + b) so
    # each grid step reads one contiguous (S*BT, 1) block.
    tok = jnp.zeros((Bp, S), jnp.int32).at[:B].set(src.astype(jnp.int32))
    tok = tok.reshape(n_tiles, BT, S).transpose(0, 2, 1).reshape(n_tiles, SB, 1)

    kernel = make_encoder_kernel(L, S, Hp, matmul_dtype)

    def full_spec(arr):
        return pl.BlockSpec(arr.shape, lambda i, nd=arr.ndim: (0,) * nd)

    in_specs = [pl.BlockSpec((1, SB, 1), lambda i: (i, 0, 0)),   # tokens
                full_spec(embproj)]
    in_specs += [full_spec(w) for w in w_ih_list]
    in_specs += [full_spec(w) for w in w_hh_list]
    in_specs += [full_spec(b) for b in b_list]
    out_specs = (pl.BlockSpec((L, BT, Hp), lambda i: (0, i, 0)),
                 pl.BlockSpec((L, BT, Hp), lambda i: (0, i, 0)))

    scratch_shapes = [pltpu.VMEM((SB, 4 * Hp), jnp.float32)]     # proj scratch
    if L > 1:
        scratch_shapes.append(pltpu.VMEM((SB, Hp), jnp.float32))  # layer I/O

    # Explicit VMEM budget (v7x has only 64 MiB physical; don't rely on the
    # 32 MiB scoped default).
    def _bytes(a):
        return math.prod(a.shape) * jnp.dtype(a.dtype).itemsize
    total = (_bytes(tok) + _bytes(embproj)
             + sum(_bytes(w) for w in w_ih_list + w_hh_list + b_list)
             + 2 * L * BT * Hp * 4                       # output blocks
             + SB * 4 * Hp * 4 + (SB * Hp * 4 if L > 1 else 0))
    vmem_limit = int(min(128 << 20, max(32 << 20, 2 * total + (4 << 20))))

    h_pad, c_pad = pl.pallas_call(
        kernel,
        out_shape=(jax.ShapeDtypeStruct((L, Bp, Hp), jnp.float32),
                   jax.ShapeDtypeStruct((L, Bp, Hp), jnp.float32)),
        grid=(n_tiles,),
        in_specs=in_specs,
        out_specs=out_specs,
        scratch_shapes=scratch_shapes,
        compiler_params=pltpu.CompilerParams(
            dimension_semantics=("parallel",),
            vmem_limit_bytes=vmem_limit),
    )(tok, embproj, *w_ih_list, *w_hh_list, *b_list)

    return h_pad[:, :B, :H], c_pad[:, :B, :H]


# ---------------------------- pure-JAX reference ---------------------------

def encoder_forward_ref(params, src):
    x_seq = params["embedding"][src]                 # (B, S, E)
    B, S, _ = x_seq.shape
    H = params["lstm"][0]["w_hh"].shape[1]
    hs, cs = [], []
    for p in params["lstm"]:
        h = jnp.zeros((B, H), jnp.float32)
        c = jnp.zeros((B, H), jnp.float32)
        outs = []
        for t in range(S):
            x = x_seq[:, t, :]
            gates = x @ p["w_ih"].T + h @ p["w_hh"].T + p["b_ih"] + p["b_hh"]
            i = jax.nn.sigmoid(gates[:, 0 * H:1 * H])
            f = jax.nn.sigmoid(gates[:, 1 * H:2 * H])
            g = jnp.tanh(gates[:, 2 * H:3 * H])
            o = jax.nn.sigmoid(gates[:, 3 * H:4 * H])
            c = f * c + i * g
            h = o * jnp.tanh(c)
            outs.append(h)
        x_seq = jnp.stack(outs, axis=1)
        hs.append(h)
        cs.append(c)
    return jnp.stack(hs), jnp.stack(cs)


# -------------------------------- init -------------------------------------

def init_params(key, input_dim, emb_dim, hid_dim, num_layers):
    keys = jax.random.split(key, 1 + 4 * num_layers)
    scale = 1.0 / (hid_dim ** 0.5)
    params = {
        "embedding": 0.1 * jax.random.normal(keys[0], (input_dim, emb_dim),
                                             jnp.float32),
        "lstm": [],
    }
    for l in range(num_layers):
        in_dim = emb_dim if l == 0 else hid_dim
        k = keys[1 + 4 * l: 1 + 4 * (l + 1)]
        params["lstm"].append({
            "w_ih": jax.random.uniform(k[0], (4 * hid_dim, in_dim),
                                       jnp.float32, -scale, scale),
            "w_hh": jax.random.uniform(k[1], (4 * hid_dim, hid_dim),
                                       jnp.float32, -scale, scale),
            "b_ih": jax.random.uniform(k[2], (4 * hid_dim,), jnp.float32,
                                       -scale, scale),
            "b_hh": jax.random.uniform(k[3], (4 * hid_dim,), jnp.float32,
                                       -scale, scale),
        })
    return params


# -------------------------------- main --------------------------------------

if __name__ == "__main__":
    input_dim, emb_dim, hid_dim, num_layers = 64, 32, 32, 2
    batch, seq_len = 4, 8
    # dropout=0.5 in the module constructor; inactive in the inference forward.

    key = jax.random.PRNGKey(0)
    k_params, k_src = jax.random.split(key)
    params = init_params(k_params, input_dim, emb_dim, hid_dim, num_layers)
    src = jax.random.randint(k_src, (batch, seq_len), 0, input_dim,
                             dtype=jnp.int32)

    h_ref, c_ref = encoder_forward_ref(params, src)

    # f32-operand path: parity check against the pure-JAX reference.
    # (TPU default matmul precision rounds operands to bf16 and the prep-time
    #  Emb@W_ih0 fold adds one extra rounding vs. the reference, hence 1e-3.)
    h32, c32 = encoder_forward(params, src, matmul_dtype=jnp.float32)
    jax.block_until_ready((h32, c32))
    assert h32.shape == (num_layers, batch, hid_dim)
    assert c32.shape == (num_layers, batch, hid_dim)
    assert jnp.allclose(h32, h_ref, atol=1e-3, rtol=1e-3)
    assert jnp.allclose(c32, c_ref, atol=1e-3, rtol=1e-3)

    # bf16-operand path (production default): f32 accumulation, looser tol.
    hidden, cell = encoder_forward(params, src)
    jax.block_until_ready((hidden, cell))
    assert hidden.shape == (num_layers, batch, hid_dim)
    assert cell.shape == (num_layers, batch, hid_dim)
    assert jnp.allclose(hidden, h_ref, atol=2e-2, rtol=2e-2)
    assert jnp.allclose(cell, c_ref, atol=2e-2, rtol=2e-2)

    print("KERNEL_OK")
</pallas_src>

<mosaic_0001>
module attributes {stable_mosaic.version = 11 : i64} {
  func.func @kernel(%arg0: i32, %arg1: memref<1x64x1xi32, #tpu.memory_space<vmem>>, %arg2: memref<128x512xf32, #tpu.memory_space<vmem>>, %arg3: memref<128x512xf32, #tpu.memory_space<vmem>>, %arg4: memref<128x512xf32, #tpu.memory_space<vmem>>, %arg5: memref<128x512xf32, #tpu.memory_space<vmem>>, %arg6: memref<1x512xf32, #tpu.memory_space<vmem>>, %arg7: memref<1x512xf32, #tpu.memory_space<vmem>>, %arg8: memref<2x8x128xf32, #tpu.memory_space<vmem>>, %arg9: memref<2x8x128xf32, #tpu.memory_space<vmem>>, %arg10: memref<64x512xf32, #tpu.memory_space<vmem>>, %arg11: memref<64x128xf32, #tpu.memory_space<vmem>>) attributes {dimension_semantics = [#tpu.dimension_semantics<parallel>], iteration_bounds = array<i64: 1>, scalar_prefetch = 0 : i64, scratch_operands = 2 : i64, tpu.core_type = #tpu.core_type<tc>, window_params = [{transform_indices = @transform_0, window_bounds = array<i64: 1, 64, 1>}, {pipeline_mode = #tpu.pipeline_mode<synchronous>, transform_indices = @transform_1, window_bounds = array<i64: 128, 512>}, {pipeline_mode = #tpu.pipeline_mode<synchronous>, transform_indices = @transform_2, window_bounds = array<i64: 128, 512>}, {pipeline_mode = #tpu.pipeline_mode<synchronous>, transform_indices = @transform_3, window_bounds = array<i64: 128, 512>}, {pipeline_mode = #tpu.pipeline_mode<synchronous>, transform_indices = @transform_4, window_bounds = array<i64: 128, 512>}, {pipeline_mode = #tpu.pipeline_mode<synchronous>, transform_indices = @transform_5, window_bounds = array<i64: 1, 512>}, {pipeline_mode = #tpu.pipeline_mode<synchronous>, transform_indices = @transform_6, window_bounds = array<i64: 1, 512>}, {transform_indices = @transform_7, window_bounds = array<i64: 2, 8, 128>}, {transform_indices = @transform_8, window_bounds = array<i64: 2, 8, 128>}]} {
    %c0 = arith.constant 0 : index
    %c0_0 = arith.constant 0 : index
    %c0_1 = arith.constant 0 : index
    %0 = vector.load %arg1[%c0, %c0_0, %c0_1] : memref<1x64x1xi32, #tpu.memory_space<vmem>>, vector<1x64x1xi32>
    %1 = vector.shape_cast %0 : vector<1x64x1xi32> to vector<64x1xi32>
    %2 = tpu.iota {dimensions = array<i32: 1>} : vector<64x128xi32>
    %3 = vector.broadcast %1 : vector<64x1xi32> to vector<64x128xi32>
    %4 = arith.cmpi eq, %3, %2 : vector<64x128xi32>
    %5 = arith.extui %4 : vector<64x128xi1> to vector<64x128xi32>
    %6 = arith.sitofp %5 : vector<64x128xi32> to vector<64x128xf32>
    %c0_2 = arith.constant 0 : index
    %c0_3 = arith.constant 0 : index
    %7 = vector.load %arg2[%c0_2, %c0_3] : memref<128x512xf32, #tpu.memory_space<vmem>>, vector<128x512xf32>
    %cst = arith.constant dense<0.000000e+00> : vector<64x512xf32>
    %8 = tpu.matmul %6, %7, %cst {dimension_numbers = #tpu.dot_dimension_numbers<[1], [0], [0], [1], [0, 0, 1, 1], [], []>} : vector<64x128xf32>, vector<128x512xf32>, vector<64x512xf32> -> vector<64x512xf32>
    %c0_4 = arith.constant 0 : index
    %c0_5 = arith.constant 0 : index
    %9 = vector.load %arg6[%c0_4, %c0_5] : memref<1x512xf32, #tpu.memory_space<vmem>>, vector<1x512xf32>
    %10 = vector.broadcast %9 : vector<1x512xf32> to vector<64x512xf32>
    %11 = arith.addf %8, %10 : vector<64x512xf32>
    %c0_6 = arith.constant 0 : index
    %c0_7 = arith.constant 0 : index
    %12 = vector.load %arg10[%c0_6, %c0_7] : memref<64x512xf32, #tpu.memory_space<vmem>>, vector<64x512xf32>
    tpu.vector_store %arg10[%c0_6, %c0_7], %11 {strides = array<i32>} : memref<64x512xf32, #tpu.memory_space<vmem>>, vector<64x512xf32>,
    %cst_8 = arith.constant 0.000000e+00 : f32
    %13 = vector.broadcast %cst_8 : f32 to vector<8x128xf32>
    %cst_9 = arith.constant 0.000000e+00 : f32
    %14 = vector.broadcast %cst_9 : f32 to vector<8x128xf32>
    %c0_i32 = arith.constant 0 : i32
    %c8_i32 = arith.constant 8 : i32
    %15 = arith.muli %c0_i32, %c8_i32 : i32
    %16 = tpu.assume_multiple %15, 8 : i32
    %17 = arith.index_cast %16 : i32 to index
    %c0_10 = arith.constant 0 : index
    %18 = vector.load %arg10[%17, %c0_10] : memref<64x512xf32, #tpu.memory_space<vmem>>, vector<8x512xf32>
    %c0_11 = arith.constant 0 : index
    %c0_12 = arith.constant 0 : index
    %19 = vector.load %arg4[%c0_11, %c0_12] : memref<128x512xf32, #tpu.memory_space<vmem>>, vector<128x512xf32>
    %cst_13 = arith.constant dense<0.000000e+00> : vector<8x512xf32>
    %20 = tpu.matmul %13, %19, %cst_13 {dimension_numbers = #tpu.dot_dimension_numbers<[1], [0], [0], [1], [0, 0, 1, 1], [], []>} : vector<8x128xf32>, vector<128x512xf32>, vector<8x512xf32> -> vector<8x512xf32>
    %21 = arith.addf %18, %20 : vector<8x512xf32>
    %22 = vector.extract_strided_slice %21 {offsets = [0, 0], sizes = [8, 128], strides = [1, 1]} : vector<8x512xf32> to vector<8x128xf32>
    %23 = arith.negf %22 : vector<8x128xf32>
    %24 = math.exp %23 : vector<8x128xf32>
    %cst_14 = arith.constant 1.000000e+00 : f32
    %25 = vector.broadcast %cst_14 : f32 to vector<8x128xf32>
    %26 = arith.addf %25, %24 : vector<8x128xf32>
    %27 = arith.divf %25, %26 : vector<8x128xf32>
    %28 = vector.extract_strided_slice %21 {offsets = [0, 128], sizes = [8, 128], strides = [1, 1]} : vector<8x512xf32> to vector<8x128xf32>
    %29 = arith.negf %28 : vector<8x128xf32>
    %30 = math.exp %29 : vector<8x128xf32>
    %cst_15 = arith.constant 1.000000e+00 : f32
    %31 = vector.broadcast %cst_15 : f32 to vector<8x128xf32>
    %32 = arith.addf %31, %30 : vector<8x128xf32>
    %33 = arith.divf %31, %32 : vector<8x128xf32>
    %34 = vector.extract_strided_slice %21 {offsets = [0, 256], sizes = [8, 128], strides = [1, 1]} : vector<8x512xf32> to vector<8x128xf32>
    %35 = math.tanh %34 : vector<8x128xf32>
    %36 = vector.extract_strided_slice %21 {offsets = [0, 384], sizes = [8, 128], strides = [1, 1]} : vector<8x512xf32> to vector<8x128xf32>
    %37 = arith.negf %36 : vector<8x128xf32>
    %38 = math.exp %37 : vector<8x128xf32>
    %cst_16 = arith.constant 1.000000e+00 : f32
    %39 = vector.broadcast %cst_16 : f32 to vector<8x128xf32>
    %40 = arith.addf %39, %38 : vector<8x128xf32>
    %41 = arith.divf %39, %40 : vector<8x128xf32>
    %42 = arith.mulf %33, %14 : vector<8x128xf32>
    %43 = arith.mulf %27, %35 : vector<8x128xf32>
    %44 = arith.addf %42, %43 : vector<8x128xf32>
    %45 = math.tanh %44 : vector<8x128xf32>
    %46 = arith.mulf %41, %45 : vector<8x128xf32>
    %47 = arith.index_cast %16 : i32 to index
    %c0_17 = arith.constant 0 : index
    %48 = vector.load %arg11[%47, %c0_17] : memref<64x128xf32, #tpu.memory_space<vmem>>, vector<8x128xf32>
    tpu.vector_store %arg11[%47, %c0_17], %46 {strides = array<i32>} : memref<64x128xf32, #tpu.memory_space<vmem>>, vector<8x128xf32>,
    %c1_i32 = arith.constant 1 : i32
    %c8_i32_18 = arith.constant 8 : i32
    %49 = arith.muli %c1_i32, %c8_i32_18 : i32
    %50 = tpu.assume_multiple %49, 8 : i32
    %51 = arith.index_cast %50 : i32 to index
    %c0_19 = arith.constant 0 : index
    %52 = vector.load %arg10[%51, %c0_19] : memref<64x512xf32, #tpu.memory_space<vmem>>, vector<8x512xf32>
    %c0_20 = arith.constant 0 : index
    %c0_21 = arith.constant 0 : index
    %53 = vector.load %arg4[%c0_20, %c0_21] : memref<128x512xf32, #tpu.memory_space<vmem>>, vector<128x512xf32>
    %cst_22 = arith.constant dense<0.000000e+00> : vector<8x512xf32>
    %54 = tpu.matmul %46, %53, %cst_22 {dimension_numbers = #tpu.dot_dimension_numbers<[1], [0], [0], [1], [0, 0, 1, 1], [], []>} : vector<8x128xf32>, vector<128x512xf32>, vector<8x512xf32> -> vector<8x512xf32>
    %55 = arith.addf %52, %54 : vector<8x512xf32>
    %56 = vector.extract_strided_slice %55 {offsets = [0, 0], sizes = [8, 128], strides = [1, 1]} : vector<8x512xf32> to vector<8x128xf32>
    %57 = arith.negf %56 : vector<8x128xf32>
    %58 = math.exp %57 : vector<8x128xf32>
    %cst_23 = arith.constant 1.000000e+00 : f32
    %59 = vector.broadcast %cst_23 : f32 to vector<8x128xf32>
    %60 = arith.addf %59, %58 : vector<8x128xf32>
    %61 = arith.divf %59, %60 : vector<8x128xf32>
    %62 = vector.extract_strided_slice %55 {offsets = [0, 128], sizes = [8, 128], strides = [1, 1]} : vector<8x512xf32> to vector<8x128xf32>
    %63 = arith.negf %62 : vector<8x128xf32>
    %64 = math.exp %63 : vector<8x128xf32>
    %cst_24 = arith.constant 1.000000e+00 : f32
    %65 = vector.broadcast %cst_24 : f32 to vector<8x128xf32>
    %66 = arith.addf %65, %64 : vector<8x128xf32>
    %67 = arith.divf %65, %66 : vector<8x128xf32>
    %68 = vector.extract_strided_slice %55 {offsets = [0, 256], sizes = [8, 128], strides = [1, 1]} : vector<8x512xf32> to vector<8x128xf32>
    %69 = math.tanh %68 : vector<8x128xf32>
    %70 = vector.extract_strided_slice %55 {offsets = [0, 384], sizes = [8, 128], strides = [1, 1]} : vector<8x512xf32> to vector<8x128xf32>
    %71 = arith.negf %70 : vector<8x128xf32>
    %72 = math.exp %71 : vector<8x128xf32>
    %cst_25 = arith.constant 1.000000e+00 : f32
    %73 = vector.broadcast %cst_25 : f32 to vector<8x128xf32>
    %74 = arith.addf %73, %72 : vector<8x128xf32>
    %75 = arith.divf %73, %74 : vector<8x128xf32>
    %76 = arith.mulf %67, %44 : vector<8x128xf32>
    %77 = arith.mulf %61, %69 : vector<8x128xf32>
    %78 = arith.addf %76, %77 : vector<8x128xf32>
    %79 = math.tanh %78 : vector<8x128xf32>
    %80 = arith.mulf %75, %79 : vector<8x128xf32>
    %81 = arith.index_cast %50 : i32 to index
    %c0_26 = arith.constant 0 : index
    %82 = vector.load %arg11[%81, %c0_26] : memref<64x128xf32, #tpu.memory_space<vmem>>, vector<8x128xf32>
    tpu.vector_store %arg11[%81, %c0_26], %80 {strides = array<i32>} : memref<64x128xf32, #tpu.memory_space<vmem>>, vector<8x128xf32>,
    %c2_i32 = arith.constant 2 : i32
    %c8_i32_27 = arith.constant 8 : i32
    %83 = arith.muli %c2_i32, %c8_i32_27 : i32
    %84 = tpu.assume_multiple %83, 8 : i32
    %85 = arith.index_cast %84 : i32 to index
    %c0_28 = arith.constant 0 : index
    %86 = vector.load %arg10[%85, %c0_28] : memref<64x512xf32, #tpu.memory_space<vmem>>, vector<8x512xf32>
    %c0_29 = arith.constant 0 : index
    %c0_30 = arith.constant 0 : index
    %87 = vector.load %arg4[%c0_29, %c0_30] : memref<128x512xf32, #tpu.memory_space<vmem>>, vector<128x512xf32>
    %cst_31 = arith.constant dense<0.000000e+00> : vector<8x512xf32>
    %88 = tpu.matmul %80, %87, %cst_31 {dimension_numbers = #tpu.dot_dimension_numbers<[1], [0], [0], [1], [0, 0, 1, 1], [], []>} : vector<8x128xf32>, vector<128x512xf32>, vector<8x512xf32> -> vector<8x512xf32>
    %89 = arith.addf %86, %88 : vector<8x512xf32>
    %90 = vector.extract_strided_slice %89 {offsets = [0, 0], sizes = [8, 128], strides = [1, 1]} : vector<8x512xf32> to vector<8x128xf32>
    %91 = arith.negf %90 : vector<8x128xf32>
    %92 = math.exp %91 : vector<8x128xf32>
    %cst_32 = arith.constant 1.000000e+00 : f32
    %93 = vector.broadcast %cst_32 : f32 to vector<8x128xf32>
    %94 = arith.addf %93, %92 : vector<8x128xf32>
    %95 = arith.divf %93, %94 : vector<8x128xf32>
    %96 = vector.extract_strided_slice %89 {offsets = [0, 128], sizes = [8, 128], strides = [1, 1]} : vector<8x512xf32> to vector<8x128xf32>
    %97 = arith.negf %96 : vector<8x128xf32>
    %98 = math.exp %97 : vector<8x128xf32>
    %cst_33 = arith.constant 1.000000e+00 : f32
    %99 = vector.broadcast %cst_33 : f32 to vector<8x128xf32>
    %100 = arith.addf %99, %98 : vector<8x128xf32>
    %101 = arith.divf %99, %100 : vector<8x128xf32>
    %102 = vector.extract_strided_slice %89 {offsets = [0, 256], sizes = [8, 128], strides = [1, 1]} : vector<8x512xf32> to vector<8x128xf32>
    %103 = math.tanh %102 : vector<8x128xf32>
    %104 = vector.extract_strided_slice %89 {offsets = [0, 384], sizes = [8, 128], strides = [1, 1]} : vector<8x512xf32> to vector<8x128xf32>
    %105 = arith.negf %104 : vector<8x128xf32>
    %106 = math.exp %105 : vector<8x128xf32>
    %cst_34 = arith.constant 1.000000e+00 : f32
    %107 = vector.broadcast %cst_34 : f32 to vector<8x128xf32>
    %108 = arith.addf %107, %106 : vector<8x128xf32>
    %109 = arith.divf %107, %108 : vector<8x128xf32>
    %110 = arith.mulf %101, %78 : vector<8x128xf32>
    %111 = arith.mulf %95, %103 : vector<8x128xf32>
    %112 = arith.addf %110, %111 : vector<8x128xf32>
    %113 = math.tanh %112 : vector<8x128xf32>
    %114 = arith.mulf %109, %113 : vector<8x128xf32>
    %115 = arith.index_cast %84 : i32 to index
    %c0_35 = arith.constant 0 : index
    %116 = vector.load %arg11[%115, %c0_35] : memref<64x128xf32, #tpu.memory_space<vmem>>, vector<8x128xf32>
    tpu.vector_store %arg11[%115, %c0_35], %114 {strides = array<i32>} : memref<64x128xf32, #tpu.memory_space<vmem>>, vector<8x128xf32>,
    %c3_i32 = arith.constant 3 : i32
    %c8_i32_36 = arith.constant 8 : i32
    %117 = arith.muli %c3_i32, %c8_i32_36 : i32
    %118 = tpu.assume_multiple %117, 8 : i32
    %119 = arith.index_cast %118 : i32 to index
    %c0_37 = arith.constant 0 : index
    %120 = vector.load %arg10[%119, %c0_37] : memref<64x512xf32, #tpu.memory_space<vmem>>, vector<8x512xf32>
    %c0_38 = arith.constant 0 : index
    %c0_39 = arith.constant 0 : index
    %121 = vector.load %arg4[%c0_38, %c0_39] : memref<128x512xf32, #tpu.memory_space<vmem>>, vector<128x512xf32>
    %cst_40 = arith.constant dense<0.000000e+00> : vector<8x512xf32>
    %122 = tpu.matmul %114, %121, %cst_40 {dimension_numbers = #tpu.dot_dimension_numbers<[1], [0], [0], [1], [0, 0, 1, 1], [], []>} : vector<8x128xf32>, vector<128x512xf32>, vector<8x512xf32> -> vector<8x512xf32>
    %123 = arith.addf %120, %122 : vector<8x512xf32>
    %124 = vector.extract_strided_slice %123 {offsets = [0, 0], sizes = [8, 128], strides = [1, 1]} : vector<8x512xf32> to vector<8x128xf32>
    %125 = arith.negf %124 : vector<8x128xf32>
    %126 = math.exp %125 : vector<8x128xf32>
    %cst_41 = arith.constant 1.000000e+00 : f32
    %127 = vector.broadcast %cst_41 : f32 to vector<8x128xf32>
    %128 = arith.addf %127, %126 : vector<8x128xf32>
    %129 = arith.divf %127, %128 : vector<8x128xf32>
    %130 = vector.extract_strided_slice %123 {offsets = [0, 128], sizes = [8, 128], strides = [1, 1]} : vector<8x512xf32> to vector<8x128xf32>
    %131 = arith.negf %130 : vector<8x128xf32>
    %132 = math.exp %131 : vector<8x128xf32>
    %cst_42 = arith.constant 1.000000e+00 : f32
    %133 = vector.broadcast %cst_42 : f32 to vector<8x128xf32>
    %134 = arith.addf %133, %132 : vector<8x128xf32>
    %135 = arith.divf %133, %134 : vector<8x128xf32>
    %136 = vector.extract_strided_slice %123 {offsets = [0, 256], sizes = [8, 128], strides = [1, 1]} : vector<8x512xf32> to vector<8x128xf32>
    %137 = math.tanh %136 : vector<8x128xf32>
    %138 = vector.extract_strided_slice %123 {offsets = [0, 384], sizes = [8, 128], strides = [1, 1]} : vector<8x512xf32> to vector<8x128xf32>
    %139 = arith.negf %138 : vector<8x128xf32>
    %140 = math.exp %139 : vector<8x128xf32>
    %cst_43 = arith.constant 1.000000e+00 : f32
    %141 = vector.broadcast %cst_43 : f32 to vector<8x128xf32>
    %142 = arith.addf %141, %140 : vector<8x128xf32>
    %143 = arith.divf %141, %142 : vector<8x128xf32>
    %144 = arith.mulf %135, %112 : vector<8x128xf32>
    %145 = arith.mulf %129, %137 : vector<8x128xf32>
    %146 = arith.addf %144, %145 : vector<8x128xf32>
    %147 = math.tanh %146 : vector<8x128xf32>
    %148 = arith.mulf %143, %147 : vector<8x128xf32>
    %149 = arith.index_cast %118 : i32 to index
    %c0_44 = arith.constant 0 : index
    %150 = vector.load %arg11[%149, %c0_44] : memref<64x128xf32, #tpu.memory_space<vmem>>, vector<8x128xf32>
    tpu.vector_store %arg11[%149, %c0_44], %148 {strides = array<i32>} : memref<64x128xf32, #tpu.memory_space<vmem>>, vector<8x128xf32>,
    %c4_i32 = arith.constant 4 : i32
    %c8_i32_45 = arith.constant 8 : i32
    %151 = arith.muli %c4_i32, %c8_i32_45 : i32
    %152 = tpu.assume_multiple %151, 8 : i32
    %153 = arith.index_cast %152 : i32 to index
    %c0_46 = arith.constant 0 : index
    %154 = vector.load %arg10[%153, %c0_46] : memref<64x512xf32, #tpu.memory_space<vmem>>, vector<8x512xf32>
    %c0_47 = arith.constant 0 : index
    %c0_48 = arith.constant 0 : index
    %155 = vector.load %arg4[%c0_47, %c0_48] : memref<128x512xf32, #tpu.memory_space<vmem>>, vector<128x512xf32>
    %cst_49 = arith.constant dense<0.000000e+00> : vector<8x512xf32>
    %156 = tpu.matmul %148, %155, %cst_49 {dimension_numbers = #tpu.dot_dimension_numbers<[1], [0], [0], [1], [0, 0, 1, 1], [], []>} : vector<8x128xf32>, vector<128x512xf32>, vector<8x512xf32> -> vector<8x512xf32>
    %157 = arith.addf %154, %156 : vector<8x512xf32>
    %158 = vector.extract_strided_slice %157 {offsets = [0, 0], sizes = [8, 128], strides = [1, 1]} : vector<8x512xf32> to vector<8x128xf32>
    %159 = arith.negf %158 : vector<8x128xf32>
    %160 = math.exp %159 : vector<8x128xf32>
    %cst_50 = arith.constant 1.000000e+00 : f32
    %161 = vector.broadcast %cst_50 : f32 to vector<8x128xf32>
    %162 = arith.addf %161, %160 : vector<8x128xf32>
    %163 = arith.divf %161, %162 : vector<8x128xf32>
    %164 = vector.extract_strided_slice %157 {offsets = [0, 128], sizes = [8, 128], strides = [1, 1]} : vector<8x512xf32> to vector<8x128xf32>
    %165 = arith.negf %164 : vector<8x128xf32>
    %166 = math.exp %165 : vector<8x128xf32>
    %cst_51 = arith.constant 1.000000e+00 : f32
    %167 = vector.broadcast %cst_51 : f32 to vector<8x128xf32>
    %168 = arith.addf %167, %166 : vector<8x128xf32>
    %169 = arith.divf %167, %168 : vector<8x128xf32>
    %170 = vector.extract_strided_slice %157 {offsets = [0, 256], sizes = [8, 128], strides = [1, 1]} : vector<8x512xf32> to vector<8x128xf32>
    %171 = math.tanh %170 : vector<8x128xf32>
    %172 = vector.extract_strided_slice %157 {offsets = [0, 384], sizes = [8, 128], strides = [1, 1]} : vector<8x512xf32> to vector<8x128xf32>
    %173 = arith.negf %172 : vector<8x128xf32>
    %174 = math.exp %173 : vector<8x128xf32>
    %cst_52 = arith.constant 1.000000e+00 : f32
    %175 = vector.broadcast %cst_52 : f32 to vector<8x128xf32>
    %176 = arith.addf %175, %174 : vector<8x128xf32>
    %177 = arith.divf %175, %176 : vector<8x128xf32>
    %178 = arith.mulf %169, %146 : vector<8x128xf32>
    %179 = arith.mulf %163, %171 : vector<8x128xf32>
    %180 = arith.addf %178, %179 : vector<8x128xf32>
    %181 = math.tanh %180 : vector<8x128xf32>
    %182 = arith.mulf %177, %181 : vector<8x128xf32>
    %183 = arith.index_cast %152 : i32 to index
    %c0_53 = arith.constant 0 : index
    %184 = vector.load %arg11[%183, %c0_53] : memref<64x128xf32, #tpu.memory_space<vmem>>, vector<8x128xf32>
    tpu.vector_store %arg11[%183, %c0_53], %182 {strides = array<i32>} : memref<64x128xf32, #tpu.memory_space<vmem>>, vector<8x128xf32>,
    %c5_i32 = arith.constant 5 : i32
    %c8_i32_54 = arith.constant 8 : i32
    %185 = arith.muli %c5_i32, %c8_i32_54 : i32
    %186 = tpu.assume_multiple %185, 8 : i32
    %187 = arith.index_cast %186 : i32 to index
    %c0_55 = arith.constant 0 : index
    %188 = vector.load %arg10[%187, %c0_55] : memref<64x512xf32, #tpu.memory_space<vmem>>, vector<8x512xf32>
    %c0_56 = arith.constant 0 : index
    %c0_57 = arith.constant 0 : index
    %189 = vector.load %arg4[%c0_56, %c0_57] : memref<128x512xf32, #tpu.memory_space<vmem>>, vector<128x512xf32>
    %cst_58 = arith.constant dense<0.000000e+00> : vector<8x512xf32>
    %190 = tpu.matmul %182, %189, %cst_58 {dimension_numbers = #tpu.dot_dimension_numbers<[1], [0], [0], [1], [0, 0, 1, 1], [], []>} : vector<8x128xf32>, vector<128x512xf32>, vector<8x512xf32> -> vector<8x512xf32>
    %191 = arith.addf %188, %190 : vector<8x512xf32>
    %192 = vector.extract_strided_slice %191 {offsets = [0, 0], sizes = [8, 128], strides = [1, 1]} : vector<8x512xf32> to vector<8x128xf32>
    %193 = arith.negf %192 : vector<8x128xf32>
    %194 = math.exp %193 : vector<8x128xf32>
    %cst_59 = arith.constant 1.000000e+00 : f32
    %195 = vector.broadcast %cst_59 : f32 to vector<8x128xf32>
    %196 = arith.addf %195, %194 : vector<8x128xf32>
    %197 = arith.divf %195, %196 : vector<8x128xf32>
    %198 = vector.extract_strided_slice %191 {offsets = [0, 128], sizes = [8, 128], strides = [1, 1]} : vector<8x512xf32> to vector<8x128xf32>
    %199 = arith.negf %198 : vector<8x128xf32>
    %200 = math.exp %199 : vector<8x128xf32>
    %cst_60 = arith.constant 1.000000e+00 : f32
    %201 = vector.broadcast %cst_60 : f32 to vector<8x128xf32>
    %202 = arith.addf %201, %200 : vector<8x128xf32>
    %203 = arith.divf %201, %202 : vector<8x128xf32>
    %204 = vector.extract_strided_slice %191 {offsets = [0, 256], sizes = [8, 128], strides = [1, 1]} : vector<8x512xf32> to vector<8x128xf32>
    %205 = math.tanh %204 : vector<8x128xf32>
    %206 = vector.extract_strided_slice %191 {offsets = [0, 384], sizes = [8, 128], strides = [1, 1]} : vector<8x512xf32> to vector<8x128xf32>
    %207 = arith.negf %206 : vector<8x128xf32>
    %208 = math.exp %207 : vector<8x128xf32>
    %cst_61 = arith.constant 1.000000e+00 : f32
    %209 = vector.broadcast %cst_61 : f32 to vector<8x128xf32>
    %210 = arith.addf %209, %208 : vector<8x128xf32>
    %211 = arith.divf %209, %210 : vector<8x128xf32>
    %212 = arith.mulf %203, %180 : vector<8x128xf32>
    %213 = arith.mulf %197, %205 : vector<8x128xf32>
    %214 = arith.addf %212, %213 : vector<8x128xf32>
    %215 = math.tanh %214 : vector<8x128xf32>
    %216 = arith.mulf %211, %215 : vector<8x128xf32>
    %217 = arith.index_cast %186 : i32 to index
    %c0_62 = arith.constant 0 : index
    %218 = vector.load %arg11[%217, %c0_62] : memref<64x128xf32, #tpu.memory_space<vmem>>, vector<8x128xf32>
    tpu.vector_store %arg11[%217, %c0_62], %216 {strides = array<i32>} : memref<64x128xf32, #tpu.memory_space<vmem>>, vector<8x128xf32>,
    %c6_i32 = arith.constant 6 : i32
    %c8_i32_63 = arith.constant 8 : i32
    %219 = arith.muli %c6_i32, %c8_i32_63 : i32
    %220 = tpu.assume_multiple %219, 8 : i32
    %221 = arith.index_cast %220 : i32 to index
    %c0_64 = arith.constant 0 : index
    %222 = vector.load %arg10[%221, %c0_64] : memref<64x512xf32, #tpu.memory_space<vmem>>, vector<8x512xf32>
    %c0_65 = arith.constant 0 : index
    %c0_66 = arith.constant 0 : index
    %223 = vector.load %arg4[%c0_65, %c0_66] : memref<128x512xf32, #tpu.memory_space<vmem>>, vector<128x512xf32>
    %cst_67 = arith.constant dense<0.000000e+00> : vector<8x512xf32>
    %224 = tpu.matmul %216, %223, %cst_67 {dimension_numbers = #tpu.dot_dimension_numbers<[1], [0], [0], [1], [0, 0, 1, 1], [], []>} : vector<8x128xf32>, vector<128x512xf32>, vector<8x512xf32> -> vector<8x512xf32>
    %225 = arith.addf %222, %224 : vector<8x512xf32>
    %226 = vector.extract_strided_slice %225 {offsets = [0, 0], sizes = [8, 128], strides = [1, 1]} : vector<8x512xf32> to vector<8x128xf32>
    %227 = arith.negf %226 : vector<8x128xf32>
    %228 = math.exp %227 : vector<8x128xf32>
    %cst_68 = arith.constant 1.000000e+00 : f32
    %229 = vector.broadcast %cst_68 : f32 to vector<8x128xf32>
    %230 = arith.addf %229, %228 : vector<8x128xf32>
    %231 = arith.divf %229, %230 : vector<8x128xf32>
    %232 = vector.extract_strided_slice %225 {offsets = [0, 128], sizes = [8, 128], strides = [1, 1]} : vector<8x512xf32> to vector<8x128xf32>
    %233 = arith.negf %232 : vector<8x128xf32>
    %234 = math.exp %233 : vector<8x128xf32>
    %cst_69 = arith.constant 1.000000e+00 : f32
    %235 = vector.broadcast %cst_69 : f32 to vector<8x128xf32>
    %236 = arith.addf %235, %234 : vector<8x128xf32>
    %237 = arith.divf %235, %236 : vector<8x128xf32>
    %238 = vector.extract_strided_slice %225 {offsets = [0, 256], sizes = [8, 128], strides = [1, 1]} : vector<8x512xf32> to vector<8x128xf32>
    %239 = math.tanh %238 : vector<8x128xf32>
    %240 = vector.extract_strided_slice %225 {offsets = [0, 384], sizes = [8, 128], strides = [1, 1]} : vector<8x512xf32> to vector<8x128xf32>
    %241 = arith.negf %240 : vector<8x128xf32>
    %242 = math.exp %241 : vector<8x128xf32>
    %cst_70 = arith.constant 1.000000e+00 : f32
    %243 = vector.broadcast %cst_70 : f32 to vector<8x128xf32>
    %244 = arith.addf %243, %242 : vector<8x128xf32>
    %245 = arith.divf %243, %244 : vector<8x128xf32>
    %246 = arith.mulf %237, %214 : vector<8x128xf32>
    %247 = arith.mulf %231, %239 : vector<8x128xf32>
    %248 = arith.addf %246, %247 : vector<8x128xf32>
    %249 = math.tanh %248 : vector<8x128xf32>
    %250 = arith.mulf %245, %249 : vector<8x128xf32>
    %251 = arith.index_cast %220 : i32 to index
    %c0_71 = arith.constant 0 : index
    %252 = vector.load %arg11[%251, %c0_71] : memref<64x128xf32, #tpu.memory_space<vmem>>, vector<8x128xf32>
    tpu.vector_store %arg11[%251, %c0_71], %250 {strides = array<i32>} : memref<64x128xf32, #tpu.memory_space<vmem>>, vector<8x128xf32>,
    %c7_i32 = arith.constant 7 : i32
    %c8_i32_72 = arith.constant 8 : i32
    %253 = arith.muli %c7_i32, %c8_i32_72 : i32
    %254 = tpu.assume_multiple %253, 8 : i32
    %255 = arith.index_cast %254 : i32 to index
    %c0_73 = arith.constant 0 : index
    %256 = vector.load %arg10[%255, %c0_73] : memref<64x512xf32, #tpu.memory_space<vmem>>, vector<8x512xf32>
    %c0_74 = arith.constant 0 : index
    %c0_75 = arith.constant 0 : index
    %257 = vector.load %arg4[%c0_74, %c0_75] : memref<128x512xf32, #tpu.memory_space<vmem>>, vector<128x512xf32>
    %cst_76 = arith.constant dense<0.000000e+00> : vector<8x512xf32>
    %258 = tpu.matmul %250, %257, %cst_76 {dimension_numbers = #tpu.dot_dimension_numbers<[1], [0], [0], [1], [0, 0, 1, 1], [], []>} : vector<8x128xf32>, vector<128x512xf32>, vector<8x512xf32> -> vector<8x512xf32>
    %259 = arith.addf %256, %258 : vector<8x512xf32>
    %260 = vector.extract_strided_slice %259 {offsets = [0, 0], sizes = [8, 128], strides = [1, 1]} : vector<8x512xf32> to vector<8x128xf32>
    %261 = arith.negf %260 : vector<8x128xf32>
    %262 = math.exp %261 : vector<8x128xf32>
    %cst_77 = arith.constant 1.000000e+00 : f32
    %263 = vector.broadcast %cst_77 : f32 to vector<8x128xf32>
    %264 = arith.addf %263, %262 : vector<8x128xf32>
    %265 = arith.divf %263, %264 : vector<8x128xf32>
    %266 = vector.extract_strided_slice %259 {offsets = [0, 128], sizes = [8, 128], strides = [1, 1]} : vector<8x512xf32> to vector<8x128xf32>
    %267 = arith.negf %266 : vector<8x128xf32>
    %268 = math.exp %267 : vector<8x128xf32>
    %cst_78 = arith.constant 1.000000e+00 : f32
    %269 = vector.broadcast %cst_78 : f32 to vector<8x128xf32>
    %270 = arith.addf %269, %268 : vector<8x128xf32>
    %271 = arith.divf %269, %270 : vector<8x128xf32>
    %272 = vector.extract_strided_slice %259 {offsets = [0, 256], sizes = [8, 128], strides = [1, 1]} : vector<8x512xf32> to vector<8x128xf32>
    %273 = math.tanh %272 : vector<8x128xf32>
    %274 = vector.extract_strided_slice %259 {offsets = [0, 384], sizes = [8, 128], strides = [1, 1]} : vector<8x512xf32> to vector<8x128xf32>
    %275 = arith.negf %274 : vector<8x128xf32>
    %276 = math.exp %275 : vector<8x128xf32>
    %cst_79 = arith.constant 1.000000e+00 : f32
    %277 = vector.broadcast %cst_79 : f32 to vector<8x128xf32>
    %278 = arith.addf %277, %276 : vector<8x128xf32>
    %279 = arith.divf %277, %278 : vector<8x128xf32>
    %280 = arith.mulf %271, %248 : vector<8x128xf32>
    %281 = arith.mulf %265, %273 : vector<8x128xf32>
    %282 = arith.addf %280, %281 : vector<8x128xf32>
    %283 = math.tanh %282 : vector<8x128xf32>
    %284 = arith.mulf %279, %283 : vector<8x128xf32>
    %285 = arith.index_cast %254 : i32 to index
    %c0_80 = arith.constant 0 : index
    %286 = vector.load %arg11[%285, %c0_80] : memref<64x128xf32, #tpu.memory_space<vmem>>, vector<8x128xf32>
    tpu.vector_store %arg11[%285, %c0_80], %284 {strides = array<i32>} : memref<64x128xf32, #tpu.memory_space<vmem>>, vector<8x128xf32>,
    %c8_i32_81 = arith.constant 8 : i32
    %c0_82 = arith.constant 0 : index
    %c0_83 = arith.constant 0 : index
    %c0_84 = arith.constant 0 : index
    %287 = vector.load %arg8[%c0_82, %c0_83, %c0_84] : memref<2x8x128xf32, #tpu.memory_space<vmem>>, vector<1x8x128xf32>
    %288 = vector.shape_cast %287 : vector<1x8x128xf32> to vector<8x128xf32>
    %289 = vector.shape_cast %284 : vector<8x128xf32> to vector<1x8x128xf32>
    tpu.vector_store %arg8[%c0_82, %c0_83, %c0_84], %289 {strides = array<i32>} : memref<2x8x128xf32, #tpu.memory_space<vmem>>, vector<1x8x128xf32>,
    %c0_85 = arith.constant 0 : index
    %c0_86 = arith.constant 0 : index
    %c0_87 = arith.constant 0 : index
    %290 = vector.load %arg9[%c0_85, %c0_86, %c0_87] : memref<2x8x128xf32, #tpu.memory_space<vmem>>, vector<1x8x128xf32>
    %291 = vector.shape_cast %290 : vector<1x8x128xf32> to vector<8x128xf32>
    %292 = vector.shape_cast %282 : vector<8x128xf32> to vector<1x8x128xf32>
    tpu.vector_store %arg9[%c0_85, %c0_86, %c0_87], %292 {strides = array<i32>} : memref<2x8x128xf32, #tpu.memory_space<vmem>>, vector<1x8x128xf32>,
    %c0_88 = arith.constant 0 : index
    %c0_89 = arith.constant 0 : index
    %293 = vector.load %arg11[%c0_88, %c0_89] : memref<64x128xf32, #tpu.memory_space<vmem>>, vector<64x128xf32>
    %c0_90 = arith.constant 0 : index
    %c0_91 = arith.constant 0 : index
    %294 = vector.load %arg3[%c0_90, %c0_91] : memref<128x512xf32, #tpu.memory_space<vmem>>, vector<128x512xf32>
    %cst_92 = arith.constant dense<0.000000e+00> : vector<64x512xf32>
    %295 = tpu.matmul %293, %294, %cst_92 {dimension_numbers = #tpu.dot_dimension_numbers<[1], [0], [0], [1], [0, 0, 1, 1], [], []>} : vector<64x128xf32>, vector<128x512xf32>, vector<64x512xf32> -> vector<64x512xf32>
    %c0_93 = arith.constant 0 : index
    %c0_94 = arith.constant 0 : index
    %296 = vector.load %arg7[%c0_93, %c0_94] : memref<1x512xf32, #tpu.memory_space<vmem>>, vector<1x512xf32>
    %297 = vector.broadcast %296 : vector<1x512xf32> to vector<64x512xf32>
    %298 = arith.addf %295, %297 : vector<64x512xf32>
    %c0_95 = arith.constant 0 : index
    %c0_96 = arith.constant 0 : index
    %299 = vector.load %arg10[%c0_95, %c0_96] : memref<64x512xf32, #tpu.memory_space<vmem>>, vector<64x512xf32>
    tpu.vector_store %arg10[%c0_95, %c0_96], %298 {strides = array<i32>} : memref<64x512xf32, #tpu.memory_space<vmem>>, vector<64x512xf32>,
    %cst_97 = arith.constant 0.000000e+00 : f32
    %300 = vector.broadcast %cst_97 : f32 to vector<8x128xf32>
    %cst_98 = arith.constant 0.000000e+00 : f32
    %301 = vector.broadcast %cst_98 : f32 to vector<8x128xf32>
    %c0_i32_99 = arith.constant 0 : i32
    %c8_i32_100 = arith.constant 8 : i32
    %302 = arith.muli %c0_i32_99, %c8_i32_100 : i32
    %303 = tpu.assume_multiple %302, 8 : i32
    %304 = arith.index_cast %303 : i32 to index
    %c0_101 = arith.constant 0 : index
    %305 = vector.load %arg10[%304, %c0_101] : memref<64x512xf32, #tpu.memory_space<vmem>>, vector<8x512xf32>
    %c0_102 = arith.constant 0 : index
    %c0_103 = arith.constant 0 : index
    %306 = vector.load %arg5[%c0_102, %c0_103] : memref<128x512xf32, #tpu.memory_space<vmem>>, vector<128x512xf32>
    %cst_104 = arith.constant dense<0.000000e+00> : vector<8x512xf32>
    %307 = tpu.matmul %300, %306, %cst_104 {dimension_numbers = #tpu.dot_dimension_numbers<[1], [0], [0], [1], [0, 0, 1, 1], [], []>} : vector<8x128xf32>, vector<128x512xf32>, vector<8x512xf32> -> vector<8x512xf32>
    %308 = arith.addf %305, %307 : vector<8x512xf32>
    %309 = vector.extract_strided_slice %308 {offsets = [0, 0], sizes = [8, 128], strides = [1, 1]} : vector<8x512xf32> to vector<8x128xf32>
    %310 = arith.negf %309 : vector<8x128xf32>
    %311 = math.exp %310 : vector<8x128xf32>
    %cst_105 = arith.constant 1.000000e+00 : f32
    %312 = vector.broadcast %cst_105 : f32 to vector<8x128xf32>
    %313 = arith.addf %312, %311 : vector<8x128xf32>
    %314 = arith.divf %312, %313 : vector<8x128xf32>
    %315 = vector.extract_strided_slice %308 {offsets = [0, 128], sizes = [8, 128], strides = [1, 1]} : vector<8x512xf32> to vector<8x128xf32>
    %316 = arith.negf %315 : vector<8x128xf32>
    %317 = math.exp %316 : vector<8x128xf32>
    %cst_106 = arith.constant 1.000000e+00 : f32
    %318 = vector.broadcast %cst_106 : f32 to vector<8x128xf32>
    %319 = arith.addf %318, %317 : vector<8x128xf32>
    %320 = arith.divf %318, %319 : vector<8x128xf32>
    %321 = vector.extract_strided_slice %308 {offsets = [0, 256], sizes = [8, 128], strides = [1, 1]} : vector<8x512xf32> to vector<8x128xf32>
    %322 = math.tanh %321 : vector<8x128xf32>
    %323 = vector.extract_strided_slice %308 {offsets = [0, 384], sizes = [8, 128], strides = [1, 1]} : vector<8x512xf32> to vector<8x128xf32>
    %324 = arith.negf %323 : vector<8x128xf32>
    %325 = math.exp %324 : vector<8x128xf32>
    %cst_107 = arith.constant 1.000000e+00 : f32
    %326 = vector.broadcast %cst_107 : f32 to vector<8x128xf32>
    %327 = arith.addf %326, %325 : vector<8x128xf32>
    %328 = arith.divf %326, %327 : vector<8x128xf32>
    %329 = arith.mulf %320, %301 : vector<8x128xf32>
    %330 = arith.mulf %314, %322 : vector<8x128xf32>
    %331 = arith.addf %329, %330 : vector<8x128xf32>
    %332 = math.tanh %331 : vector<8x128xf32>
    %333 = arith.mulf %328, %332 : vector<8x128xf32>
    %c1_i32_108 = arith.constant 1 : i32
    %c8_i32_109 = arith.constant 8 : i32
    %334 = arith.muli %c1_i32_108, %c8_i32_109 : i32
    %335 = tpu.assume_multiple %334, 8 : i32
    %336 = arith.index_cast %335 : i32 to index
    %c0_110 = arith.constant 0 : index
    %337 = vector.load %arg10[%336, %c0_110] : memref<64x512xf32, #tpu.memory_space<vmem>>, vector<8x512xf32>
    %c0_111 = arith.constant 0 : index
    %c0_112 = arith.constant 0 : index
    %338 = vector.load %arg5[%c0_111, %c0_112] : memref<128x512xf32, #tpu.memory_space<vmem>>, vector<128x512xf32>
    %cst_113 = arith.constant dense<0.000000e+00> : vector<8x512xf32>
    %339 = tpu.matmul %333, %338, %cst_113 {dimension_numbers = #tpu.dot_dimension_numbers<[1], [0], [0], [1], [0, 0, 1, 1], [], []>} : vector<8x128xf32>, vector<128x512xf32>, vector<8x512xf32> -> vector<8x512xf32>
    %340 = arith.addf %337, %339 : vector<8x512xf32>
    %341 = vector.extract_strided_slice %340 {offsets = [0, 0], sizes = [8, 128], strides = [1, 1]} : vector<8x512xf32> to vector<8x128xf32>
    %342 = arith.negf %341 : vector<8x128xf32>
    %343 = math.exp %342 : vector<8x128xf32>
    %cst_114 = arith.constant 1.000000e+00 : f32
    %344 = vector.broadcast %cst_114 : f32 to vector<8x128xf32>
    %345 = arith.addf %344, %343 : vector<8x128xf32>
    %346 = arith.divf %344, %345 : vector<8x128xf32>
    %347 = vector.extract_strided_slice %340 {offsets = [0, 128], sizes = [8, 128], strides = [1, 1]} : vector<8x512xf32> to vector<8x128xf32>
    %348 = arith.negf %347 : vector<8x128xf32>
    %349 = math.exp %348 : vector<8x128xf32>
    %cst_115 = arith.constant 1.000000e+00 : f32
    %350 = vector.broadcast %cst_115 : f32 to vector<8x128xf32>
    %351 = arith.addf %350, %349 : vector<8x128xf32>
    %352 = arith.divf %350, %351 : vector<8x128xf32>
    %353 = vector.extract_strided_slice %340 {offsets = [0, 256], sizes = [8, 128], strides = [1, 1]} : vector<8x512xf32> to vector<8x128xf32>
    %354 = math.tanh %353 : vector<8x128xf32>
    %355 = vector.extract_strided_slice %340 {offsets = [0, 384], sizes = [8, 128], strides = [1, 1]} : vector<8x512xf32> to vector<8x128xf32>
    %356 = arith.negf %355 : vector<8x128xf32>
    %357 = math.exp %356 : vector<8x128xf32>
    %cst_116 = arith.constant 1.000000e+00 : f32
    %358 = vector.broadcast %cst_116 : f32 to vector<8x128xf32>
    %359 = arith.addf %358, %357 : vector<8x128xf32>
    %360 = arith.divf %358, %359 : vector<8x128xf32>
    %361 = arith.mulf %352, %331 : vector<8x128xf32>
    %362 = arith.mulf %346, %354 : vector<8x128xf32>
    %363 = arith.addf %361, %362 : vector<8x128xf32>
    %364 = math.tanh %363 : vector<8x128xf32>
    %365 = arith.mulf %360, %364 : vector<8x128xf32>
    %c2_i32_117 = arith.constant 2 : i32
    %c8_i32_118 = arith.constant 8 : i32
    %366 = arith.muli %c2_i32_117, %c8_i32_118 : i32
    %367 = tpu.assume_multiple %366, 8 : i32
    %368 = arith.index_cast %367 : i32 to index
    %c0_119 = arith.constant 0 : index
    %369 = vector.load %arg10[%368, %c0_119] : memref<64x512xf32, #tpu.memory_space<vmem>>, vector<8x512xf32>
    %c0_120 = arith.constant 0 : index
    %c0_121 = arith.constant 0 : index
    %370 = vector.load %arg5[%c0_120, %c0_121] : memref<128x512xf32, #tpu.memory_space<vmem>>, vector<128x512xf32>
    %cst_122 = arith.constant dense<0.000000e+00> : vector<8x512xf32>
    %371 = tpu.matmul %365, %370, %cst_122 {dimension_numbers = #tpu.dot_dimension_numbers<[1], [0], [0], [1], [0, 0, 1, 1], [], []>} : vector<8x128xf32>, vector<128x512xf32>, vector<8x512xf32> -> vector<8x512xf32>
    %372 = arith.addf %369, %371 : vector<8x512xf32>
    %373 = vector.extract_strided_slice %372 {offsets = [0, 0], sizes = [8, 128], strides = [1, 1]} : vector<8x512xf32> to vector<8x128xf32>
    %374 = arith.negf %373 : vector<8x128xf32>
    %375 = math.exp %374 : vector<8x128xf32>
    %cst_123 = arith.constant 1.000000e+00 : f32
    %376 = vector.broadcast %cst_123 : f32 to vector<8x128xf32>
    %377 = arith.addf %376, %375 : vector<8x128xf32>
    %378 = arith.divf %376, %377 : vector<8x128xf32>
    %379 = vector.extract_strided_slice %372 {offsets = [0, 128], sizes = [8, 128], strides = [1, 1]} : vector<8x512xf32> to vector<8x128xf32>
    %380 = arith.negf %379 : vector<8x128xf32>
    %381 = math.exp %380 : vector<8x128xf32>
    %cst_124 = arith.constant 1.000000e+00 : f32
    %382 = vector.broadcast %cst_124 : f32 to vector<8x128xf32>
    %383 = arith.addf %382, %381 : vector<8x128xf32>
    %384 = arith.divf %382, %383 : vector<8x128xf32>
    %385 = vector.extract_strided_slice %372 {offsets = [0, 256], sizes = [8, 128], strides = [1, 1]} : vector<8x512xf32> to vector<8x128xf32>
    %386 = math.tanh %385 : vector<8x128xf32>
    %387 = vector.extract_strided_slice %372 {offsets = [0, 384], sizes = [8, 128], strides = [1, 1]} : vector<8x512xf32> to vector<8x128xf32>
    %388 = arith.negf %387 : vector<8x128xf32>
    %389 = math.exp %388 : vector<8x128xf32>
    %cst_125 = arith.constant 1.000000e+00 : f32
    %390 = vector.broadcast %cst_125 : f32 to vector<8x128xf32>
    %391 = arith.addf %390, %389 : vector<8x128xf32>
    %392 = arith.divf %390, %391 : vector<8x128xf32>
    %393 = arith.mulf %384, %363 : vector<8x128xf32>
    %394 = arith.mulf %378, %386 : vector<8x128xf32>
    %395 = arith.addf %393, %394 : vector<8x128xf32>
    %396 = math.tanh %395 : vector<8x128xf32>
    %397 = arith.mulf %392, %396 : vector<8x128xf32>
    %c3_i32_126 = arith.constant 3 : i32
    %c8_i32_127 = arith.constant 8 : i32
    %398 = arith.muli %c3_i32_126, %c8_i32_127 : i32
    %399 = tpu.assume_multiple %398, 8 : i32
    %400 = arith.index_cast %399 : i32 to index
    %c0_128 = arith.constant 0 : index
    %401 = vector.load %arg10[%400, %c0_128] : memref<64x512xf32, #tpu.memory_space<vmem>>, vector<8x512xf32>
    %c0_129 = arith.constant 0 : index
    %c0_130 = arith.constant 0 : index
    %402 = vector.load %arg5[%c0_129, %c0_130] : memref<128x512xf32, #tpu.memory_space<vmem>>, vector<128x512xf32>
    %cst_131 = arith.constant dense<0.000000e+00> : vector<8x512xf32>
    %403 = tpu.matmul %397, %402, %cst_131 {dimension_numbers = #tpu.dot_dimension_numbers<[1], [0], [0], [1], [0, 0, 1, 1], [], []>} : vector<8x128xf32>, vector<128x512xf32>, vector<8x512xf32> -> vector<8x512xf32>
    %404 = arith.addf %401, %403 : vector<8x512xf32>
    %405 = vector.extract_strided_slice %404 {offsets = [0, 0], sizes = [8, 128], strides = [1, 1]} : vector<8x512xf32> to vector<8x128xf32>
    %406 = arith.negf %405 : vector<8x128xf32>
    %407 = math.exp %406 : vector<8x128xf32>
    %cst_132 = arith.constant 1.000000e+00 : f32
    %408 = vector.broadcast %cst_132 : f32 to vector<8x128xf32>
    %409 = arith.addf %408, %407 : vector<8x128xf32>
    %410 = arith.divf %408, %409 : vector<8x128xf32>
    %411 = vector.extract_strided_slice %404 {offsets = [0, 128], sizes = [8, 128], strides = [1, 1]} : vector<8x512xf32> to vector<8x128xf32>
    %412 = arith.negf %411 : vector<8x128xf32>
    %413 = math.exp %412 : vector<8x128xf32>
    %cst_133 = arith.constant 1.000000e+00 : f32
    %414 = vector.broadcast %cst_133 : f32 to vector<8x128xf32>
    %415 = arith.addf %414, %413 : vector<8x128xf32>
    %416 = arith.divf %414, %415 : vector<8x128xf32>
    %417 = vector.extract_strided_slice %404 {offsets = [0, 256], sizes = [8, 128], strides = [1, 1]} : vector<8x512xf32> to vector<8x128xf32>
    %418 = math.tanh %417 : vector<8x128xf32>
    %419 = vector.extract_strided_slice %404 {offsets = [0, 384], sizes = [8, 128], strides = [1, 1]} : vector<8x512xf32> to vector<8x128xf32>
    %420 = arith.negf %419 : vector<8x128xf32>
    %421 = math.exp %420 : vector<8x128xf32>
    %cst_134 = arith.constant 1.000000e+00 : f32
    %422 = vector.broadcast %cst_134 : f32 to vector<8x128xf32>
    %423 = arith.addf %422, %421 : vector<8x128xf32>
    %424 = arith.divf %422, %423 : vector<8x128xf32>
    %425 = arith.mulf %416, %395 : vector<8x128xf32>
    %426 = arith.mulf %410, %418 : vector<8x128xf32>
    %427 = arith.addf %425, %426 : vector<8x128xf32>
    %428 = math.tanh %427 : vector<8x128xf32>
    %429 = arith.mulf %424, %428 : vector<8x128xf32>
    %c4_i32_135 = arith.constant 4 : i32
    %c8_i32_136 = arith.constant 8 : i32
    %430 = arith.muli %c4_i32_135, %c8_i32_136 : i32
    %431 = tpu.assume_multiple %430, 8 : i32
    %432 = arith.index_cast %431 : i32 to index
    %c0_137 = arith.constant 0 : index
    %433 = vector.load %arg10[%432, %c0_137] : memref<64x512xf32, #tpu.memory_space<vmem>>, vector<8x512xf32>
    %c0_138 = arith.constant 0 : index
    %c0_139 = arith.constant 0 : index
    %434 = vector.load %arg5[%c0_138, %c0_139] : memref<128x512xf32, #tpu.memory_space<vmem>>, vector<128x512xf32>
    %cst_140 = arith.constant dense<0.000000e+00> : vector<8x512xf32>
    %435 = tpu.matmul %429, %434, %cst_140 {dimension_numbers = #tpu.dot_dimension_numbers<[1], [0], [0], [1], [0, 0, 1, 1], [], []>} : vector<8x128xf32>, vector<128x512xf32>, vector<8x512xf32> -> vector<8x512xf32>
    %436 = arith.addf %433, %435 : vector<8x512xf32>
    %437 = vector.extract_strided_slice %436 {offsets = [0, 0], sizes = [8, 128], strides = [1, 1]} : vector<8x512xf32> to vector<8x128xf32>
    %438 = arith.negf %437 : vector<8x128xf32>
    %439 = math.exp %438 : vector<8x128xf32>
    %cst_141 = arith.constant 1.000000e+00 : f32
    %440 = vector.broadcast %cst_141 : f32 to vector<8x128xf32>
    %441 = arith.addf %440, %439 : vector<8x128xf32>
    %442 = arith.divf %440, %441 : vector<8x128xf32>
    %443 = vector.extract_strided_slice %436 {offsets = [0, 128], sizes = [8, 128], strides = [1, 1]} : vector<8x512xf32> to vector<8x128xf32>
    %444 = arith.negf %443 : vector<8x128xf32>
    %445 = math.exp %444 : vector<8x128xf32>
    %cst_142 = arith.constant 1.000000e+00 : f32
    %446 = vector.broadcast %cst_142 : f32 to vector<8x128xf32>
    %447 = arith.addf %446, %445 : vector<8x128xf32>
    %448 = arith.divf %446, %447 : vector<8x128xf32>
    %449 = vector.extract_strided_slice %436 {offsets = [0, 256], sizes = [8, 128], strides = [1, 1]} : vector<8x512xf32> to vector<8x128xf32>
    %450 = math.tanh %449 : vector<8x128xf32>
    %451 = vector.extract_strided_slice %436 {offsets = [0, 384], sizes = [8, 128], strides = [1, 1]} : vector<8x512xf32> to vector<8x128xf32>
    %452 = arith.negf %451 : vector<8x128xf32>
    %453 = math.exp %452 : vector<8x128xf32>
    %cst_143 = arith.constant 1.000000e+00 : f32
    %454 = vector.broadcast %cst_143 : f32 to vector<8x128xf32>
    %455 = arith.addf %454, %453 : vector<8x128xf32>
    %456 = arith.divf %454, %455 : vector<8x128xf32>
    %457 = arith.mulf %448, %427 : vector<8x128xf32>
    %458 = arith.mulf %442, %450 : vector<8x128xf32>
    %459 = arith.addf %457, %458 : vector<8x128xf32>
    %460 = math.tanh %459 : vector<8x128xf32>
    %461 = arith.mulf %456, %460 : vector<8x128xf32>
    %c5_i32_144 = arith.constant 5 : i32
    %c8_i32_145 = arith.constant 8 : i32
    %462 = arith.muli %c5_i32_144, %c8_i32_145 : i32
    %463 = tpu.assume_multiple %462, 8 : i32
    %464 = arith.index_cast %463 : i32 to index
    %c0_146 = arith.constant 0 : index
    %465 = vector.load %arg10[%464, %c0_146] : memref<64x512xf32, #tpu.memory_space<vmem>>, vector<8x512xf32>
    %c0_147 = arith.constant 0 : index
    %c0_148 = arith.constant 0 : index
    %466 = vector.load %arg5[%c0_147, %c0_148] : memref<128x512xf32, #tpu.memory_space<vmem>>, vector<128x512xf32>
    %cst_149 = arith.constant dense<0.000000e+00> : vector<8x512xf32>
    %467 = tpu.matmul %461, %466, %cst_149 {dimension_numbers = #tpu.dot_dimension_numbers<[1], [0], [0], [1], [0, 0, 1, 1], [], []>} : vector<8x128xf32>, vector<128x512xf32>, vector<8x512xf32> -> vector<8x512xf32>
    %468 = arith.addf %465, %467 : vector<8x512xf32>
    %469 = vector.extract_strided_slice %468 {offsets = [0, 0], sizes = [8, 128], strides = [1, 1]} : vector<8x512xf32> to vector<8x128xf32>
    %470 = arith.negf %469 : vector<8x128xf32>
    %471 = math.exp %470 : vector<8x128xf32>
    %cst_150 = arith.constant 1.000000e+00 : f32
    %472 = vector.broadcast %cst_150 : f32 to vector<8x128xf32>
    %473 = arith.addf %472, %471 : vector<8x128xf32>
    %474 = arith.divf %472, %473 : vector<8x128xf32>
    %475 = vector.extract_strided_slice %468 {offsets = [0, 128], sizes = [8, 128], strides = [1, 1]} : vector<8x512xf32> to vector<8x128xf32>
    %476 = arith.negf %475 : vector<8x128xf32>
    %477 = math.exp %476 : vector<8x128xf32>
    %cst_151 = arith.constant 1.000000e+00 : f32
    %478 = vector.broadcast %cst_151 : f32 to vector<8x128xf32>
    %479 = arith.addf %478, %477 : vector<8x128xf32>
    %480 = arith.divf %478, %479 : vector<8x128xf32>
    %481 = vector.extract_strided_slice %468 {offsets = [0, 256], sizes = [8, 128], strides = [1, 1]} : vector<8x512xf32> to vector<8x128xf32>
    %482 = math.tanh %481 : vector<8x128xf32>
    %483 = vector.extract_strided_slice %468 {offsets = [0, 384], sizes = [8, 128], strides = [1, 1]} : vector<8x512xf32> to vector<8x128xf32>
    %484 = arith.negf %483 : vector<8x128xf32>
    %485 = math.exp %484 : vector<8x128xf32>
    %cst_152 = arith.constant 1.000000e+00 : f32
    %486 = vector.broadcast %cst_152 : f32 to vector<8x128xf32>
    %487 = arith.addf %486, %485 : vector<8x128xf32>
    %488 = arith.divf %486, %487 : vector<8x128xf32>
    %489 = arith.mulf %480, %459 : vector<8x128xf32>
    %490 = arith.mulf %474, %482 : vector<8x128xf32>
    %491 = arith.addf %489, %490 : vector<8x128xf32>
    %492 = math.tanh %491 : vector<8x128xf32>
    %493 = arith.mulf %488, %492 : vector<8x128xf32>
    %c6_i32_153 = arith.constant 6 : i32
    %c8_i32_154 = arith.constant 8 : i32
    %494 = arith.muli %c6_i32_153, %c8_i32_154 : i32
    %495 = tpu.assume_multiple %494, 8 : i32
    %496 = arith.index_cast %495 : i32 to index
    %c0_155 = arith.constant 0 : index
    %497 = vector.load %arg10[%496, %c0_155] : memref<64x512xf32, #tpu.memory_space<vmem>>, vector<8x512xf32>
    %c0_156 = arith.constant 0 : index
    %c0_157 = arith.constant 0 : index
    %498 = vector.load %arg5[%c0_156, %c0_157] : memref<128x512xf32, #tpu.memory_space<vmem>>, vector<128x512xf32>
    %cst_158 = arith.constant dense<0.000000e+00> : vector<8x512xf32>
    %499 = tpu.matmul %493, %498, %cst_158 {dimension_numbers = #tpu.dot_dimension_numbers<[1], [0], [0], [1], [0, 0, 1, 1], [], []>} : vector<8x128xf32>, vector<128x512xf32>, vector<8x512xf32> -> vector<8x512xf32>
    %500 = arith.addf %497, %499 : vector<8x512xf32>
    %501 = vector.extract_strided_slice %500 {offsets = [0, 0], sizes = [8, 128], strides = [1, 1]} : vector<8x512xf32> to vector<8x128xf32>
    %502 = arith.negf %501 : vector<8x128xf32>
    %503 = math.exp %502 : vector<8x128xf32>
    %cst_159 = arith.constant 1.000000e+00 : f32
    %504 = vector.broadcast %cst_159 : f32 to vector<8x128xf32>
    %505 = arith.addf %504, %503 : vector<8x128xf32>
    %506 = arith.divf %504, %505 : vector<8x128xf32>
    %507 = vector.extract_strided_slice %500 {offsets = [0, 128], sizes = [8, 128], strides = [1, 1]} : vector<8x512xf32> to vector<8x128xf32>
    %508 = arith.negf %507 : vector<8x128xf32>
    %509 = math.exp %508 : vector<8x128xf32>
    %cst_160 = arith.constant 1.000000e+00 : f32
    %510 = vector.broadcast %cst_160 : f32 to vector<8x128xf32>
    %511 = arith.addf %510, %509 : vector<8x128xf32>
    %512 = arith.divf %510, %511 : vector<8x128xf32>
    %513 = vector.extract_strided_slice %500 {offsets = [0, 256], sizes = [8, 128], strides = [1, 1]} : vector<8x512xf32> to vector<8x128xf32>
    %514 = math.tanh %513 : vector<8x128xf32>
    %515 = vector.extract_strided_slice %500 {offsets = [0, 384], sizes = [8, 128], strides = [1, 1]} : vector<8x512xf32> to vector<8x128xf32>
    %516 = arith.negf %515 : vector<8x128xf32>
    %517 = math.exp %516 : vector<8x128xf32>
    %cst_161 = arith.constant 1.000000e+00 : f32
    %518 = vector.broadcast %cst_161 : f32 to vector<8x128xf32>
    %519 = arith.addf %518, %517 : vector<8x128xf32>
    %520 = arith.divf %518, %519 : vector<8x128xf32>
    %521 = arith.mulf %512, %491 : vector<8x128xf32>
    %522 = arith.mulf %506, %514 : vector<8x128xf32>
    %523 = arith.addf %521, %522 : vector<8x128xf32>
    %524 = math.tanh %523 : vector<8x128xf32>
    %525 = arith.mulf %520, %524 : vector<8x128xf32>
    %c7_i32_162 = arith.constant 7 : i32
    %c8_i32_163 = arith.constant 8 : i32
    %526 = arith.muli %c7_i32_162, %c8_i32_163 : i32
    %527 = tpu.assume_multiple %526, 8 : i32
    %528 = arith.index_cast %527 : i32 to index
    %c0_164 = arith.constant 0 : index
    %529 = vector.load %arg10[%528, %c0_164] : memref<64x512xf32, #tpu.memory_space<vmem>>, vector<8x512xf32>
    %c0_165 = arith.constant 0 : index
    %c0_166 = arith.constant 0 : index
    %530 = vector.load %arg5[%c0_165, %c0_166] : memref<128x512xf32, #tpu.memory_space<vmem>>, vector<128x512xf32>
    %cst_167 = arith.constant dense<0.000000e+00> : vector<8x512xf32>
    %531 = tpu.matmul %525, %530, %cst_167 {dimension_numbers = #tpu.dot_dimension_numbers<[1], [0], [0], [1], [0, 0, 1, 1], [], []>} : vector<8x128xf32>, vector<128x512xf32>, vector<8x512xf32> -> vector<8x512xf32>
    %532 = arith.addf %529, %531 : vector<8x512xf32>
    %533 = vector.extract_strided_slice %532 {offsets = [0, 0], sizes = [8, 128], strides = [1, 1]} : vector<8x512xf32> to vector<8x128xf32>
    %534 = arith.negf %533 : vector<8x128xf32>
    %535 = math.exp %534 : vector<8x128xf32>
    %cst_168 = arith.constant 1.000000e+00 : f32
    %536 = vector.broadcast %cst_168 : f32 to vector<8x128xf32>
    %537 = arith.addf %536, %535 : vector<8x128xf32>
    %538 = arith.divf %536, %537 : vector<8x128xf32>
    %539 = vector.extract_strided_slice %532 {offsets = [0, 128], sizes = [8, 128], strides = [1, 1]} : vector<8x512xf32> to vector<8x128xf32>
    %540 = arith.negf %539 : vector<8x128xf32>
    %541 = math.exp %540 : vector<8x128xf32>
    %cst_169 = arith.constant 1.000000e+00 : f32
    %542 = vector.broadcast %cst_169 : f32 to vector<8x128xf32>
    %543 = arith.addf %542, %541 : vector<8x128xf32>
    %544 = arith.divf %542, %543 : vector<8x128xf32>
    %545 = vector.extract_strided_slice %532 {offsets = [0, 256], sizes = [8, 128], strides = [1, 1]} : vector<8x512xf32> to vector<8x128xf32>
    %546 = math.tanh %545 : vector<8x128xf32>
    %547 = vector.extract_strided_slice %532 {offsets = [0, 384], sizes = [8, 128], strides = [1, 1]} : vector<8x512xf32> to vector<8x128xf32>
    %548 = arith.negf %547 : vector<8x128xf32>
    %549 = math.exp %548 : vector<8x128xf32>
    %cst_170 = arith.constant 1.000000e+00 : f32
    %550 = vector.broadcast %cst_170 : f32 to vector<8x128xf32>
    %551 = arith.addf %550, %549 : vector<8x128xf32>
    %552 = arith.divf %550, %551 : vector<8x128xf32>
    %553 = arith.mulf %544, %523 : vector<8x128xf32>
    %554 = arith.mulf %538, %546 : vector<8x128xf32>
    %555 = arith.addf %553, %554 : vector<8x128xf32>
    %556 = math.tanh %555 : vector<8x128xf32>
    %557 = arith.mulf %552, %556 : vector<8x128xf32>
    %c8_i32_171 = arith.constant 8 : i32
    %c1 = arith.constant 1 : index
    %c0_172 = arith.constant 0 : index
    %c0_173 = arith.constant 0 : index
    %558 = vector.load %arg8[%c1, %c0_172, %c0_173] : memref<2x8x128xf32, #tpu.memory_space<vmem>>, vector<1x8x128xf32>
    %559 = vector.shape_cast %558 : vector<1x8x128xf32> to vector<8x128xf32>
    %560 = vector.shape_cast %557 : vector<8x128xf32> to vector<1x8x128xf32>
    tpu.vector_store %arg8[%c1, %c0_172, %c0_173], %560 {strides = array<i32>} : memref<2x8x128xf32, #tpu.memory_space<vmem>>, vector<1x8x128xf32>,
    %c1_174 = arith.constant 1 : index
    %c0_175 = arith.constant 0 : index
    %c0_176 = arith.constant 0 : index
    %561 = vector.load %arg9[%c1_174, %c0_175, %c0_176] : memref<2x8x128xf32, #tpu.memory_space<vmem>>, vector<1x8x128xf32>
    %562 = vector.shape_cast %561 : vector<1x8x128xf32> to vector<8x128xf32>
    %563 = vector.shape_cast %555 : vector<8x128xf32> to vector<1x8x128xf32>
    tpu.vector_store %arg9[%c1_174, %c0_175, %c0_176], %563 {strides = array<i32>} : memref<2x8x128xf32, #tpu.memory_space<vmem>>, vector<1x8x128xf32>,
    return
  }
  func.func @transform_0(%arg0: i32) -> (i32, i32, i32) {
    %c0_i32 = arith.constant 0 : i32
    %c0_i32_0 = arith.constant 0 : i32
    %c0_i32_1 = arith.constant 0 : i32
    return %arg0, %c0_i32, %c0_i32_0 : i32, i32, i32
  }
  func.func @transform_1(%arg0: i32) -> (i32, i32) {
    %c0_i32 = arith.constant 0 : i32
    %c0_i32_0 = arith.constant 0 : i32
    %c0_i32_1 = arith.constant 0 : i32
    return %c0_i32, %c0_i32_0 : i32, i32
  }
  func.func @transform_2(%arg0: i32) -> (i32, i32) {
    %c0_i32 = arith.constant 0 : i32
    %c0_i32_0 = arith.constant 0 : i32
    %c0_i32_1 = arith.constant 0 : i32
    return %c0_i32, %c0_i32_0 : i32, i32
  }
  func.func @transform_3(%arg0: i32) -> (i32, i32) {
    %c0_i32 = arith.constant 0 : i32
    %c0_i32_0 = arith.constant 0 : i32
    %c0_i32_1 = arith.constant 0 : i32
    return %c0_i32, %c0_i32_0 : i32, i32
  }
  func.func @transform_4(%arg0: i32) -> (i32, i32) {
    %c0_i32 = arith.constant 0 : i32
    %c0_i32_0 = arith.constant 0 : i32
    %c0_i32_1 = arith.constant 0 : i32
    return %c0_i32, %c0_i32_0 : i32, i32
  }
  func.func @transform_5(%arg0: i32) -> (i32, i32) {
    %c0_i32 = arith.constant 0 : i32
    %c0_i32_0 = arith.constant 0 : i32
    %c0_i32_1 = arith.constant 0 : i32
    return %c0_i32, %c0_i32_0 : i32, i32
  }
  func.func @transform_6(%arg0: i32) -> (i32, i32) {
    %c0_i32 = arith.constant 0 : i32
    %c0_i32_0 = arith.constant 0 : i32
    %c0_i32_1 = arith.constant 0 : i32
    return %c0_i32, %c0_i32_0 : i32, i32
  }
  func.func @transform_7(%arg0: i32) -> (i32, i32, i32) {
    %c0_i32 = arith.constant 0 : i32
    %c0_i32_0 = arith.constant 0 : i32
    %c0_i32_1 = arith.constant 0 : i32
    return %c0_i32, %arg0, %c0_i32_0 : i32, i32, i32
  }
  func.func @transform_8(%arg0: i32) -> (i32, i32, i32) {
    %c0_i32 = arith.constant 0 : i32
    %c0_i32_0 = arith.constant 0 : i32
    %c0_i32_1 = arith.constant 0 : i32
    return %c0_i32, %arg0, %c0_i32_0 : i32, i32, i32
  }
}

</mosaic_0001>

<bundles_post_ra>
// kernel: encoder_forward.1
= control target key start
LH: loop header
LB: loop body
LE: loop exit
PB: predicated region body
PF: predicated region fallthrough
CT: control target
= control target key end

     0   :  { %v4102_v0 = vmov 0   ;;  %s7718_s0 = inlined_call_operand.vmem [shape: s32[1,64,1], index: 0, kind: input, shape index: {}]   ;;  %s7719_s1 = inlined_call_operand.vmem [shape: f32[128,512], index: 1, kind: input, shape index: {}]   ;;  %s7720_s3 = inlined_call_operand.vmem [shape: f32[128,512], index: 3, kind: input, shape index: {}]   ;;  %s7721_s5 = inlined_call_operand.vmem [shape: f32[1,512], index: 5, kind: input, shape index: {}]   ;;  %s7722_s2 = inlined_call_operand.vmem [shape: f32[128,512], index: 2, kind: input, shape index: {}]   ;;  %s7723_s4 = inlined_call_operand.vmem [shape: f32[128,512], index: 4, kind: input, shape index: {}]   ;;  %s7724_s8 = inlined_call_operand.vmem [shape: f32[2,8,128], index: 8, kind: output, shape index: {1}]   ;;  %s7725_s7 = inlined_call_operand.vmem [shape: f32[2,8,128], index: 7, kind: output, shape index: {0}]   ;;  %s7726_s6 = inlined_call_operand.vmem [shape: f32[1,512], index: 6, kind: input, shape index: {}]  }
   0x1   :  { %3780 = vset.pattern.permute.xlu1 %v4102_v0  ;;  %3779 = vset.pattern.permute.xlu0 %v4102_v0  ;;  %v30_v1 = vld [vmem:[%s7718_s0 + $0x10] sm:$0xff]  ;;  %v28_v2 = vld [vmem:[%s7718_s0] sm:$0xff]  ;;  %v147_v5 = vld [vmem:[%s7719_s1 + $0x1e8] sm:$0xff] }
   0x2   :  { %45 = vperm.xlu1 %3780, %v30_v1   ;;  %39 = vperm.xlu0 %3779, %v28_v2   ;;  %v32_v3 = vld [vmem:[%s7718_s0 + $0x20] sm:$0xff]  ;;  %v148_v6 = vld [vmem:[%s7719_s1 + $0x1f0] sm:$0xff]  ;;  %v149_v7 = vld [vmem:[%s7719_s1 + $0x1f8] sm:$0xff] }
   0x3   :  { %3781 = vset.pattern.permute.xlu2 %v4102_v0  ;;  %v146_v4 = vld [vmem:[%s7719_s1 + $0x1e0] sm:$0xff]  ;;  %201 = vmatpush.msra.mxu1 %v147_v5  ;;  %v143_v9 = vld [vmem:[%s7719_s1 + $0x1c8] sm:$0xff]  ;;  %v144_v10 = vld [vmem:[%s7719_s1 + $0x1d0] sm:$0xff] }
   0x4   :  { %51 = vperm.xlu2 %3781, %v32_v3   ;;  %160 = vmatpush.msra.mxu0 %v146_v4  ;;  %v142_v8 = vld [vmem:[%s7719_s1 + $0x1c0] sm:$0xff]  ;;  %v145_v11 = vld [vmem:[%s7719_s1 + $0x1d8] sm:$0xff]  ;;  %v139_v13 = vld [vmem:[%s7719_s1 + $0x1a8] sm:$0xff] }
   0x5   :  { %242 = vmatpush.msra.mxu2 %v148_v6  ;;  %283 = vmatpush.msra.mxu3 %v149_v7  ;;  %v138_v12 = vld [vmem:[%s7719_s1 + $0x1a0] sm:$0xff]  ;;  %v31_v14 = vld [vmem:[%s7718_s0 + $0x18] sm:$0xff]  ;;  %v29_v15 = vld [vmem:[%s7718_s0 + $0x8] sm:$0xff] }
   0x6   :  { %161 = vmatpush.msra.mxu0 %v142_v8  ;;  %202 = vmatpush.msra.mxu1 %v143_v9  ;;  %v140_v16 = vld [vmem:[%s7719_s1 + $0x1b0] sm:$0xff]  ;;  %v141_v17 = vld [vmem:[%s7719_s1 + $0x1b8] sm:$0xff]  ;;  %v134_v18 = vld [vmem:[%s7719_s1 + $0x180] sm:$0xff] }
   0x7   :  { %243 = vmatpush.msra.mxu2 %v144_v10  ;;  %284 = vmatpush.msra.mxu3 %v145_v11  ;;  %v33_v19 = vld [vmem:[%s7718_s0 + $0x28] sm:$0xff]  ;;  %v136_v21 = vld [vmem:[%s7719_s1 + $0x190] sm:$0xff]  ;;  %v137_v22 = vld [vmem:[%s7719_s1 + $0x198] sm:$0xff] }
   0x8   :  { %162 = vmatpush.msra.mxu0 %v138_v12  ;;  %203 = vmatpush.msra.mxu1 %v139_v13  ;;  %v135_v20 = vld [vmem:[%s7719_s1 + $0x188] sm:$0xff]  ;;  %v130_v23 = vld [vmem:[%s7719_s1 + $0x160] sm:$0xff]  ;;  %v132_v25 = vld [vmem:[%s7719_s1 + $0x170] sm:$0xff] }
   0x9   :  { %244 = vmatpush.msra.mxu2 %v140_v16  ;;  %285 = vmatpush.msra.mxu3 %v141_v17  ;;  %v131_v24 = vld [vmem:[%s7719_s1 + $0x168] sm:$0xff]  ;;  %v133_v26 = vld [vmem:[%s7719_s1 + $0x178] sm:$0xff]  ;;  %v126_v27 = vld [vmem:[%s7719_s1 + $0x140] sm:$0xff] }
   0xa   :  { %48 = vperm.xlu1 %3780, %v31_v14   ;;  %42 = vperm.xlu0 %3779, %v29_v15   ;;  %v127_v28 = vld [vmem:[%s7719_s1 + $0x148] sm:$0xff]  ;;  %v128_v29 = vld [vmem:[%s7719_s1 + $0x150] sm:$0xff]  ;;  %v129_v30 = vld [vmem:[%s7719_s1 + $0x158] sm:$0xff] }
   0xb   :  { %163 = vmatpush.msra.mxu0 %v134_v18  ;;  %204 = vmatpush.msra.mxu1 %v135_v20  ;;  %v35_v31 = vld [vmem:[%s7718_s0 + $0x38] sm:$0xff]  ;;  %v34_v32 = vld [vmem:[%s7718_s0 + $0x30] sm:$0xff]  ;;  %v122_v33 = vld [vmem:[%s7719_s1 + $0x120] sm:$0xff] }
   0xc   :  { %54 = vperm.xlu2 %3781, %v33_v19   ;;  %245 = vmatpush.msra.mxu2 %v136_v21  ;;  %v123_v34 = vld [vmem:[%s7719_s1 + $0x128] sm:$0xff]  ;;  %v124_v35 = vld [vmem:[%s7719_s1 + $0x130] sm:$0xff]  ;;  %v125_v36 = vld [vmem:[%s7719_s1 + $0x138] sm:$0xff] }
   0xd   :  { %286 = vmatpush.msra.mxu3 %v137_v22  ;;  %164 = vmatpush.msra.mxu0 %v130_v23  ;;  %v118_v37 = vld [vmem:[%s7719_s1 + $0x100] sm:$0xff]  ;;  %v119_v38 = vld [vmem:[%s7719_s1 + $0x108] sm:$0xff]  ;;  %v120_v39 = vld [vmem:[%s7719_s1 + $0x110] sm:$0xff] }
   0xe   :  { %205 = vmatpush.msra.mxu1 %v131_v24  ;;  %246 = vmatpush.msra.mxu2 %v132_v25  ;;  %v121_v40 = vld [vmem:[%s7719_s1 + $0x118] sm:$0xff]  ;;  %v114_v41 = vld [vmem:[%s7719_s1 + $0xe0] sm:$0xff]  ;;  %v115_v42 = vld [vmem:[%s7719_s1 + $0xe8] sm:$0xff] }
   0xf   :  { %287 = vmatpush.msra.mxu3 %v133_v26  ;;  %165 = vmatpush.msra.mxu0 %v126_v27  ;;  %v116_v43 = vld [vmem:[%s7719_s1 + $0xf0] sm:$0xff]  ;;  %v117_v44 = vld [vmem:[%s7719_s1 + $0xf8] sm:$0xff]  ;;  %v110_v45 = vld [vmem:[%s7719_s1 + $0xc0] sm:$0xff] }
  0x10   :  { %206 = vmatpush.msra.mxu1 %v127_v28  ;;  %247 = vmatpush.msra.mxu2 %v128_v29  ;;  %v111_v46 = vld [vmem:[%s7719_s1 + $0xc8] sm:$0xff]  ;;  %v112_v47 = vld [vmem:[%s7719_s1 + $0xd0] sm:$0xff]  ;;  %v113_v48 = vld [vmem:[%s7719_s1 + $0xd8] sm:$0xff]  ;;  %v36_v29 = vlaneseq }
  0x11   :  { %288 = vmatpush.msra.mxu3 %v129_v30  ;;  %166 = vmatpush.msra.mxu0 %v122_v33  ;;  %v106_v49 = vld [vmem:[%s7719_s1 + $0xa0] sm:$0xff]  ;;  %v107_v50 = vld [vmem:[%s7719_s1 + $0xa8] sm:$0xff]  ;;  %v108_v51 = vld [vmem:[%s7719_s1 + $0xb0] sm:$0xff] }
  0x12   :  { %60 = vperm.xlu1 %3780, %v35_v31   ;;  %57 = vperm.xlu0 %3779, %v34_v32   ;;  %v109_v52 = vld [vmem:[%s7719_s1 + $0xb8] sm:$0xff]  ;;  %v102_v53 = vld [vmem:[%s7719_s1 + $0x80] sm:$0xff]  ;;  %v103_v54 = vld [vmem:[%s7719_s1 + $0x88] sm:$0xff] }
  0x13   :  { %207 = vmatpush.msra.mxu1 %v123_v34  ;;  %248 = vmatpush.msra.mxu2 %v124_v35  ;;  %v104_v55 = vld [vmem:[%s7719_s1 + $0x90] sm:$0xff]  ;;  %v105_v56 = vld [vmem:[%s7719_s1 + $0x98] sm:$0xff]  ;;  %v98_v57 = vld [vmem:[%s7719_s1 + $0x60] sm:$0xff] }
  0x14   :  { %289 = vmatpush.msra.mxu3 %v125_v36  ;;  %167 = vmatpush.msra.mxu0 %v118_v37  ;;  %v99_v58 = vld [vmem:[%s7719_s1 + $0x68] sm:$0xff]  ;;  %v100_v59 = vld [vmem:[%s7719_s1 + $0x70] sm:$0xff]  ;;  %v101_v60 = vld [vmem:[%s7719_s1 + $0x78] sm:$0xff]  ;;  %v4518_v36 = vand.u32 127, %v36_v29 }
  0x15   :  { %208 = vmatpush.msra.mxu1 %v119_v38  ;;  %249 = vmatpush.msra.mxu2 %v120_v39  ;;  %v94_v61 = vld [vmem:[%s7719_s1 + $0x40] sm:$0xff]  ;;  %v95_v62 = vld [vmem:[%s7719_s1 + $0x48] sm:$0xff]  ;;  %v96_v63 = vld [vmem:[%s7719_s1 + $0x50] sm:$0xff] }
  0x16   :  { %290 = vmatpush.msra.mxu3 %v121_v40  ;;  %168 = vmatpush.msra.mxu0 %v114_v41  ;;  %v97_v0 = vld [vmem:[%s7719_s1 + $0x58] sm:$0xff]  ;;  %v90_v1 = vld [vmem:[%s7719_s1 + $0x20] sm:$0xff]  ;;  %v91_v2 = vld [vmem:[%s7719_s1 + $0x28] sm:$0xff]  ;;  %v7727_v40 = vmov 1.0  }
  0x17   :  { %209 = vmatpush.msra.mxu1 %v115_v42  ;;  %250 = vmatpush.msra.mxu2 %v116_v43  ;;  %v92_v3 = vld [vmem:[%s7719_s1 + $0x30] sm:$0xff]  ;;  %v93_v4 = vld [vmem:[%s7719_s1 + $0x38] sm:$0xff]  ;;  %v86_v5 = vld [vmem:[%s7719_s1] sm:$0xff] }
  0x18   :  { %291 = vmatpush.msra.mxu3 %v117_v44  ;;  %169 = vmatpush.msra.mxu0 %v110_v45  ;;  %v87_v6 = vld [vmem:[%s7719_s1 + $0x8] sm:$0xff]  ;;  %v88_v7 = vld [vmem:[%s7719_s1 + $0x10] sm:$0xff]  ;;  %v89_v8 = vld [vmem:[%s7719_s1 + $0x18] sm:$0xff] }
  0x19   :  { %210 = vmatpush.msra.mxu1 %v111_v46  ;;  %251 = vmatpush.msra.mxu2 %v112_v47  ;;  %v4369_v9 = vld [vmem:[%s7720_s3 + $0x1e0] sm:$0xff]  ;;  %v4374_v10 = vld [vmem:[%s7720_s3 + $0x1e8] sm:$0xff]  ;;  %v4391_v13 = vld [vmem:[%s7720_s3 + $0x1f8] sm:$0xff] }
  0x1a   :  { %292 = vmatpush.msra.mxu3 %v113_v48  ;;  %170 = vmatpush.msra.mxu0 %v106_v49  ;;  %v4379_v11 = vld [vmem:[%s7720_s3 + $0x1c0] sm:$0xff]  ;;  %v4386_v12 = vld [vmem:[%s7720_s3 + $0x1c8] sm:$0xff]  ;;  %v4409_v16 = vld [vmem:[%s7720_s3 + $0x1d8] sm:$0xff] }
  0x1b   :  { %211 = vmatpush.msra.mxu1 %v107_v50  ;;  %252 = vmatpush.msra.mxu2 %v108_v51  ;;  %v4399_v14 = vld [vmem:[%s7720_s3 + $0x1a0] sm:$0xff]  ;;  %v4404_v15 = vld [vmem:[%s7720_s3 + $0x1a8] sm:$0xff]  ;;  %v4426_v19 = vld [vmem:[%s7720_s3 + $0x1b8] sm:$0xff] }
  0x1c   :  { %293 = vmatpush.msra.mxu3 %v109_v52  ;;  %171 = vmatpush.msra.mxu0 %v102_v53  ;;  %v4416_v17 = vld [vmem:[%s7720_s3 + $0x180] sm:$0xff]  ;;  %v4421_v18 = vld [vmem:[%s7720_s3 + $0x188] sm:$0xff]  ;;  %v4435_v20 = vld [vmem:[%s7720_s3 + $0x1f0] sm:$0xff] }
  0x1d   :  { %212 = vmatpush.msra.mxu1 %v103_v54  ;;  %253 = vmatpush.msra.mxu2 %v104_v55  ;;  %v4441_v21 = vld [vmem:[%s7720_s3 + $0x160] sm:$0xff]  ;;  %v4446_v22 = vld [vmem:[%s7720_s3 + $0x168] sm:$0xff]  ;;  %v4451_v23 = vld [vmem:[%s7720_s3 + $0x198] sm:$0xff] }
  0x1e   :  { %294 = vmatpush.msra.mxu3 %v105_v56  ;;  %172 = vmatpush.msra.mxu0 %v98_v57  ;;  %v4458_v24 = vld [vmem:[%s7720_s3 + $0x1d0] sm:$0xff]  ;;  %v4463_v25 = vld [vmem:[%s7720_s3 + $0x140] sm:$0xff]  ;;  %v4468_v26 = vld [vmem:[%s7720_s3 + $0x148] sm:$0xff] }
  0x1f   :  { %213 = vmatpush.msra.mxu1 %v99_v58  ;;  %254 = vmatpush.msra.mxu2 %v100_v59  ;;  %v4475_v27 = vld [vmem:[%s7720_s3 + $0x178] sm:$0xff]  ;;  %v4480_v28 = vld [vmem:[%s7720_s3 + $0x1b0] sm:$0xff]  ;;  %v4489_v30 = vld [vmem:[%s7720_s3 + $0x120] sm:$0xff] }
  0x20   :  { %295 = vmatpush.msra.mxu3 %v101_v60  ;;  %173 = vmatpush.msra.mxu0 %v94_v61  ;;  %v4494_v31 = vld [vmem:[%s7720_s3 + $0x128] sm:$0xff]  ;;  %v4499_v32 = vld [vmem:[%s7720_s3 + $0x158] sm:$0xff]  ;;  %v4506_v33 = vld [vmem:[%s7720_s3 + $0x190] sm:$0xff] }
  0x21   :  { %214 = vmatpush.msra.mxu1 %v95_v62  ;;  %255 = vmatpush.msra.mxu2 %v96_v63  ;;  %v4511_v34 = vld [vmem:[%s7720_s3 + $0x100] sm:$0xff]  ;;  %v4516_v35 = vld [vmem:[%s7720_s3 + $0x108] sm:$0xff]  ;;  %v4525_v37 = vld [vmem:[%s7720_s3 + $0x138] sm:$0xff] }
  0x22   :  { %296 = vmatpush.msra.mxu3 %v97_v0  ;;  %174 = vmatpush.msra.mxu0 %v90_v1  ;;  %v4530_v38 = vld [vmem:[%s7720_s3 + $0x170] sm:$0xff]  ;;  %v4544_v41 = vld [vmem:[%s7720_s3 + $0xe0] sm:$0xff]  ;;  %v4549_v42 = vld [vmem:[%s7720_s3 + $0xe8] sm:$0xff] }
  0x23   :  { %215 = vmatpush.msra.mxu1 %v91_v2  ;;  %256 = vmatpush.msra.mxu2 %v92_v3  ;;  %v4554_v43 = vld [vmem:[%s7720_s3 + $0x118] sm:$0xff]  ;;  %v4561_v44 = vld [vmem:[%s7720_s3 + $0x150] sm:$0xff]  ;;  %v4566_v45 = vld [vmem:[%s7720_s3 + $0xc0] sm:$0xff] }
  0x24   :  { %297 = vmatpush.msra.mxu3 %v93_v4  ;;  %175 = vmatpush.msra.mxu0 %v86_v5  ;;  %v4571_v46 = vld [vmem:[%s7720_s3 + $0xc8] sm:$0xff]  ;;  %v4578_v47 = vld [vmem:[%s7720_s3 + $0xf8] sm:$0xff]  ;;  %v4583_v48 = vld [vmem:[%s7720_s3 + $0x130] sm:$0xff] }
  0x25   :  { %216 = vmatpush.msra.mxu1 %v87_v6  ;;  %257 = vmatpush.msra.mxu2 %v88_v7  ;;  %v4597_v50 = vld [vmem:[%s7720_s3 + $0xa0] sm:$0xff]  ;;  %v4602_v51 = vld [vmem:[%s7720_s3 + $0xa8] sm:$0xff]  ;;  %v4607_v52 = vld [vmem:[%s7720_s3 + $0xd8] sm:$0xff] }
  0x26   :  { %298 = vmatpush.msra.mxu3 %v89_v8  ;;  %427 = vmatpush.msrb.mxu0 %v4369_v9  ;;  %v4614_v53 = vld [vmem:[%s7720_s3 + $0x110] sm:$0xff]  ;;  %v4619_v54 = vld [vmem:[%s7720_s3 + $0x80] sm:$0xff]  ;;  %v4624_v55 = vld [vmem:[%s7720_s3 + $0x88] sm:$0xff] }
  0x27   :  { %447 = vmatpush.msrb.mxu1 %v4374_v10  ;;  %467 = vmatpush.msrb.mxu2 %v4435_v20  ;;  %v4631_v56 = vld [vmem:[%s7720_s3 + $0xb8] sm:$0xff]  ;;  %v4636_v57 = vld [vmem:[%s7720_s3 + $0xf0] sm:$0xff]  ;;  %v4650_v59 = vld [vmem:[%s7720_s3 + $0x60] sm:$0xff] }
  0x28   :  { %487 = vmatpush.msrb.mxu3 %v4391_v13  ;;  %428 = vmatpush.msrb.mxu0 %v4379_v11  ;;  %v4655_v60 = vld [vmem:[%s7720_s3 + $0x68] sm:$0xff]  ;;  %v4660_v61 = vld [vmem:[%s7720_s3 + $0x98] sm:$0xff]  ;;  %v4667_v62 = vld [vmem:[%s7720_s3 + $0xd0] sm:$0xff] }
  0x29   :  { %448 = vmatpush.msrb.mxu1 %v4386_v12  ;;  %468 = vmatpush.msrb.mxu2 %v4458_v24  ;;  %v4672_v63 = vld [vmem:[%s7720_s3 + $0x40] sm:$0xff]  ;;  %v4677_v0 = vld [vmem:[%s7720_s3 + $0x48] sm:$0xff]  ;;  %v4684_v1 = vld [vmem:[%s7720_s3 + $0xb0] sm:$0xff] }
  0x2a   :  { %429 = vmatpush.msrb.mxu0 %v4399_v14  ;;  %488 = vmatpush.msrb.mxu3 %v4409_v16  ;;  %v4689_v2 = vld [vmem:[%s7720_s3 + $0x78] sm:$0xff]  ;;  %v4696_v3 = vld [vmem:[%s7720_s3 + $0x90] sm:$0xff]  ;;  %v4709_v5 = vld [vmem:[%s7720_s3 + $0x20] sm:$0xff] }
  0x2b   :  { %449 = vmatpush.msrb.mxu1 %v4404_v15  ;;  %469 = vmatpush.msrb.mxu2 %v4480_v28  ;;  %v4714_v6 = vld [vmem:[%s7720_s3 + $0x28] sm:$0xff]  ;;  %v4719_v7 = vld [vmem:[%s7720_s3 + $0x70] sm:$0xff]  ;;  %v4726_v29 = vld [vmem:[%s7720_s3 + $0x58] sm:$0xff] }
  0x2c   :  { %430 = vmatpush.msrb.mxu0 %v4416_v17  ;;  %489 = vmatpush.msrb.mxu3 %v4426_v19  ;;  %7924 = vst [vmem:[#allocation4_spill] sm:$0xff] %v4714_v6 }
  0x2d   :  { %450 = vmatpush.msrb.mxu1 %v4421_v18  ;;  %470 = vmatpush.msrb.mxu2 %v4506_v33 }
  0x2e   :  { %431 = vmatpush.msrb.mxu0 %v4441_v21  ;;  %490 = vmatpush.msrb.mxu3 %v4451_v23 }
  0x2f   :  { %451 = vmatpush.msrb.mxu1 %v4446_v22  ;;  %471 = vmatpush.msrb.mxu2 %v4530_v38 }
  0x30   :  { %432 = vmatpush.msrb.mxu0 %v4463_v25  ;;  %491 = vmatpush.msrb.mxu3 %v4475_v27 }
  0x31   :  { %452 = vmatpush.msrb.mxu1 %v4468_v26  ;;  %472 = vmatpush.msrb.mxu2 %v4561_v44 }
  0x32   :  { %433 = vmatpush.msrb.mxu0 %v4489_v30  ;;  %492 = vmatpush.msrb.mxu3 %v4499_v32 }
  0x33   :  { %453 = vmatpush.msrb.mxu1 %v4494_v31  ;;  %473 = vmatpush.msrb.mxu2 %v4583_v48 }
  0x34   :  { %434 = vmatpush.msrb.mxu0 %v4511_v34  ;;  %493 = vmatpush.msrb.mxu3 %v4525_v37 }
  0x35   :  { %454 = vmatpush.msrb.mxu1 %v4516_v35  ;;  %474 = vmatpush.msrb.mxu2 %v4614_v53 }
  0x36   :  { %435 = vmatpush.msrb.mxu0 %v4544_v41  ;;  %494 = vmatpush.msrb.mxu3 %v4554_v43 }
  0x37   :  { %455 = vmatpush.msrb.mxu1 %v4549_v42  ;;  %475 = vmatpush.msrb.mxu2 %v4636_v57 }
  0x38   :  { %436 = vmatpush.msrb.mxu0 %v4566_v45  ;;  %495 = vmatpush.msrb.mxu3 %v4578_v47 }
  0x39   :  { %456 = vmatpush.msrb.mxu1 %v4571_v46  ;;  %476 = vmatpush.msrb.mxu2 %v4667_v62 }
  0x3a   :  { %437 = vmatpush.msrb.mxu0 %v4597_v50  ;;  %496 = vmatpush.msrb.mxu3 %v4607_v52 }
  0x3b   :  { %457 = vmatpush.msrb.mxu1 %v4602_v51  ;;  %477 = vmatpush.msrb.mxu2 %v4684_v1 }
  0x3c   :  { %438 = vmatpush.msrb.mxu0 %v4619_v54  ;;  %497 = vmatpush.msrb.mxu3 %v4631_v56 }
  0x3d   :  { %458 = vmatpush.msrb.mxu1 %v4624_v55  ;;  %478 = vmatpush.msrb.mxu2 %v4696_v3 }
  0x3e   :  { %439 = vmatpush.msrb.mxu0 %v4650_v59  ;;  %498 = vmatpush.msrb.mxu3 %v4660_v61 }
  0x3f   :  { %459 = vmatpush.msrb.mxu1 %v4655_v60  ;;  %479 = vmatpush.msrb.mxu2 %v4719_v7 }
  0x40   :  { %440 = vmatpush.msrb.mxu0 %v4672_v63  ;;  %499 = vmatpush.msrb.mxu3 %v4689_v2 }
  0x41   :  { %460 = vmatpush.msrb.mxu1 %v4677_v0 }
  0x42   :  { %441 = vmatpush.msrb.mxu0 %v4709_v5  ;;  %500 = vmatpush.msrb.mxu3 %v4726_v29 }
  0x43   :  { %461 = vmatpush.msrb.mxu1 %v4714_v6  ;;  %v4760_v6 = vld [vmem:[%s7720_s3 + $0x18] sm:$0xff] }
  0x5e   :  { %v52_v8 = vpop.permute.xlu2 %51 }
  0x5f   :  { %vm66_vm4 = vcmp.eq.s32.totalorder %v52_v8, %v4518_v36 }
  0x66   :  { %v55_v8 = vpop.permute.xlu2 %54 }
  0x67   :  { %vm67_vm5 = vcmp.eq.s32.totalorder %v55_v8, %v4518_v36 }
  0x74   :  { %v40_v39 = vpop.permute.xlu0 %39  ;;  %v46_v58 = vpop.permute.xlu1 %45 }
  0x75   :  { %vm62_vm0 = vcmp.eq.s32.totalorder %v40_v39, %v4518_v36  ;;  %vm64_vm2 = vcmp.eq.s32.totalorder %v46_v58, %v4518_v36  ;;  %v4731_v39 = vld [vmem:[%s7720_s3 + $0x50] sm:$0xff]  ;;  %v4743_v58 = vld [vmem:[%s7720_s3 + $0x8] sm:$0xff] }
  0x76   :  { %3694 = vmatmul.msk.f32.vlgmr.msra.gmra.mxu0 %vm62_vm0, %v7727_v40  ;;  %3702 = vmatmul.msk.f32.vlgmr.msra.gmra.mxu1 %vm62_vm0, %v7727_v40  ;;  %7926 = vst [vmem:[#allocation6_spill] sm:$0xff] %v4743_v58 }
  0x77   :  { %3710 = vmatmul.msk.f32.vlgmr.msra.gmra.mxu2 %vm62_vm0, %v7727_v40  ;;  %3718 = vmatmul.msk.f32.vlgmr.msra.gmra.mxu3 %vm62_vm0, %v7727_v40 }
  0x78   :  { %462 = vmatpush.msrb.mxu1 %v4743_v58  ;;  %480 = vmatpush.msrb.mxu2 %v4731_v39  ;;  %v4771_v58 = vld [vmem:[%s7720_s3 + $0x10] sm:$0xff] }
  0x7a   :  { %666 = vmatpush.msra.mxu1 %v4374_v10 }
  0x7c   :  { %v43_v49 = vpop.permute.xlu0 %42  ;;  %v49_v4 = vpop.permute.xlu1 %48  ;;  %667 = vmatpush.msra.mxu1 %v4386_v12 }
  0x7d   :  { %vm63_vm1 = vcmp.eq.s32.totalorder %v43_v49, %v4518_v36  ;;  %vm65_vm3 = vcmp.eq.s32.totalorder %v49_v4, %v4518_v36  ;;  %v4736_v49 = vld [vmem:[%s7720_s3] sm:$0xff]  ;;  %v4748_v4 = vld [vmem:[%s7720_s3 + $0x38] sm:$0xff] }
  0x7e   :  { %3695 = vmatmul.msk.f32.gmra.mxu0 %vm63_vm1, %v7727_v40  ;;  %3703 = vmatmul.msk.f32.gmra.mxu1 %vm63_vm1, %v7727_v40  ;;  %7925 = vst [vmem:[#allocation5_spill] sm:$0xff] %v4736_v49 }
  0x7f   :  { %3711 = vmatmul.msk.f32.gmra.mxu2 %vm63_vm1, %v7727_v40  ;;  %3719 = vmatmul.msk.f32.gmra.mxu3 %vm63_vm1, %v7727_v40 }
  0x80   :  { %442 = vmatpush.msrb.mxu0 %v4736_v49  ;;  %501 = vmatpush.msrb.mxu3 %v4748_v4  ;;  %v7927_v49 = vmov 1.0  }
  0x81   :  { %668 = vmatpush.msra.mxu1 %v4404_v15 }
  0x82   :  { %646 = vmatpush.msra.mxu0 %v4369_v9  ;;  %502 = vmatpush.msrb.mxu3 %v4760_v6 }
  0x83   :  { %669 = vmatpush.msra.mxu1 %v4421_v18 }
  0x84   :  { %706 = vmatpush.msra.mxu3 %v4391_v13  ;;  %647 = vmatpush.msra.mxu0 %v4379_v11  ;;  %v58_v8 = vpop.permute.xlu0 %57 }
  0x85   :  { %670 = vmatpush.msra.mxu1 %v4446_v22  ;;  %vm68_vm6 = vcmp.eq.s32.totalorder %v58_v8, %v4518_v36  ;;  %v61_v8 = vpop.permute.xlu1 %60 }
  0x86   :  { %3696 = vmatmul.msk.f32.gmra.mxu0 %vm64_vm2, %v7727_v40  ;;  %3704 = vmatmul.msk.f32.gmra.mxu1 %vm64_vm2, %v7727_v40  ;;  %vm69_vm7 = vcmp.eq.s32.totalorder %v61_v8, %v4518_v36  ;;  %v7735_v36 = vmov 0.0   ;;  %v7929_v8 = vld [vmem:[#allocation5_spill] sm:$0xff] }
  0x87   :  { %3712 = vmatmul.msk.f32.gmra.mxu2 %vm64_vm2, %v7727_v40  ;;  %3720 = vmatmul.msk.f32.gmra.mxu3 %vm64_vm2, %v7727_v40 }
  0x88   :  { %707 = vmatpush.msra.mxu3 %v4409_v16  ;;  %648 = vmatpush.msra.mxu0 %v4399_v14 }
  0x89   :  { %671 = vmatpush.msra.mxu1 %v4468_v26 }
  0x8a   :  { %708 = vmatpush.msra.mxu3 %v4426_v19  ;;  %649 = vmatpush.msra.mxu0 %v4416_v17 }
  0x8b   :  { %672 = vmatpush.msra.mxu1 %v4494_v31 }
  0x8c   :  { %709 = vmatpush.msra.mxu3 %v4451_v23  ;;  %650 = vmatpush.msra.mxu0 %v4441_v21 }
  0x8d   :  { %673 = vmatpush.msra.mxu1 %v4516_v35 }
  0x8e   :  { %3697 = vmatmul.msk.f32.gmra.mxu0 %vm65_vm3, %v7727_v40  ;;  %3705 = vmatmul.msk.f32.gmra.mxu1 %vm65_vm3, %v7727_v40 }
  0x8f   :  { %3713 = vmatmul.msk.f32.gmra.mxu2 %vm65_vm3, %v7727_v40  ;;  %3721 = vmatmul.msk.f32.gmra.mxu3 %vm65_vm3, %v7727_v40  ;;  %v4755_v40 = vld [vmem:[%s7720_s3 + $0x30] sm:$0xff] }
  0x90   :  { %481 = vmatpush.msrb.mxu2 %v4755_v40  ;;  %710 = vmatpush.msra.mxu3 %v4475_v27 }
  0x91   :  { %651 = vmatpush.msra.mxu0 %v4463_v25  ;;  %674 = vmatpush.msra.mxu1 %v4549_v42 }
  0x92   :  { %482 = vmatpush.msrb.mxu2 %v4771_v58  ;;  %711 = vmatpush.msra.mxu3 %v4499_v32 }
  0x93   :  { %652 = vmatpush.msra.mxu0 %v4489_v30  ;;  %675 = vmatpush.msra.mxu1 %v4571_v46 }
  0x94   :  { %686 = vmatpush.msra.mxu2 %v4435_v20  ;;  %712 = vmatpush.msra.mxu3 %v4525_v37 }
  0x95   :  { %653 = vmatpush.msra.mxu0 %v4511_v34  ;;  %676 = vmatpush.msra.mxu1 %v4602_v51 }
  0x96   :  { %3698 = vmatmul.msk.f32.gmra.mxu0 %vm66_vm4, %v7927_v49  ;;  %3706 = vmatmul.msk.f32.gmra.mxu1 %vm66_vm4, %v7927_v49 }
  0x97   :  { %3714 = vmatmul.msk.f32.gmra.mxu2 %vm66_vm4, %v7927_v49  ;;  %3722 = vmatmul.msk.f32.gmra.mxu3 %vm66_vm4, %v7927_v49 }
  0x98   :  { %687 = vmatpush.msra.mxu2 %v4458_v24  ;;  %713 = vmatpush.msra.mxu3 %v4554_v43 }
  0x99   :  { %654 = vmatpush.msra.mxu0 %v4544_v41  ;;  %677 = vmatpush.msra.mxu1 %v4624_v55 }
  0x9a   :  { %688 = vmatpush.msra.mxu2 %v4480_v28  ;;  %714 = vmatpush.msra.mxu3 %v4578_v47 }
  0x9b   :  { %655 = vmatpush.msra.mxu0 %v4566_v45  ;;  %678 = vmatpush.msra.mxu1 %v4655_v60 }
  0x9c   :  { %689 = vmatpush.msra.mxu2 %v4506_v33  ;;  %715 = vmatpush.msra.mxu3 %v4607_v52 }
  0x9d   :  { %656 = vmatpush.msra.mxu0 %v4597_v50  ;;  %679 = vmatpush.msra.mxu1 %v4677_v0 }
  0x9e   :  { %3699 = vmatmul.msk.f32.gmra.mxu0 %vm67_vm5, %v7927_v49  ;;  %3707 = vmatmul.msk.f32.gmra.mxu1 %vm67_vm5, %v7927_v49 }
  0x9f   :  { %3715 = vmatmul.msk.f32.gmra.mxu2 %vm67_vm5, %v7927_v49  ;;  %3723 = vmatmul.msk.f32.gmra.mxu3 %vm67_vm5, %v7927_v49 }
  0xa0   :  { %690 = vmatpush.msra.mxu2 %v4530_v38  ;;  %716 = vmatpush.msra.mxu3 %v4631_v56 }
  0xa1   :  { %657 = vmatpush.msra.mxu0 %v4619_v54 }
  0xa2   :  { %691 = vmatpush.msra.mxu2 %v4561_v44  ;;  %717 = vmatpush.msra.mxu3 %v4660_v61 }
  0xa3   :  { %658 = vmatpush.msra.mxu0 %v4650_v59 }
  0xa4   :  { %692 = vmatpush.msra.mxu2 %v4583_v48  ;;  %718 = vmatpush.msra.mxu3 %v4689_v2 }
  0xa5   :  { %659 = vmatpush.msra.mxu0 %v4672_v63 }
  0xa6   :  { %3700 = vmatmul.msk.f32.gmra.mxu0 %vm68_vm6, %v7927_v49  ;;  %3708 = vmatmul.msk.f32.gmra.mxu1 %vm68_vm6, %v7927_v49 }
  0xa7   :  { %3716 = vmatmul.msk.f32.gmra.mxu2 %vm68_vm6, %v7927_v49  ;;  %3724 = vmatmul.msk.f32.gmra.mxu3 %vm68_vm6, %v7927_v49 }
  0xa8   :  { %693 = vmatpush.msra.mxu2 %v4614_v53  ;;  %719 = vmatpush.msra.mxu3 %v4726_v29 }
  0xa9   :  { %660 = vmatpush.msra.mxu0 %v4709_v5 }
  0xaa   :  { %694 = vmatpush.msra.mxu2 %v4636_v57  ;;  %720 = vmatpush.msra.mxu3 %v4748_v4 }
  0xab   :  { %661 = vmatpush.msra.mxu0 %v7929_v8 }
  0xac   :  { %695 = vmatpush.msra.mxu2 %v4667_v62  ;;  %721 = vmatpush.msra.mxu3 %v4760_v6 }
  0xae   :  { %3701 = vmatmul.msk.f32.gmra.mxu0 %vm69_vm7, %v7927_v49  ;;  %3709 = vmatmul.msk.f32.gmra.mxu1 %vm69_vm7, %v7927_v49 }
  0xaf   :  { %3717 = vmatmul.msk.f32.gmra.mxu2 %vm69_vm7, %v7927_v49  ;;  %3725 = vmatmul.msk.f32.gmra.mxu3 %vm69_vm7, %v7927_v49  ;;  %v7928_v49 = vld [vmem:[#allocation4_spill] sm:$0xff] }
  0xb0   :  { %696 = vmatpush.msra.mxu2 %v4684_v1  ;;  %680 = vmatpush.msra.mxu1 %v7928_v49 }
  0xb2   :  { %697 = vmatpush.msra.mxu2 %v4696_v3 }
  0xb4   :  { %698 = vmatpush.msra.mxu2 %v4719_v7 }
  0xb6   :  { %443 = vmatmul.f32.vlgmr.msrb.gmra.mxu0 %v7735_v36  ;;  %463 = vmatmul.f32.vlgmr.msrb.gmra.mxu1 %v7735_v36 }
  0xb7   :  { %483 = vmatmul.f32.vlgmr.msrb.gmra.mxu2 %v7735_v36  ;;  %503 = vmatmul.f32.vlgmr.msrb.gmra.mxu3 %v7735_v36  ;;  %v7930_v36 = vld [vmem:[#allocation6_spill] sm:$0xff] }
  0xb8   :  { %699 = vmatpush.msra.mxu2 %v4731_v39  ;;  %681 = vmatpush.msra.mxu1 %v7930_v36 }
  0xb9   :  { %866 = vmatpush.msrb.mxu0 %v4369_v9  ;;  %926 = vmatpush.msrb.mxu3 %v4391_v13 }
  0xba   :  { %700 = vmatpush.msra.mxu2 %v4755_v40  ;;  %886 = vmatpush.msrb.mxu1 %v4374_v10 }
  0xbb   :  { %867 = vmatpush.msrb.mxu0 %v4379_v11  ;;  %927 = vmatpush.msrb.mxu3 %v4409_v16 }
  0xbc   :  { %701 = vmatpush.msra.mxu2 %v4771_v58  ;;  %887 = vmatpush.msrb.mxu1 %v4386_v12 }
  0xbd   :  { %868 = vmatpush.msrb.mxu0 %v4399_v14  ;;  %928 = vmatpush.msrb.mxu3 %v4426_v19 }
  0xbe   :  { %906 = vmatpush.msrb.mxu2 %v4435_v20  ;;  %888 = vmatpush.msrb.mxu1 %v4404_v15 }
  0xbf   :  { %869 = vmatpush.msrb.mxu0 %v4416_v17  ;;  %929 = vmatpush.msrb.mxu3 %v4451_v23 }
  0xc0   :  { %907 = vmatpush.msrb.mxu2 %v4458_v24  ;;  %889 = vmatpush.msrb.mxu1 %v4421_v18 }
  0xc1   :  { %870 = vmatpush.msrb.mxu0 %v4441_v21  ;;  %930 = vmatpush.msrb.mxu3 %v4475_v27 }
  0xc2   :  { %908 = vmatpush.msrb.mxu2 %v4480_v28  ;;  %890 = vmatpush.msrb.mxu1 %v4446_v22 }
  0xc3   :  { %871 = vmatpush.msrb.mxu0 %v4463_v25  ;;  %931 = vmatpush.msrb.mxu3 %v4499_v32 }
  0xc4   :  { %909 = vmatpush.msrb.mxu2 %v4506_v33  ;;  %891 = vmatpush.msrb.mxu1 %v4468_v26 }
  0xc5   :  { %872 = vmatpush.msrb.mxu0 %v4489_v30  ;;  %932 = vmatpush.msrb.mxu3 %v4525_v37 }
  0xc6   :  { %910 = vmatpush.msrb.mxu2 %v4530_v38  ;;  %892 = vmatpush.msrb.mxu1 %v4494_v31  ;;  %v150_v38 = vld [vmem:[%s7721_s5] sm:$0xf] }
  0xc7   :  { %873 = vmatpush.msrb.mxu0 %v4511_v34  ;;  %933 = vmatpush.msrb.mxu3 %v4554_v43  ;;  %v4979_v43 = vperm.slane %v150_v38, 1 }
  0xc8   :  { %911 = vmatpush.msrb.mxu2 %v4561_v44  ;;  %893 = vmatpush.msrb.mxu1 %v4516_v35 }
  0xc9   :  { %874 = vmatpush.msrb.mxu0 %v4544_v41  ;;  %934 = vmatpush.msrb.mxu3 %v4578_v47  ;;  %7949 = vst [vmem:[#allocation22_spill] sm:$0xff] %v4979_v43 }
  0xca   :  { %912 = vmatpush.msrb.mxu2 %v4583_v48  ;;  %894 = vmatpush.msrb.mxu1 %v4549_v42  ;;  %v4977_v42 = vperm.slane %v150_v38, 0 }
  0xcb   :  { %875 = vmatpush.msrb.mxu0 %v4566_v45  ;;  %935 = vmatpush.msrb.mxu3 %v4607_v52 }
  0xcc   :  { %913 = vmatpush.msrb.mxu2 %v4614_v53  ;;  %895 = vmatpush.msrb.mxu1 %v4571_v46  ;;  %7948 = vst [vmem:[#allocation21_spill] sm:$0xff] %v4977_v42  ;;  %v4987_v53 = vperm.slane %v150_v38, 3 }
  0xcd   :  { %876 = vmatpush.msrb.mxu0 %v4597_v50  ;;  %936 = vmatpush.msrb.mxu3 %v4631_v56 }
  0xce   :  { %914 = vmatpush.msrb.mxu2 %v4636_v57  ;;  %896 = vmatpush.msrb.mxu1 %v4602_v51  ;;  %7952 = vst [vmem:[#allocation25_spill] sm:$0xff] %v4987_v53 }
  0xcf   :  { %877 = vmatpush.msrb.mxu0 %v4619_v54  ;;  %937 = vmatpush.msrb.mxu3 %v4660_v61 }
  0xd0   :  { %915 = vmatpush.msrb.mxu2 %v4667_v62  ;;  %897 = vmatpush.msrb.mxu1 %v4624_v55 }
  0xd1   :  { %878 = vmatpush.msrb.mxu0 %v4650_v59  ;;  %938 = vmatpush.msrb.mxu3 %v4689_v2  ;;  %v4992_v2 = vperm.slane %v150_v38, 2 }
  0xd2   :  { %916 = vmatpush.msrb.mxu2 %v4684_v1  ;;  %898 = vmatpush.msrb.mxu1 %v4655_v60 }
  0xd3   :  { %879 = vmatpush.msrb.mxu0 %v4672_v63  ;;  %939 = vmatpush.msrb.mxu3 %v4726_v29  ;;  %7954 = vst [vmem:[#allocation27_spill] sm:$0xff] %v4992_v2 }
  0xd4   :  { %917 = vmatpush.msrb.mxu2 %v4696_v3  ;;  %899 = vmatpush.msrb.mxu1 %v4677_v0 }
  0xd5   :  { %880 = vmatpush.msrb.mxu0 %v4709_v5  ;;  %940 = vmatpush.msrb.mxu3 %v4748_v4 }
  0xd6   :  { %918 = vmatpush.msrb.mxu2 %v4719_v7  ;;  %900 = vmatpush.msrb.mxu1 %v7928_v49 }
  0xd7   :  { %881 = vmatpush.msrb.mxu0 %v7929_v8  ;;  %941 = vmatpush.msrb.mxu3 %v4760_v6 }
  0xd8   :  { %919 = vmatpush.msrb.mxu2 %v4731_v39  ;;  %901 = vmatpush.msrb.mxu1 %v7930_v36 }
  0xda   :  { %920 = vmatpush.msrb.mxu2 %v4755_v40 }
  0xdc   :  { %921 = vmatpush.msrb.mxu2 %v4771_v58 }
  0xf3   :  { %v177_v9 = vpop.f32.mrf.mxu0  ;;  %v218_v10 = vpop.f32.mrf.mxu1 }
  0xf4   :  { %v178_v45 = vadd.f32 %v177_v9, %v4977_v42  ;;  %v219_v46 = vadd.f32 %v218_v10, %v4979_v43 }
  0xfa   :  { %v259_v11 = vpop.f32.mrf.mxu2  ;;  %v300_v12 = vpop.f32.mrf.mxu3 }
  0xfb   :  { %v4924_v13 = vpop.f32.mrf.mxu0  ;;  %v4926_v14 = vpop.f32.mrf.mxu1  ;;  %v301_v56 = vadd.f32 %v300_v12, %v4987_v53  ;;  %v260_v6 = vadd.f32 %v259_v11, %v4992_v2 }
 0x102   :  { %v4928_v15 = vpop.f32.mrf.mxu2  ;;  %v4930_v16 = vpop.f32.mrf.mxu3 }
 0x103   :  { %v4932_v17 = vpop.f32.mrf.mxu0  ;;  %v4934_v18 = vpop.f32.mrf.mxu1 }
 0x10a   :  { %v4936_v19 = vpop.f32.mrf.mxu2  ;;  %v4938_v20 = vpop.f32.mrf.mxu3 }
 0x10b   :  { %v4940_v21 = vpop.f32.mrf.mxu0  ;;  %v4942_v22 = vpop.f32.mrf.mxu1 }
 0x10c   :  { %7931 = vst [vmem:[#allocation4_spill] sm:$0xff] %v4940_v21  ;;  %v5372_v21 = vld [vmem:[%s7720_s3 + $0x28] sm:$0xff] }
 0x10d   :  { %7932 = vst [vmem:[#allocation5_spill] sm:$0xff] %v4942_v22  ;;  %v5353_v22 = vld [vmem:[%s7720_s3 + $0x50] sm:$0xff] }
 0x10e   :  { %7973 = vst [vmem:[#allocation46_spill] sm:$0xff] %v5353_v22 }
 0x10f   :  { %7976 = vst [vmem:[#allocation49_spill] sm:$0xff] %v5372_v21 }
 0x112   :  { %v4944_v23 = vpop.f32.mrf.mxu2  ;;  %v4946_v24 = vpop.f32.mrf.mxu3 }
 0x113   :  { %7933 = vst [vmem:[#allocation6_spill] sm:$0xff] %v4944_v23  ;;  %v4948_v25 = vpop.f32.mrf.mxu0  ;;  %v4950_v26 = vpop.f32.mrf.mxu1 }
 0x114   :  { %7934 = vst [vmem:[#allocation7_spill] sm:$0xff] %v4946_v24  ;;  %v5343_v24 = vld [vmem:[%s7720_s3 + $0x40] sm:$0xff] }
 0x115   :  { %7935 = vst [vmem:[#allocation8_spill] sm:$0xff] %v4948_v25  ;;  %v5329_v25 = vld [vmem:[%s7720_s3 + $0x70] sm:$0xff] }
 0x116   :  { %7936 = vst [vmem:[#allocation9_spill] sm:$0xff] %v4950_v26  ;;  %v5324_v26 = vld [vmem:[%s7720_s3 + $0x68] sm:$0xff] }
 0x117   :  { %7969 = vst [vmem:[#allocation42_spill] sm:$0xff] %v5329_v25 }
 0x118   :  { %7971 = vst [vmem:[#allocation44_spill] sm:$0xff] %v5343_v24 }
 0x11a   :  { %v4952_v27 = vpop.f32.mrf.mxu3  ;;  %v4958_v31 = vpop.f32.mrf.mxu2 }
 0x11b   :  { %7937 = vst [vmem:[#allocation10_spill] sm:$0xff] %v4952_v27  ;;  %v4954_v28 = vpop.f32.mrf.mxu0  ;;  %v4956_v30 = vpop.f32.mrf.mxu1  ;;  %v307_v27 = vadd.f32 %v4938_v20, %v4987_v53 }
 0x11c   :  { %7938 = vst [vmem:[#allocation11_spill] sm:$0xff] %v4954_v28  ;;  %v5293_v28 = vld [vmem:[%s7720_s3 + $0x80] sm:$0xff] }
 0x11d   :  { %7939 = vst [vmem:[#allocation12_spill] sm:$0xff] %v4956_v30  ;;  %v5286_v30 = vld [vmem:[%s7720_s3 + $0xb8] sm:$0xff] }
 0x11e   :  { %7940 = vst [vmem:[#allocation13_spill] sm:$0xff] %v4958_v31  ;;  %v5310_v31 = vld [vmem:[%s7720_s3 + $0x98] sm:$0xff] }
 0x122   :  { %v4960_v32 = vpop.f32.mrf.mxu3  ;;  %v4966_v35 = vpop.f32.mrf.mxu2 }
 0x123   :  { %7941 = vst [vmem:[#allocation14_spill] sm:$0xff] %v4960_v32  ;;  %v4962_v33 = vpop.f32.mrf.mxu0  ;;  %v4964_v34 = vpop.f32.mrf.mxu1  ;;  %v5269_v32 = vld [vmem:[%s7720_s3 + $0xa0] sm:$0xff] }
 0x124   :  { %7942 = vst [vmem:[#allocation15_spill] sm:$0xff] %v4962_v33 }
 0x125   :  { %7943 = vst [vmem:[#allocation16_spill] sm:$0xff] %v4964_v34 }
 0x126   :  { %7944 = vst [vmem:[#allocation17_spill] sm:$0xff] %v4966_v35  ;;  %v5262_v35 = vld [vmem:[%s7720_s3 + $0xd8] sm:$0xff] }
 0x12a   :  { %v4968_v37 = vpop.f32.mrf.mxu3  ;;  %v4981_v44 = vpop.f32.mrf.mxu2 }
 0x12b   :  { %7945 = vst [vmem:[#allocation18_spill] sm:$0xff] %v4968_v37  ;;  %v4973_v40 = vpop.f32.mrf.mxu0  ;;  %v4975_v41 = vpop.f32.mrf.mxu1  ;;  %v5255_v37 = vld [vmem:[%s7720_s3 + $0xd0] sm:$0xff] }
 0x12c   :  { %7946 = vst [vmem:[#allocation19_spill] sm:$0xff] %v4973_v40  ;;  %v225_v40 = vadd.f32 %v4934_v18, %v4979_v43  ;;  %v5250_v18 = vld [vmem:[%s7720_s3 + $0xc8] sm:$0xff] }
 0x12d   :  { %7947 = vst [vmem:[#allocation20_spill] sm:$0xff] %v4975_v41  ;;  %v184_v41 = vadd.f32 %v4932_v17, %v4977_v42  ;;  %v5245_v17 = vld [vmem:[%s7720_s3 + $0xc0] sm:$0xff] }
 0x12e   :  { %7950 = vst [vmem:[#allocation23_spill] sm:$0xff] %v4981_v44 }
 0x132   :  { %v4985_v47 = vpop.f32.mrf.mxu3  ;;  %v4990_v57 = vpop.f32.mrf.mxu2 }
 0x133   :  { %7951 = vst [vmem:[#allocation24_spill] sm:$0xff] %v4985_v47  ;;  %v444_v48 = vpop.f32.mrf.mxu0  ;;  %v464_v50 = vpop.f32.mrf.mxu1  ;;  %v5227_v47 = vld [vmem:[%s7720_s3 + $0xf0] sm:$0xff] }
 0x134   :  { %v507_v51 = vadd.f32 %v444_v48, %v178_v45  ;;  %v508_v52 = vadd.f32 %v464_v50, %v219_v46  ;;  %7953 = vst [vmem:[#allocation26_spill] sm:$0xff] %v4990_v57  ;;  %v5222_v57 = vld [vmem:[%s7720_s3 + $0xe8] sm:$0xff] }
 0x136   :  { %v3726_v54 = vmul.f32 -1.442695, %v507_v51  ;;  %v3727_v55 = vmul.f32 -1.442695, %v508_v52 }
 0x138   :  { %3782 = vpow2.f32 %v3726_v54 }
 0x139   :  { %3784 = vpow2.f32 %v3727_v55 }
 0x13a   :  { %v504_v59 = vpop.f32.mrf.mxu3  ;;  %v484_v3 = vpop.f32.mrf.mxu2 }
 0x13b   :  { %v510_v60 = vadd.f32 %v504_v59, %v301_v56  ;;  %v509_v39 = vadd.f32 %v484_v3, %v260_v6 }
 0x13d   :  { %v3728_v61 = vmul.f32 -1.442695, %v510_v60 }
 0x13e   :  { %v3783_v62 = vpop.eup %3782 }
 0x13f   :  { %v3785_v63 = vpop.eup %3784  ;;  %v514_v0 = vadd.f32 1.0, %v3783_v62  ;;  %3786 = vpow2.f32 %v3728_v61 }
 0x140   :  { %v533_v1 = vadd.f32 1.0, %v3785_v63 }
 0x141   :  { %3788 = vrcp.f32 %v514_v0  ;;  %v526_v9 = vand.u32 2147483648, %v514_v0  ;;  %v524_v38 = vand.u32 2147483647, %v514_v0  ;;  %vm520_vm10 = vweird.f32 %v514_v0 }
 0x142   :  { %3790 = vrcp.f32 %v533_v1  ;;  %v545_v10 = vand.u32 2147483648, %v533_v1  ;;  %v543_v46 = vand.u32 2147483647, %v533_v1  ;;  %vm539_vm11 = vweird.f32 %v533_v1 }
 0x143   :  { %v527_v50 = vor.u32 1.1754944e-38, %v526_v9  ;;  %vm525_vm13 = vcmp.eq.f32.partialorder %v524_v38, 8.507059e+37 }
 0x144   :  { %v546_v54 = vor.u32 1.1754944e-38, %v545_v10  ;;  %vm544_vm15 = vcmp.eq.f32.partialorder %v543_v46, 8.507059e+37 }
 0x145   :  { %v3787_v5 = vpop.eup %3786 }
 0x146   :  { %v553_v7 = vadd.f32 1.0, %v3787_v5 }
 0x147   :  { %v3789_v29 = vpop.eup %3788 }
 0x148   :  { %v3791_v58 = vpop.eup %3790  ;;  %v516_v4 = vmul.f32 %v3789_v29, %v514_v0  ;;  %3792 = vrcp.f32 %v553_v7  ;;  %vm521_vm8 = vweird.f32 %v3789_v29  ;;  %vm559_vm1 = vweird.f32 %v553_v7 }
 0x149   :  { %v535_v36 = vmul.f32 %v3791_v58, %v533_v1  ;;  %3794 = vtanh.f32 %v509_v39  ;;  %vm540_vm9 = vweird.f32 %v3791_v58  ;;  %vm522_vm12 = vmor %vm520_vm10, %vm521_vm8  ;;  %v565_v1 = vand.u32 2147483648, %v553_v7 }
 0x14a   :  { %v517_v49 = vsub.f32 1.0, %v516_v4  ;;  %vm541_vm14 = vmor %vm539_vm11, %vm540_vm9 }
 0x14b   :  { %v536_v8 = vsub.f32 1.0, %v535_v36  ;;  %v566_v4 = vor.u32 1.1754944e-38, %v565_v1 }
 0x14c   :  { %v518_v12 = vmul.f32 %v3789_v29, %v517_v49 }
 0x14d   :  { %v537_v45 = vmul.f32 %v3791_v58, %v536_v8  ;;  %v181_v8 = vadd.f32 %v4924_v13, %v4977_v42  ;;  %v5377_v42 = vld [vmem:[%s7720_s3 + $0x30] sm:$0xff] }
 0x14e   :  { %v3793_v48 = vpop.eup %3792  ;;  %v519_v11 = vadd.f32 %v3789_v29, %v518_v12 }
 0x14f   :  { %v538_v51 = vadd.f32 %v3791_v58, %v537_v45  ;;  %v555_v52 = vmul.f32 %v3793_v48, %v553_v7  ;;  %v3795_v56 = vpop.eup %3794  ;;  %vm560_vm0 = vweird.f32 %v3793_v48 }
 0x150   :  { %v523_v55 = vsel %vm522_vm12, %v3789_v29, %v519_v11  ;;  %v563_v29 = vand.u32 2147483647, %v553_v7  ;;  %vm561_vm2 = vmor %vm559_vm1, %vm560_vm0  ;;  %v222_v7 = vadd.f32 %v4926_v14, %v4979_v43  ;;  %v5367_v43 = vld [vmem:[%s7720_s3 + $0x20] sm:$0xff] }
 0x151   :  { %v528_v59 = vsel %vm525_vm13, %v527_v50, %v523_v55  ;;  %v542_v60 = vsel %vm541_vm14, %v3791_v58, %v538_v51  ;;  %v556_v61 = vsub.f32 1.0, %v555_v52  ;;  %7975 = vst [vmem:[#allocation48_spill] sm:$0xff] %v5367_v43 }
 0x152   :  { %v547_v62 = vsel %vm544_vm15, %v546_v54, %v542_v60  ;;  %v570_v63 = vmul.f32 %v3795_v56, %v528_v59  ;;  %vm564_vm3 = vcmp.eq.f32.partialorder %v563_v29, 8.507059e+37  ;;  %v263_v59 = vadd.f32 %v4928_v15, %v4992_v2 }
 0x153   :  { %v569_v3 = vmul.f32 0.0, %v547_v62  ;;  %v557_v5 = vmul.f32 %v3793_v48, %v556_v61 }
 0x155   :  { %v4995_v6 = vadd.f32 %v570_v63, %v569_v3  ;;  %v558_v0 = vadd.f32 %v3793_v48, %v557_v5 }
 0x157   :  { %3796 = vtanh.f32 %v4995_v6  ;;  %v562_v39 = vsel %vm561_vm2, %v3793_v48, %v558_v0  ;;  %v304_v48 = vadd.f32 %v4930_v16, %v4987_v53  ;;  %v5348_v53 = vld [vmem:[%s7720_s3 + $0x48] sm:$0xff] }
 0x158   :  { %v567_v36 = vsel %vm564_vm3, %v566_v4, %v562_v39  ;;  %7972 = vst [vmem:[#allocation45_spill] sm:$0xff] %v5348_v53 }
 0x15d   :  { %v3797_v58 = vpop.eup %3796 }
 0x15e   :  { %v4998_v49 = vmul.f32 %v3797_v58, %v567_v36 }
 0x160   :  { %7955 = vst [vmem:[#allocation28_spill] sm:$0xff] %v4998_v49  ;;  %662 = vmatmul.f32.vlgmr.msra.gmra.mxu0 %v4998_v49  ;;  %682 = vmatmul.f32.vlgmr.msra.gmra.mxu1 %v4998_v49 }
 0x161   :  { %702 = vmatmul.f32.vlgmr.msra.gmra.mxu2 %v4998_v49  ;;  %722 = vmatmul.f32.vlgmr.msra.gmra.mxu3 %v4998_v49 }
 0x1dd   :  { %v663_v9 = vpop.f32.mrf.mxu0  ;;  %v683_v10 = vpop.f32.mrf.mxu1 }
 0x1de   :  { %v726_v12 = vadd.f32 %v663_v9, %v181_v8  ;;  %v727_v38 = vadd.f32 %v683_v10, %v222_v7 }
 0x1e0   :  { %v3729_v45 = vmul.f32 -1.442695, %v726_v12  ;;  %v3730_v46 = vmul.f32 -1.442695, %v727_v38 }
 0x1e2   :  { %3798 = vpow2.f32 %v3729_v45 }
 0x1e3   :  { %3800 = vpow2.f32 %v3730_v46 }
 0x1e4   :  { %v723_v11 = vpop.f32.mrf.mxu3  ;;  %v703_v14 = vpop.f32.mrf.mxu2 }
 0x1e5   :  { %v729_v50 = vadd.f32 %v723_v11, %v304_v48  ;;  %v728_v62 = vadd.f32 %v703_v14, %v263_v59 }
 0x1e7   :  { %v3731_v51 = vmul.f32 -1.442695, %v729_v50 }
 0x1e8   :  { %v3799_v52 = vpop.eup %3798 }
 0x1e9   :  { %v3801_v54 = vpop.eup %3800  ;;  %v733_v13 = vadd.f32 1.0, %v3799_v52  ;;  %3802 = vpow2.f32 %v3731_v51 }
 0x1ea   :  { %v752_v55 = vadd.f32 1.0, %v3801_v54 }
 0x1eb   :  { %3804 = vrcp.f32 %v733_v13  ;;  %v745_v1 = vand.u32 2147483648, %v733_v13  ;;  %v743_v4 = vand.u32 2147483647, %v733_v13  ;;  %vm739_vm6 = vweird.f32 %v733_v13 }
 0x1ec   :  { %3806 = vrcp.f32 %v752_v55  ;;  %v764_v29 = vand.u32 2147483648, %v752_v55  ;;  %v762_v36 = vand.u32 2147483647, %v752_v55  ;;  %vm758_vm7 = vweird.f32 %v752_v55 }
 0x1ed   :  { %v746_v7 = vor.u32 1.1754944e-38, %v745_v1  ;;  %vm744_vm10 = vcmp.eq.f32.partialorder %v743_v4, 8.507059e+37  ;;  %v5054_v1 = vld [vmem:[%s7720_s3 + $0x1c8] sm:$0xff]  ;;  %v5073_v4 = vld [vmem:[%s7720_s3 + $0x1a0] sm:$0xff] }
 0x1ee   :  { %v765_v12 = vor.u32 1.1754944e-38, %v764_v29  ;;  %vm763_vm11 = vcmp.eq.f32.partialorder %v762_v36, 8.507059e+37  ;;  %7961 = vst [vmem:[#allocation34_spill] sm:$0xff] %v5054_v1  ;;  %v5059_v29 = vld [vmem:[%s7720_s3 + $0x1d0] sm:$0xff] }
 0x1ef   :  { %v3803_v56 = vpop.eup %3802  ;;  %v5083_v36 = vld [vmem:[%s7720_s3 + $0x1b0] sm:$0xff] }
 0x1f0   :  { %v772_v60 = vadd.f32 1.0, %v3803_v56 }
 0x1f1   :  { %v3805_v61 = vpop.eup %3804 }
 0x1f2   :  { %v3807_v16 = vpop.eup %3806  ;;  %v735_v63 = vmul.f32 %v3805_v61, %v733_v13  ;;  %3808 = vrcp.f32 %v772_v60  ;;  %vm740_vm4 = vweird.f32 %v3805_v61  ;;  %v784_v14 = vand.u32 2147483648, %v772_v60 }
 0x1f3   :  { %v754_v3 = vmul.f32 %v3807_v16, %v752_v55  ;;  %3810 = vtanh.f32 %v728_v62  ;;  %vm759_vm5 = vweird.f32 %v3807_v16  ;;  %vm741_vm8 = vmor %vm739_vm6, %vm740_vm4  ;;  %vm778_vm13 = vweird.f32 %v772_v60 }
 0x1f4   :  { %v736_v5 = vsub.f32 1.0, %v735_v63  ;;  %vm760_vm9 = vmor %vm758_vm7, %vm759_vm5  ;;  %v782_v56 = vand.u32 2147483647, %v772_v60 }
 0x1f5   :  { %v755_v0 = vsub.f32 1.0, %v754_v3  ;;  %v5035_v3 = vld [vmem:[%s7720_s3 + $0x1f0] sm:$0xff] }
 0x1f6   :  { %v737_v39 = vmul.f32 %v3805_v61, %v736_v5  ;;  %vm783_vm15 = vcmp.eq.f32.partialorder %v782_v56, 8.507059e+37  ;;  %7958 = vst [vmem:[#allocation31_spill] sm:$0xff] %v5035_v3  ;;  %v5042_v5 = vld [vmem:[%s7720_s3 + $0x1f8] sm:$0xff]  ;;  %1126 = vmatpush.msra.mxu2 %v5035_v3  ;;  %v5193_v56 = vld [vmem:[%s7720_s3 + $0x100] sm:$0xff] }
 0x1f7   :  { %v756_v58 = vmul.f32 %v3807_v16, %v755_v0  ;;  %7959 = vst [vmem:[#allocation32_spill] sm:$0xff] %v5042_v5  ;;  %1146 = vmatpush.msra.mxu3 %v5042_v5  ;;  %v5049_v0 = vld [vmem:[%s7720_s3 + $0x1c0] sm:$0xff] }
 0x1f8   :  { %v3809_v8 = vpop.eup %3808  ;;  %v738_v15 = vadd.f32 %v3805_v61, %v737_v39  ;;  %7960 = vst [vmem:[#allocation33_spill] sm:$0xff] %v5049_v0  ;;  %v5066_v39 = vld [vmem:[%s7720_s3 + $0x1d8] sm:$0xff]  ;;  %1127 = vmatpush.msra.mxu2 %v5059_v29 }
 0x1f9   :  { %v757_v9 = vadd.f32 %v3807_v16, %v756_v58  ;;  %v774_v10 = vmul.f32 %v3809_v8, %v772_v60  ;;  %v3811_v45 = vpop.eup %3810  ;;  %vm779_vm12 = vweird.f32 %v3809_v8  ;;  %v5030_v60 = vld [vmem:[%s7720_s3 + $0x1e8] sm:$0xff]  ;;  %1147 = vmatpush.msra.mxu3 %v5066_v39 }
 0x1fa   :  { %v742_v38 = vsel %vm741_vm8, %v3805_v61, %v738_v15  ;;  %vm780_vm14 = vmor %vm778_vm13, %vm779_vm12  ;;  %v785_v61 = vor.u32 1.1754944e-38, %v784_v14  ;;  %1106 = vmatpush.msra.mxu1 %v5030_v60  ;;  %v5078_v58 = vld [vmem:[%s7720_s3 + $0x1a8] sm:$0xff]  ;;  %1128 = vmatpush.msra.mxu2 %v5083_v36  ;;  %v5097_v15 = vld [vmem:[%s7720_s3 + $0x180] sm:$0xff] }
 0x1fb   :  { %v747_v46 = vsel %vm744_vm10, %v746_v7, %v742_v38  ;;  %v761_v48 = vsel %vm760_vm9, %v3807_v16, %v757_v9  ;;  %v775_v11 = vsub.f32 1.0, %v774_v10  ;;  %v5102_v7 = vld [vmem:[%s7720_s3 + $0x188] sm:$0xff]  ;;  %v5107_v9 = vld [vmem:[%s7720_s3 + $0x190] sm:$0xff]  ;;  %v5114_v10 = vld [vmem:[%s7720_s3 + $0x198] sm:$0xff] }
 0x1fc   :  { %v766_v50 = vsel %vm763_vm11, %v765_v12, %v761_v48  ;;  %v789_v51 = vmul.f32 %v3811_v45, %v747_v46  ;;  %1107 = vmatpush.msra.mxu1 %v5054_v1  ;;  %7962 = vst [vmem:[#allocation35_spill] sm:$0xff] %v5102_v7  ;;  %1129 = vmatpush.msra.mxu2 %v5107_v9  ;;  %v5121_v12 = vld [vmem:[%s7720_s3 + $0x160] sm:$0xff]  ;;  %v5126_v38 = vld [vmem:[%s7720_s3 + $0x168] sm:$0xff]  ;;  %v5131_v45 = vld [vmem:[%s7720_s3 + $0x170] sm:$0xff] }
 0x1fd   :  { %v788_v52 = vmul.f32 %v766_v50, %v4995_v6  ;;  %v776_v54 = vmul.f32 %v3809_v8, %v775_v11  ;;  %v5025_v6 = vld [vmem:[%s7720_s3 + $0x1e0] sm:$0xff]  ;;  %7963 = vst [vmem:[#allocation36_spill] sm:$0xff] %v5107_v9  ;;  %v5138_v46 = vld [vmem:[%s7720_s3 + $0x178] sm:$0xff]  ;;  %v5150_v11 = vld [vmem:[%s7720_s3 + $0x148] sm:$0xff] }
 0x1fe   :  { %7957 = vst [vmem:[#allocation30_spill] sm:$0xff] %v5025_v6  ;;  %1086 = vmatpush.msra.mxu0 %v5025_v6  ;;  %1108 = vmatpush.msra.mxu1 %v5078_v58  ;;  %v5145_v48 = vld [vmem:[%s7720_s3 + $0x140] sm:$0xff]  ;;  %v5155_v50 = vld [vmem:[%s7720_s3 + $0x150] sm:$0xff]  ;;  %v5186_v14 = vld [vmem:[%s7720_s3 + $0x138] sm:$0xff] }
 0x1ff   :  { %v5013_v13 = vadd.f32 %v789_v51, %v788_v52  ;;  %v777_v55 = vadd.f32 %v3809_v8, %v776_v54  ;;  %7964 = vst [vmem:[#allocation37_spill] sm:$0xff] %v5138_v46  ;;  %1130 = vmatpush.msra.mxu2 %v5131_v45  ;;  %v5162_v51 = vld [vmem:[%s7720_s3 + $0x158] sm:$0xff]  ;;  %v5169_v52 = vld [vmem:[%s7720_s3 + $0x120] sm:$0xff]  ;;  %v5174_v54 = vld [vmem:[%s7720_s3 + $0x128] sm:$0xff] }
 0x200   :  { %1087 = vmatpush.msra.mxu0 %v5049_v0  ;;  %1109 = vmatpush.msra.mxu1 %v5102_v7  ;;  %7965 = vst [vmem:[#allocation38_spill] sm:$0xff] %v5155_v50 }
 0x201   :  { %3812 = vtanh.f32 %v5013_v13  ;;  %v781_v59 = vsel %vm780_vm14, %v3809_v8, %v777_v55  ;;  %v5090_v8 = vld [vmem:[%s7720_s3 + $0x1b8] sm:$0xff]  ;;  %1131 = vmatpush.msra.mxu2 %v5155_v50  ;;  %7966 = vst [vmem:[#allocation39_spill] sm:$0xff] %v5174_v54  ;;  %v5179_v55 = vld [vmem:[%s7720_s3 + $0x130] sm:$0xff] }
 0x202   :  { %v786_v16 = vsel %vm783_vm15, %v785_v61, %v781_v59  ;;  %1088 = vmatpush.msra.mxu0 %v5073_v4  ;;  %1148 = vmatpush.msra.mxu3 %v5090_v8  ;;  %7967 = vst [vmem:[#allocation40_spill] sm:$0xff] %v5179_v55  ;;  %v5198_v59 = vld [vmem:[%s7720_s3 + $0x108] sm:$0xff]  ;;  %v5203_v61 = vld [vmem:[%s7720_s3 + $0x110] sm:$0xff] }
 0x203   :  { %1110 = vmatpush.msra.mxu1 %v5126_v38  ;;  %7968 = vst [vmem:[#allocation41_spill] sm:$0xff] %v5186_v14  ;;  %1132 = vmatpush.msra.mxu2 %v5179_v55 }
 0x204   :  { %1089 = vmatpush.msra.mxu0 %v5097_v15  ;;  %1149 = vmatpush.msra.mxu3 %v5114_v10 }
 0x205   :  { %1111 = vmatpush.msra.mxu1 %v5150_v11  ;;  %1133 = vmatpush.msra.mxu2 %v5203_v61 }
 0x206   :  { %1090 = vmatpush.msra.mxu0 %v5121_v12  ;;  %1150 = vmatpush.msra.mxu3 %v5138_v46 }
 0x207   :  { %v3813_v62 = vpop.eup %3812  ;;  %1112 = vmatpush.msra.mxu1 %v5174_v54  ;;  %1134 = vmatpush.msra.mxu2 %v5227_v47 }
 0x208   :  { %v5016_v63 = vmul.f32 %v3813_v62, %v786_v16  ;;  %1091 = vmatpush.msra.mxu0 %v5145_v48  ;;  %1151 = vmatpush.msra.mxu3 %v5162_v51  ;;  %v5210_v62 = vld [vmem:[%s7720_s3 + $0x118] sm:$0xff]  ;;  %v5217_v16 = vld [vmem:[%s7720_s3 + $0xe0] sm:$0xff] }
 0x209   :  { %1113 = vmatpush.msra.mxu1 %v5198_v59  ;;  %1135 = vmatpush.msra.mxu2 %v5255_v37 }
 0x20a   :  { %7956 = vst [vmem:[#allocation29_spill] sm:$0xff] %v5016_v63  ;;  %882 = vmatmul.f32.vlgmr.msrb.gmra.mxu0 %v5016_v63  ;;  %902 = vmatmul.f32.vlgmr.msrb.gmra.mxu1 %v5016_v63 }
 0x20b   :  { %922 = vmatmul.f32.vlgmr.msrb.gmra.mxu2 %v5016_v63  ;;  %942 = vmatmul.f32.vlgmr.msrb.gmra.mxu3 %v5016_v63  ;;  %v5238_v63 = vld [vmem:[%s7720_s3 + $0xf8] sm:$0xff] }
 0x20c   :  { %1092 = vmatpush.msra.mxu0 %v5169_v52  ;;  %1152 = vmatpush.msra.mxu3 %v5186_v14 }
 0x20d   :  { %1114 = vmatpush.msra.mxu1 %v5222_v57 }
 0x20e   :  { %1093 = vmatpush.msra.mxu0 %v5193_v56  ;;  %1153 = vmatpush.msra.mxu3 %v5210_v62 }
 0x20f   :  { %1115 = vmatpush.msra.mxu1 %v5250_v18 }
 0x210   :  { %1094 = vmatpush.msra.mxu0 %v5217_v16  ;;  %1154 = vmatpush.msra.mxu3 %v5238_v63 }
 0x212   :  { %1095 = vmatpush.msra.mxu0 %v5245_v17  ;;  %1155 = vmatpush.msra.mxu3 %v5262_v35 }
 0x214   :  { %1096 = vmatpush.msra.mxu0 %v5269_v32  ;;  %1156 = vmatpush.msra.mxu3 %v5286_v30 }
 0x216   :  { %1097 = vmatpush.msra.mxu0 %v5293_v28  ;;  %1157 = vmatpush.msra.mxu3 %v5310_v31 }
 0x287   :  { %v883_v49 = vpop.f32.mrf.mxu0  ;;  %v903_v44 = vpop.f32.mrf.mxu1 }
 0x288   :  { %v946_v34 = vadd.f32 %v883_v49, %v184_v41  ;;  %v947_v33 = vadd.f32 %v903_v44, %v225_v40  ;;  %v5274_v40 = vld [vmem:[%s7720_s3 + $0xa8] sm:$0xff]  ;;  %v5279_v41 = vld [vmem:[%s7720_s3 + $0xb0] sm:$0xff] }
 0x289   :  { %1116 = vmatpush.msra.mxu1 %v5274_v40  ;;  %1136 = vmatpush.msra.mxu2 %v5279_v41 }
 0x28a   :  { %v3732_v44 = vmul.f32 -1.442695, %v946_v34  ;;  %v3733_v49 = vmul.f32 -1.442695, %v947_v33  ;;  %v5298_v33 = vld [vmem:[%s7720_s3 + $0x88] sm:$0xff]  ;;  %v5303_v34 = vld [vmem:[%s7720_s3 + $0x90] sm:$0xff] }
 0x28b   :  { %1117 = vmatpush.msra.mxu1 %v5298_v33  ;;  %1137 = vmatpush.msra.mxu2 %v5303_v34 }
 0x28c   :  { %3814 = vpow2.f32 %v3732_v44  ;;  %v5319_v44 = vld [vmem:[%s7720_s3 + $0x60] sm:$0xff] }
 0x28d   :  { %3816 = vpow2.f32 %v3733_v49  ;;  %1098 = vmatpush.msra.mxu0 %v5319_v44  ;;  %1118 = vmatpush.msra.mxu1 %v5324_v26  ;;  %v5336_v49 = vld [vmem:[%s7720_s3 + $0x78] sm:$0xff] }
 0x28e   :  { %v943_v20 = vpop.f32.mrf.mxu3  ;;  %7970 = vst [vmem:[#allocation43_spill] sm:$0xff] %v5336_v49  ;;  %1138 = vmatpush.msra.mxu2 %v5329_v25  ;;  %1158 = vmatpush.msra.mxu3 %v5336_v49 }
 0x28f   :  { %v949_v23 = vadd.f32 %v943_v20, %v307_v27  ;;  %1099 = vmatpush.msra.mxu0 %v5343_v24  ;;  %1119 = vmatpush.msra.mxu1 %v5348_v53  ;;  %v5360_v27 = vld [vmem:[%s7720_s3 + $0x58] sm:$0xff]  ;;  %v5394_v53 = vld [vmem:[%s7720_s3 + $0x8] sm:$0xff] }
 0x290   :  { %7974 = vst [vmem:[#allocation47_spill] sm:$0xff] %v5360_v27  ;;  %1139 = vmatpush.msra.mxu2 %v5353_v22  ;;  %1159 = vmatpush.msra.mxu3 %v5360_v27  ;;  %v5384_v27 = vld [vmem:[%s7720_s3 + $0x38] sm:$0xff]  ;;  %v5389_v22 = vld [vmem:[%s7720_s3] sm:$0xff] }
 0x291   :  { %v3734_v20 = vmul.f32 -1.442695, %v949_v23  ;;  %1100 = vmatpush.msra.mxu0 %v5367_v43  ;;  %1120 = vmatpush.msra.mxu1 %v5372_v21  ;;  %v5403_v21 = vld [vmem:[%s7720_s3 + $0x10] sm:$0xff]  ;;  %v5408_v43 = vld [vmem:[%s7720_s3 + $0x18] sm:$0xff] }
 0x292   :  { %v3815_v23 = vpop.eup %3814  ;;  %1140 = vmatpush.msra.mxu2 %v5377_v42  ;;  %1160 = vmatpush.msra.mxu3 %v5384_v27 }
 0x293   :  { %v3817_v24 = vpop.eup %3816  ;;  %v5396_v49 = vadd.f32 1.0, %v3815_v23  ;;  %3818 = vpow2.f32 %v3734_v20  ;;  %1101 = vmatpush.msra.mxu0 %v5389_v22  ;;  %1121 = vmatpush.msra.mxu1 %v5394_v53  ;;  %v266_v23 = vadd.f32 %v4936_v19, %v4992_v2 }
 0x294   :  { %v5410_v25 = vadd.f32 1.0, %v3817_v24  ;;  %1141 = vmatpush.msra.mxu2 %v5403_v21  ;;  %1161 = vmatpush.msra.mxu3 %v5408_v43  ;;  %v923_v24 = vpop.f32.mrf.mxu2 }
 0x295   :  { %3820 = vrcp.f32 %v5396_v49  ;;  %1306 = vmatpush.msrb.mxu0 %v5025_v6  ;;  %1326 = vmatpush.msrb.mxu1 %v5030_v60  ;;  %vm959_vm2 = vweird.f32 %v5396_v49 }
 0x296   :  { %3822 = vrcp.f32 %v5410_v25  ;;  %1346 = vmatpush.msrb.mxu2 %v5035_v3  ;;  %1366 = vmatpush.msrb.mxu3 %v5042_v5  ;;  %v948_v3 = vadd.f32 %v923_v24, %v266_v23  ;;  %v965_v23 = vand.u32 2147483648, %v5396_v49  ;;  %v984_v2 = vand.u32 2147483648, %v5410_v25 }
 0x297   :  { %1307 = vmatpush.msrb.mxu0 %v5049_v0  ;;  %1327 = vmatpush.msrb.mxu1 %v5054_v1  ;;  %vm978_vm3 = vweird.f32 %v5410_v25 }
 0x298   :  { %1347 = vmatpush.msrb.mxu2 %v5059_v29  ;;  %1367 = vmatpush.msrb.mxu3 %v5066_v39 }
 0x299   :  { %v3819_v20 = vpop.eup %3818  ;;  %1308 = vmatpush.msrb.mxu0 %v5073_v4  ;;  %1328 = vmatpush.msrb.mxu1 %v5078_v58 }
 0x29a   :  { %v5428_v6 = vadd.f32 1.0, %v3819_v20  ;;  %1348 = vmatpush.msrb.mxu2 %v5083_v36  ;;  %1368 = vmatpush.msrb.mxu3 %v5090_v8 }
 0x29b   :  { %v3821_v5 = vpop.eup %3820  ;;  %1309 = vmatpush.msrb.mxu0 %v5097_v15  ;;  %1329 = vmatpush.msrb.mxu1 %v5102_v7 }
 0x29c   :  { %v3823_v1 = vpop.eup %3822  ;;  %v955_v0 = vmul.f32 %v3821_v5, %v5396_v49  ;;  %3824 = vrcp.f32 %v5428_v6  ;;  %1349 = vmatpush.msrb.mxu2 %v5107_v9  ;;  %1369 = vmatpush.msrb.mxu3 %v5114_v10  ;;  %vm960_vm0 = vweird.f32 %v3821_v5  ;;  %v963_v9 = vand.u32 2147483647, %v5396_v49 }
 0x29d   :  { %v974_v19 = vmul.f32 %v3823_v1, %v5410_v25  ;;  %1310 = vmatpush.msrb.mxu0 %v5121_v12  ;;  %1330 = vmatpush.msrb.mxu1 %v5126_v38  ;;  %3826 = vtanh.f32 %v948_v3  ;;  %vm979_vm1 = vweird.f32 %v3823_v1  ;;  %vm961_vm4 = vmor %vm959_vm2, %vm960_vm0  ;;  %vm998_vm9 = vweird.f32 %v5428_v6 }
 0x29e   :  { %v956_v24 = vsub.f32 1.0, %v955_v0  ;;  %1350 = vmatpush.msrb.mxu2 %v5131_v45  ;;  %1370 = vmatpush.msrb.mxu3 %v5138_v46  ;;  %vm980_vm5 = vmor %vm978_vm3, %vm979_vm1  ;;  %vm964_vm6 = vcmp.eq.f32.partialorder %v963_v9, 8.507059e+37 }
 0x29f   :  { %v975_v20 = vsub.f32 1.0, %v974_v19  ;;  %1311 = vmatpush.msrb.mxu0 %v5145_v48  ;;  %1331 = vmatpush.msrb.mxu1 %v5150_v11  ;;  %v982_v19 = vand.u32 2147483647, %v5410_v25 }
 0x2a0   :  { %v957_v7 = vmul.f32 %v3821_v5, %v956_v24  ;;  %1351 = vmatpush.msrb.mxu2 %v5155_v50  ;;  %1371 = vmatpush.msrb.mxu3 %v5162_v51  ;;  %v966_v24 = vor.u32 1.1754944e-38, %v965_v23 }
 0x2a1   :  { %v976_v0 = vmul.f32 %v3823_v1, %v975_v20  ;;  %1312 = vmatpush.msrb.mxu0 %v5169_v52  ;;  %1332 = vmatpush.msrb.mxu1 %v5174_v54  ;;  %vm983_vm7 = vcmp.eq.f32.partialorder %v982_v19, 8.507059e+37  ;;  %v7980_v19 = vld [vmem:[#allocation45_spill] sm:$0xff] }
 0x2a2   :  { %v5453_v3 = vpop.eup %3824  ;;  %v958_v46 = vadd.f32 %v3821_v5, %v957_v7  ;;  %1352 = vmatpush.msrb.mxu2 %v5179_v55  ;;  %1372 = vmatpush.msrb.mxu3 %v5186_v14  ;;  %v985_v7 = vor.u32 1.1754944e-38, %v984_v2 }
 0x2a3   :  { %v977_v20 = vadd.f32 %v3823_v1, %v976_v0  ;;  %v994_v50 = vmul.f32 %v5453_v3, %v5428_v6  ;;  %1313 = vmatpush.msrb.mxu0 %v5193_v56  ;;  %1333 = vmatpush.msrb.mxu1 %v5198_v59  ;;  %v3827_v25 = vpop.eup %3826  ;;  %vm999_vm8 = vweird.f32 %v5453_v3 }
 0x2a4   :  { %v962_v49 = vsel %vm961_vm4, %v3821_v5, %v958_v46  ;;  %1353 = vmatpush.msrb.mxu2 %v5203_v61  ;;  %1373 = vmatpush.msrb.mxu3 %v5210_v62  ;;  %v1002_v46 = vand.u32 2147483647, %v5428_v6  ;;  %vm1000_vm10 = vmor %vm998_vm9, %vm999_vm8 }
 0x2a5   :  { %v967_v54 = vsel %vm964_vm6, %v966_v24, %v962_v49  ;;  %v981_v23 = vsel %vm980_vm5, %v3823_v1, %v977_v20  ;;  %v995_v0 = vsub.f32 1.0, %v994_v50  ;;  %1314 = vmatpush.msrb.mxu0 %v5217_v16  ;;  %1334 = vmatpush.msrb.mxu1 %v5222_v57  ;;  %v7982_v49 = vld [vmem:[#allocation47_spill] sm:$0xff] }
 0x2a6   :  { %v986_v55 = vsel %vm983_vm7, %v985_v7, %v981_v23  ;;  %v1009_v14 = vmul.f32 %v3827_v25, %v967_v54  ;;  %1354 = vmatpush.msrb.mxu2 %v5227_v47  ;;  %1374 = vmatpush.msrb.mxu3 %v5238_v63  ;;  %vm1003_vm11 = vcmp.eq.f32.partialorder %v1002_v46, 8.507059e+37  ;;  %v7981_v7 = vld [vmem:[#allocation46_spill] sm:$0xff]  ;;  %v7984_v25 = vld [vmem:[#allocation48_spill] sm:$0xff]  ;;  %v7985_v23 = vld [vmem:[#allocation49_spill] sm:$0xff] }
 0x2a7   :  { %v1008_v2 = vmul.f32 %v986_v55, %v5013_v13  ;;  %v996_v5 = vmul.f32 %v5453_v3, %v995_v0  ;;  %1315 = vmatpush.msrb.mxu0 %v5245_v17  ;;  %1335 = vmatpush.msrb.mxu1 %v5250_v18  ;;  %v1004_v13 = vand.u32 2147483648, %v5428_v6  ;;  %v7977_v55 = vld [vmem:[#allocation42_spill] sm:$0xff]  ;;  %v7979_v6 = vld [vmem:[#allocation44_spill] sm:$0xff] }
 0x2a8   :  { %1355 = vmatpush.msrb.mxu2 %v5255_v37  ;;  %1375 = vmatpush.msrb.mxu3 %v5262_v35  ;;  %v7986_v0 = vld [vmem:[#allocation30_spill] sm:$0xff]  ;;  %v7992_v46 = vld [vmem:[#allocation36_spill] sm:$0xff] }
 0x2a9   :  { %v5477_v1 = vadd.f32 %v1009_v14, %v1008_v2  ;;  %v997_v9 = vadd.f32 %v5453_v3, %v996_v5  ;;  %1316 = vmatpush.msrb.mxu0 %v5269_v32  ;;  %1336 = vmatpush.msrb.mxu1 %v5274_v40  ;;  %v1005_v54 = vor.u32 1.1754944e-38, %v1004_v13  ;;  %v7978_v14 = vld [vmem:[#allocation43_spill] sm:$0xff]  ;;  %v7988_v5 = vld [vmem:[#allocation32_spill] sm:$0xff]  ;;  %v7990_v13 = vld [vmem:[#allocation34_spill] sm:$0xff] }
 0x2aa   :  { %1356 = vmatpush.msrb.mxu2 %v5279_v41  ;;  %1376 = vmatpush.msrb.mxu3 %v5286_v30  ;;  %v7987_v2 = vld [vmem:[#allocation31_spill] sm:$0xff] }
 0x2ab   :  { %3828 = vtanh.f32 %v5477_v1  ;;  %1317 = vmatpush.msrb.mxu0 %v5293_v28  ;;  %1337 = vmatpush.msrb.mxu1 %v5298_v33  ;;  %v1001_v50 = vsel %vm1000_vm10, %v5453_v3, %v997_v9  ;;  %v7989_v9 = vld [vmem:[#allocation33_spill] sm:$0xff] }
 0x2ac   :  { %1357 = vmatpush.msrb.mxu2 %v5303_v34  ;;  %1377 = vmatpush.msrb.mxu3 %v5310_v31  ;;  %v1006_v20 = vsel %vm1003_vm11, %v1005_v54, %v1001_v50 }
 0x2ad   :  { %1318 = vmatpush.msrb.mxu0 %v5319_v44  ;;  %1338 = vmatpush.msrb.mxu1 %v5324_v26 }
 0x2ae   :  { %1358 = vmatpush.msrb.mxu2 %v7977_v55  ;;  %1378 = vmatpush.msrb.mxu3 %v7978_v14 }
 0x2af   :  { %1319 = vmatpush.msrb.mxu0 %v7979_v6  ;;  %1339 = vmatpush.msrb.mxu1 %v7980_v19 }
 0x2b0   :  { %1359 = vmatpush.msrb.mxu2 %v7981_v7  ;;  %1379 = vmatpush.msrb.mxu3 %v7982_v49 }
 0x2b1   :  { %v3829_v24 = vpop.eup %3828  ;;  %1320 = vmatpush.msrb.mxu0 %v7984_v25  ;;  %1340 = vmatpush.msrb.mxu1 %v7985_v23 }
 0x2b2   :  { %v5504_v3 = vmul.f32 %v3829_v24, %v1006_v20  ;;  %1360 = vmatpush.msrb.mxu2 %v5377_v42  ;;  %1380 = vmatpush.msrb.mxu3 %v5384_v27 }
 0x2b3   :  { %1321 = vmatpush.msrb.mxu0 %v5389_v22  ;;  %1341 = vmatpush.msrb.mxu1 %v5394_v53 }
 0x2b4   :  { %7983 = vst [vmem:[#allocation42_spill] sm:$0xff] %v5504_v3  ;;  %1102 = vmatmul.f32.vlgmr.msra.gmra.mxu0 %v5504_v3  ;;  %1122 = vmatmul.f32.vlgmr.msra.gmra.mxu1 %v5504_v3 }
 0x2b5   :  { %1142 = vmatmul.f32.vlgmr.msra.gmra.mxu2 %v5504_v3  ;;  %1162 = vmatmul.f32.vlgmr.msra.gmra.mxu3 %v5504_v3  ;;  %v5963_v3 = vld [vmem:[%s7720_s3 + $0x20] sm:$0xff] }
 0x2b6   :  { %1361 = vmatpush.msrb.mxu2 %v5403_v21  ;;  %1381 = vmatpush.msrb.mxu3 %v5408_v43  ;;  %8020 = vst [vmem:[#allocation30_spill] sm:$0xff] %v5963_v3 }
 0x2b7   :  { %1526 = vmatpush.msra.mxu0 %v7986_v0  ;;  %1546 = vmatpush.msra.mxu1 %v5030_v60  ;;  %v7991_v60 = vld [vmem:[#allocation35_spill] sm:$0xff] }
 0x2b8   :  { %1566 = vmatpush.msra.mxu2 %v7987_v2  ;;  %1586 = vmatpush.msra.mxu3 %v7988_v5 }
 0x2b9   :  { %1527 = vmatpush.msra.mxu0 %v7989_v9  ;;  %1547 = vmatpush.msra.mxu1 %v7990_v13 }
 0x2ba   :  { %1567 = vmatpush.msra.mxu2 %v5059_v29  ;;  %1587 = vmatpush.msra.mxu3 %v5066_v39  ;;  %v7993_v29 = vld [vmem:[#allocation37_spill] sm:$0xff]  ;;  %v7994_v39 = vld [vmem:[#allocation38_spill] sm:$0xff] }
 0x2bb   :  { %1528 = vmatpush.msra.mxu0 %v5073_v4  ;;  %1548 = vmatpush.msra.mxu1 %v5078_v58  ;;  %v7995_v4 = vld [vmem:[#allocation39_spill] sm:$0xff]  ;;  %v7996_v58 = vld [vmem:[#allocation40_spill] sm:$0xff] }
 0x2bc   :  { %1568 = vmatpush.msra.mxu2 %v5083_v36  ;;  %1588 = vmatpush.msra.mxu3 %v5090_v8  ;;  %v7997_v36 = vld [vmem:[#allocation41_spill] sm:$0xff] }
 0x2bd   :  { %1529 = vmatpush.msra.mxu0 %v5097_v15  ;;  %1549 = vmatpush.msra.mxu1 %v7991_v60  ;;  %v8003_v15 = vld [vmem:[#allocation7_spill] sm:$0xff] }
 0x2be   :  { %1569 = vmatpush.msra.mxu2 %v7992_v46  ;;  %1589 = vmatpush.msra.mxu3 %v5114_v10 }
 0x2bf   :  { %1530 = vmatpush.msra.mxu0 %v5121_v12  ;;  %1550 = vmatpush.msra.mxu1 %v5126_v38 }
 0x2c0   :  { %1570 = vmatpush.msra.mxu2 %v5131_v45  ;;  %1590 = vmatpush.msra.mxu3 %v7993_v29 }
 0x2c1   :  { %1531 = vmatpush.msra.mxu0 %v5145_v48  ;;  %1551 = vmatpush.msra.mxu1 %v5150_v11 }
 0x2c2   :  { %1571 = vmatpush.msra.mxu2 %v7994_v39  ;;  %1591 = vmatpush.msra.mxu3 %v5162_v51 }
 0x2c3   :  { %1532 = vmatpush.msra.mxu0 %v5169_v52  ;;  %1552 = vmatpush.msra.mxu1 %v7995_v4  ;;  %v8004_v52 = vld [vmem:[#allocation27_spill] sm:$0xff] }
 0x2c4   :  { %1572 = vmatpush.msra.mxu2 %v7996_v58  ;;  %1592 = vmatpush.msra.mxu3 %v7997_v36 }
 0x2c5   :  { %1533 = vmatpush.msra.mxu0 %v5193_v56  ;;  %1553 = vmatpush.msra.mxu1 %v5198_v59  ;;  %v8005_v56 = vld [vmem:[#allocation6_spill] sm:$0xff] }
 0x2c6   :  { %1573 = vmatpush.msra.mxu2 %v5203_v61  ;;  %1593 = vmatpush.msra.mxu3 %v5210_v62  ;;  %v269_v59 = vadd.f32 %v8005_v56, %v8004_v52 }
 0x2c7   :  { %1534 = vmatpush.msra.mxu0 %v5217_v16  ;;  %1554 = vmatpush.msra.mxu1 %v5222_v57 }
 0x2c8   :  { %1574 = vmatpush.msra.mxu2 %v5227_v47  ;;  %1594 = vmatpush.msra.mxu3 %v5238_v63 }
 0x2c9   :  { %1535 = vmatpush.msra.mxu0 %v5245_v17  ;;  %1555 = vmatpush.msra.mxu1 %v5250_v18 }
 0x2ca   :  { %1575 = vmatpush.msra.mxu2 %v5255_v37  ;;  %1595 = vmatpush.msra.mxu3 %v5262_v35 }
 0x2cb   :  { %1536 = vmatpush.msra.mxu0 %v5269_v32  ;;  %1556 = vmatpush.msra.mxu1 %v5274_v40  ;;  %v8001_v32 = vld [vmem:[#allocation5_spill] sm:$0xff] }
 0x2cc   :  { %1576 = vmatpush.msra.mxu2 %v5279_v41  ;;  %1596 = vmatpush.msra.mxu3 %v5286_v30 }
 0x2cd   :  { %1537 = vmatpush.msra.mxu0 %v5293_v28  ;;  %1557 = vmatpush.msra.mxu1 %v5298_v33  ;;  %v7999_v28 = vld [vmem:[#allocation4_spill] sm:$0xff] }
 0x2ce   :  { %1577 = vmatpush.msra.mxu2 %v5303_v34  ;;  %1597 = vmatpush.msra.mxu3 %v5310_v31  ;;  %v8000_v31 = vld [vmem:[#allocation22_spill] sm:$0xff] }
 0x2cf   :  { %1538 = vmatpush.msra.mxu0 %v5319_v44  ;;  %1558 = vmatpush.msra.mxu1 %v5324_v26  ;;  %v7998_v26 = vld [vmem:[#allocation21_spill] sm:$0xff]  ;;  %v228_v35 = vadd.f32 %v8001_v32, %v8000_v31 }
 0x2d0   :  { %1578 = vmatpush.msra.mxu2 %v7977_v55  ;;  %1598 = vmatpush.msra.mxu3 %v7978_v14  ;;  %v187_v30 = vadd.f32 %v7999_v28, %v7998_v26 }
 0x2d1   :  { %1539 = vmatpush.msra.mxu0 %v7979_v6  ;;  %1559 = vmatpush.msra.mxu1 %v7980_v19 }
 0x2d2   :  { %1579 = vmatpush.msra.mxu2 %v7981_v7  ;;  %1599 = vmatpush.msra.mxu3 %v7982_v49 }
 0x2d3   :  { %1540 = vmatpush.msra.mxu0 %v7984_v25  ;;  %1560 = vmatpush.msra.mxu1 %v7985_v23 }
 0x2d4   :  { %1580 = vmatpush.msra.mxu2 %v5377_v42  ;;  %1600 = vmatpush.msra.mxu3 %v5384_v27 }
 0x2d5   :  { %1541 = vmatpush.msra.mxu0 %v5389_v22  ;;  %1561 = vmatpush.msra.mxu1 %v5394_v53  ;;  %v8002_v22 = vld [vmem:[#allocation25_spill] sm:$0xff] }
 0x2d6   :  { %1581 = vmatpush.msra.mxu2 %v5403_v21  ;;  %1601 = vmatpush.msra.mxu3 %v5408_v43  ;;  %v310_v53 = vadd.f32 %v8003_v15, %v8002_v22 }
 0x331   :  { %v1103_v37 = vpop.f32.mrf.mxu0  ;;  %v1123_v47 = vpop.f32.mrf.mxu1 }
 0x332   :  { %v1166_v57 = vadd.f32 %v1103_v37, %v187_v30  ;;  %v1167_v42 = vadd.f32 %v1123_v47, %v228_v35  ;;  %v8008_v37 = vld [vmem:[#allocation9_spill] sm:$0xff] }
 0x333   :  { %v231_v47 = vadd.f32 %v8008_v37, %v8000_v31 }
 0x334   :  { %v3735_v63 = vmul.f32 -1.442695, %v1166_v57  ;;  %v3736_v8 = vmul.f32 -1.442695, %v1167_v42 }
 0x336   :  { %3830 = vpow2.f32 %v3735_v63 }
 0x337   :  { %3832 = vpow2.f32 %v3736_v8 }
 0x338   :  { %v1163_v21 = vpop.f32.mrf.mxu3  ;;  %v1143_v11 = vpop.f32.mrf.mxu2 }
 0x339   :  { %v1169_v10 = vadd.f32 %v1163_v21, %v310_v53  ;;  %v1168_v16 = vadd.f32 %v1143_v11, %v269_v59  ;;  %v8009_v21 = vld [vmem:[#allocation10_spill] sm:$0xff] }
 0x33b   :  { %v3737_v43 = vmul.f32 -1.442695, %v1169_v10  ;;  %v313_v10 = vadd.f32 %v8009_v21, %v8002_v22  ;;  %v5662_v21 = vld [vmem:[%s7720_s3 + $0x1d8] sm:$0xff] }
 0x33c   :  { %v3831_v12 = vpop.eup %3830 }
 0x33d   :  { %v3833_v38 = vpop.eup %3832  ;;  %v1173_v45 = vadd.f32 1.0, %v3831_v12  ;;  %3834 = vpow2.f32 %v3737_v43 }
 0x33e   :  { %v1192_v48 = vadd.f32 1.0, %v3833_v38 }
 0x33f   :  { %3836 = vrcp.f32 %v1173_v45  ;;  %v1185_v34 = vand.u32 2147483648, %v1173_v45  ;;  %v1183_v50 = vand.u32 2147483647, %v1173_v45  ;;  %vm1179_vm14 = vweird.f32 %v1173_v45 }
 0x340   :  { %3838 = vrcp.f32 %v1192_v48  ;;  %v1204_v44 = vand.u32 2147483648, %v1192_v48  ;;  %v1202_v55 = vand.u32 2147483647, %v1192_v48  ;;  %vm1198_vm15 = vweird.f32 %v1192_v48 }
 0x341   :  { %v1186_v19 = vor.u32 1.1754944e-38, %v1185_v34  ;;  %vm1184_vm2 = vcmp.eq.f32.partialorder %v1183_v50, 8.507059e+37 }
 0x342   :  { %v1205_v7 = vor.u32 1.1754944e-38, %v1204_v44  ;;  %vm1203_vm3 = vcmp.eq.f32.partialorder %v1202_v55, 8.507059e+37 }
 0x343   :  { %v3835_v51 = vpop.eup %3834 }
 0x344   :  { %v1212_v61 = vadd.f32 1.0, %v3835_v51 }
 0x345   :  { %v3837_v62 = vpop.eup %3836 }
 0x346   :  { %v3839_v17 = vpop.eup %3838  ;;  %v1175_v18 = vmul.f32 %v3837_v62, %v1173_v45  ;;  %3840 = vrcp.f32 %v1212_v61  ;;  %vm1180_vm12 = vweird.f32 %v3837_v62  ;;  %v1224_v39 = vand.u32 2147483648, %v1212_v61 }
 0x347   :  { %v1194_v40 = vmul.f32 %v3839_v17, %v1192_v48  ;;  %3842 = vtanh.f32 %v1168_v16  ;;  %vm1199_vm13 = vweird.f32 %v3839_v17  ;;  %vm1181_vm0 = vmor %vm1179_vm14, %vm1180_vm12  ;;  %vm1218_vm5 = vweird.f32 %v1212_v61 }
 0x348   :  { %v1176_v41 = vsub.f32 1.0, %v1175_v18  ;;  %vm1200_vm1 = vmor %vm1198_vm15, %vm1199_vm13  ;;  %v1222_v4 = vand.u32 2147483647, %v1212_v61  ;;  %v1225_v36 = vor.u32 1.1754944e-38, %v1224_v39 }
 0x349   :  { %v1195_v33 = vsub.f32 1.0, %v1194_v40 }
 0x34a   :  { %v1177_v27 = vmul.f32 %v3837_v62, %v1176_v41  ;;  %vm1223_vm7 = vcmp.eq.f32.partialorder %v1222_v4, 8.507059e+37 }
 0x34b   :  { %v1196_v54 = vmul.f32 %v3839_v17, %v1195_v33 }
 0x34c   :  { %v3841_v14 = vpop.eup %3840  ;;  %v1178_v6 = vadd.f32 %v3837_v62, %v1177_v27 }
 0x34d   :  { %v1197_v24 = vadd.f32 %v3839_v17, %v1196_v54  ;;  %v1214_v20 = vmul.f32 %v3841_v14, %v1212_v61  ;;  %v3843_v25 = vpop.eup %3842  ;;  %vm1219_vm4 = vweird.f32 %v3841_v14  ;;  %v8010_v61 = vld [vmem:[#allocation13_spill] sm:$0xff] }
 0x34e   :  { %v1182_v49 = vsel %vm1181_vm0, %v3837_v62, %v1178_v6  ;;  %vm1220_vm6 = vmor %vm1218_vm5, %vm1219_vm4  ;;  %v272_v62 = vadd.f32 %v8010_v61, %v8004_v52  ;;  %v5727_v61 = vld [vmem:[%s7720_s3 + $0x170] sm:$0xff] }
 0x34f   :  { %v1187_v23 = vsel %vm1184_vm2, %v1186_v19, %v1182_v49  ;;  %v1201_v0 = vsel %vm1200_vm1, %v3839_v17, %v1197_v24  ;;  %v1215_v2 = vsub.f32 1.0, %v1214_v20 }
 0x350   :  { %v1206_v5 = vsel %vm1203_vm3, %v1205_v7, %v1201_v0  ;;  %v1229_v9 = vmul.f32 %v3843_v25, %v1187_v23 }
 0x351   :  { %v1228_v13 = vmul.f32 %v1206_v5, %v5477_v1  ;;  %v1216_v60 = vmul.f32 %v3841_v14, %v1215_v2  ;;  %v8007_v1 = vld [vmem:[#allocation8_spill] sm:$0xff] }
 0x352   :  { %v190_v35 = vadd.f32 %v8007_v1, %v7998_v26 }
 0x353   :  { %v5591_v46 = vadd.f32 %v1229_v9, %v1228_v13  ;;  %v1217_v29 = vadd.f32 %v3841_v14, %v1216_v60 }
 0x355   :  { %3844 = vtanh.f32 %v5591_v46  ;;  %v1221_v58 = vsel %vm1220_vm6, %v3841_v14, %v1217_v29 }
 0x356   :  { %v1226_v30 = vsel %vm1223_vm7, %v1225_v36, %v1221_v58 }
 0x35b   :  { %v3845_v28 = vpop.eup %3844 }
 0x35c   :  { %v5594_v32 = vmul.f32 %v3845_v28, %v1226_v30 }
 0x35e   :  { %8006 = vst [vmem:[#allocation43_spill] sm:$0xff] %v5594_v32  ;;  %1322 = vmatmul.f32.vlgmr.msrb.gmra.mxu0 %v5594_v32  ;;  %1342 = vmatmul.f32.vlgmr.msrb.gmra.mxu1 %v5594_v32 }
 0x35f   :  { %1362 = vmatmul.f32.vlgmr.msrb.gmra.mxu2 %v5594_v32  ;;  %1382 = vmatmul.f32.vlgmr.msrb.gmra.mxu3 %v5594_v32  ;;  %v5949_v32 = vld [vmem:[%s7720_s3 + $0x50] sm:$0xff] }
 0x360   :  { %8018 = vst [vmem:[#allocation48_spill] sm:$0xff] %v5949_v32 }
 0x3db   :  { %v1323_v57 = vpop.f32.mrf.mxu0  ;;  %v1343_v42 = vpop.f32.mrf.mxu1 }
 0x3dc   :  { %v1386_v63 = vadd.f32 %v1323_v57, %v190_v35  ;;  %v1387_v8 = vadd.f32 %v1343_v42, %v231_v47  ;;  %v5626_v57 = vld [vmem:[%s7720_s3 + $0x1e8] sm:$0xff]  ;;  %v5631_v42 = vld [vmem:[%s7720_s3 + $0x1f0] sm:$0xff] }
 0x3dd   :  { %1766 = vmatpush.msrb.mxu1 %v5626_v57  ;;  %1786 = vmatpush.msrb.mxu2 %v5631_v42 }
 0x3de   :  { %v3738_v15 = vmul.f32 -1.442695, %v1386_v63  ;;  %v3739_v53 = vmul.f32 -1.442695, %v1387_v8  ;;  %v5638_v63 = vld [vmem:[%s7720_s3 + $0x1f8] sm:$0xff]  ;;  %v5645_v8 = vld [vmem:[%s7720_s3 + $0x1c0] sm:$0xff] }
 0x3df   :  { %1806 = vmatpush.msrb.mxu3 %v5638_v63 }
 0x3e0   :  { %3846 = vpow2.f32 %v3738_v15  ;;  %v5650_v15 = vld [vmem:[%s7720_s3 + $0x1c8] sm:$0xff] }
 0x3e1   :  { %3848 = vpow2.f32 %v3739_v53  ;;  %v5655_v53 = vld [vmem:[%s7720_s3 + $0x1d0] sm:$0xff]  ;;  %1767 = vmatpush.msrb.mxu1 %v5650_v15  ;;  %1807 = vmatpush.msrb.mxu3 %v5662_v21 }
 0x3e2   :  { %v1383_v43 = vpop.f32.mrf.mxu3  ;;  %v1363_v56 = vpop.f32.mrf.mxu2  ;;  %1787 = vmatpush.msrb.mxu2 %v5655_v53 }
 0x3e3   :  { %v1389_v12 = vadd.f32 %v1383_v43, %v313_v10  ;;  %v1388_v18 = vadd.f32 %v1363_v56, %v272_v62  ;;  %v5669_v10 = vld [vmem:[%s7720_s3 + $0x1a0] sm:$0xff]  ;;  %v5674_v43 = vld [vmem:[%s7720_s3 + $0x1a8] sm:$0xff]  ;;  %v5734_v62 = vld [vmem:[%s7720_s3 + $0x178] sm:$0xff] }
 0x3e4   :  { %1768 = vmatpush.msrb.mxu1 %v5674_v43  ;;  %v5717_v56 = vld [vmem:[%s7720_s3 + $0x160] sm:$0xff] }
 0x3e5   :  { %v3740_v38 = vmul.f32 -1.442695, %v1389_v12  ;;  %v5679_v12 = vld [vmem:[%s7720_s3 + $0x1b0] sm:$0xff] }
 0x3e6   :  { %v3847_v45 = vpop.eup %3846  ;;  %1788 = vmatpush.msrb.mxu2 %v5679_v12 }
 0x3e7   :  { %v3849_v48 = vpop.eup %3848  ;;  %v1393_v11 = vadd.f32 1.0, %v3847_v45  ;;  %3850 = vpow2.f32 %v3740_v38  ;;  %v5686_v38 = vld [vmem:[%s7720_s3 + $0x1b8] sm:$0xff]  ;;  %v5693_v45 = vld [vmem:[%s7720_s3 + $0x180] sm:$0xff] }
 0x3e8   :  { %v1412_v51 = vadd.f32 1.0, %v3849_v48  ;;  %1808 = vmatpush.msrb.mxu3 %v5686_v38  ;;  %v5698_v48 = vld [vmem:[%s7720_s3 + $0x188] sm:$0xff] }
 0x3e9   :  { %3852 = vrcp.f32 %v1393_v11  ;;  %v1405_v27 = vand.u32 2147483648, %v1393_v11  ;;  %v1403_v55 = vand.u32 2147483647, %v1393_v11  ;;  %vm1399_vm10 = vweird.f32 %v1393_v11  ;;  %1769 = vmatpush.msrb.mxu1 %v5698_v48 }
 0x3ea   :  { %3854 = vrcp.f32 %v1412_v51  ;;  %v1424_v50 = vand.u32 2147483648, %v1412_v51  ;;  %v1422_v6 = vand.u32 2147483647, %v1412_v51  ;;  %vm1418_vm11 = vweird.f32 %v1412_v51 }
 0x3eb   :  { %v1406_v20 = vor.u32 1.1754944e-38, %v1405_v27  ;;  %vm1404_vm14 = vcmp.eq.f32.partialorder %v1403_v55, 8.507059e+37  ;;  %v5789_v27 = vld [vmem:[%s7720_s3 + $0x100] sm:$0xff]  ;;  %v5806_v55 = vld [vmem:[%s7720_s3 + $0x118] sm:$0xff] }
 0x3ec   :  { %v1425_v25 = vor.u32 1.1754944e-38, %v1424_v50  ;;  %vm1423_vm15 = vcmp.eq.f32.partialorder %v1422_v6, 8.507059e+37  ;;  %v5794_v50 = vld [vmem:[%s7720_s3 + $0x108] sm:$0xff] }
 0x3ed   :  { %v3851_v59 = vpop.eup %3850  ;;  %v5818_v6 = vld [vmem:[%s7720_s3 + $0xe8] sm:$0xff] }
 0x3ee   :  { %v1432_v16 = vadd.f32 1.0, %v3851_v59  ;;  %v5722_v59 = vld [vmem:[%s7720_s3 + $0x168] sm:$0xff] }
 0x3ef   :  { %v3853_v17 = vpop.eup %3852  ;;  %1770 = vmatpush.msrb.mxu1 %v5722_v59 }
 0x3f0   :  { %v3855_v40 = vpop.eup %3854  ;;  %v1395_v41 = vmul.f32 %v3853_v17, %v1393_v11  ;;  %3856 = vrcp.f32 %v1432_v16  ;;  %vm1400_vm8 = vweird.f32 %v3853_v17  ;;  %v1444_v36 = vand.u32 2147483648, %v1432_v16  ;;  %v5703_v11 = vld [vmem:[%s7720_s3 + $0x190] sm:$0xff] }
 0x3f1   :  { %v1414_v33 = vmul.f32 %v3855_v40, %v1412_v51  ;;  %3858 = vtanh.f32 %v1388_v18  ;;  %vm1419_vm9 = vweird.f32 %v3855_v40  ;;  %vm1401_vm12 = vmor %vm1399_vm10, %vm1400_vm8  ;;  %vm1438_vm1 = vweird.f32 %v1432_v16  ;;  %v5710_v51 = vld [vmem:[%s7720_s3 + $0x198] sm:$0xff]  ;;  %1789 = vmatpush.msrb.mxu2 %v5703_v11  ;;  %v5751_v18 = vld [vmem:[%s7720_s3 + $0x150] sm:$0xff] }
 0x3f2   :  { %v1396_v34 = vsub.f32 1.0, %v1395_v41  ;;  %vm1420_vm13 = vmor %vm1418_vm11, %vm1419_vm9  ;;  %v1442_v28 = vand.u32 2147483647, %v1432_v16  ;;  %v1445_v1 = vor.u32 1.1754944e-38, %v1444_v36  ;;  %1809 = vmatpush.msrb.mxu3 %v5710_v51  ;;  %v5765_v41 = vld [vmem:[%s7720_s3 + $0x120] sm:$0xff]  ;;  %v5875_v36 = vld [vmem:[%s7720_s3 + $0xb0] sm:$0xff] }
 0x3f3   :  { %v1415_v44 = vsub.f32 1.0, %v1414_v33  ;;  %1790 = vmatpush.msrb.mxu2 %v5727_v61  ;;  %v5770_v33 = vld [vmem:[%s7720_s3 + $0x128] sm:$0xff] }
 0x3f4   :  { %v1397_v54 = vmul.f32 %v3853_v17, %v1396_v34  ;;  %vm1443_vm3 = vcmp.eq.f32.partialorder %v1442_v28, 8.507059e+37  ;;  %1810 = vmatpush.msrb.mxu3 %v5734_v62  ;;  %v5775_v34 = vld [vmem:[%s7720_s3 + $0x130] sm:$0xff] }
 0x3f5   :  { %v1416_v14 = vmul.f32 %v3855_v40, %v1415_v44  ;;  %1791 = vmatpush.msrb.mxu2 %v5751_v18  ;;  %v5782_v44 = vld [vmem:[%s7720_s3 + $0x138] sm:$0xff] }
 0x3f6   :  { %v3857_v19 = vpop.eup %3856  ;;  %v1398_v24 = vadd.f32 %v3853_v17, %v1397_v54  ;;  %v5799_v54 = vld [vmem:[%s7720_s3 + $0x110] sm:$0xff] }
 0x3f7   :  { %v1417_v7 = vadd.f32 %v3855_v40, %v1416_v14  ;;  %v1434_v49 = vmul.f32 %v3857_v19, %v1432_v16  ;;  %v3859_v0 = vpop.eup %3858  ;;  %vm1439_vm0 = vweird.f32 %v3857_v19  ;;  %v5741_v16 = vld [vmem:[%s7720_s3 + $0x140] sm:$0xff]  ;;  %1792 = vmatpush.msrb.mxu2 %v5775_v34 }
 0x3f8   :  { %v1402_v23 = vsel %vm1401_vm12, %v3853_v17, %v1398_v24  ;;  %vm1440_vm2 = vmor %vm1438_vm1, %vm1439_vm0  ;;  %v5746_v17 = vld [vmem:[%s7720_s3 + $0x148] sm:$0xff]  ;;  %v5813_v14 = vld [vmem:[%s7720_s3 + $0xe0] sm:$0xff] }
 0x3f9   :  { %v1407_v2 = vsel %vm1404_vm14, %v1406_v20, %v1402_v23  ;;  %v1421_v5 = vsel %vm1420_vm13, %v3855_v40, %v1417_v7  ;;  %v1435_v9 = vsub.f32 1.0, %v1434_v49  ;;  %1771 = vmatpush.msrb.mxu1 %v5746_v17  ;;  %v5758_v40 = vld [vmem:[%s7720_s3 + $0x158] sm:$0xff]  ;;  %1793 = vmatpush.msrb.mxu2 %v5799_v54  ;;  %v8013_v7 = vld [vmem:[#allocation12_spill] sm:$0xff] }
 0x3fa   :  { %v1426_v13 = vsel %vm1423_vm15, %v1425_v25, %v1421_v5  ;;  %v1449_v60 = vmul.f32 %v3859_v0, %v1407_v2  ;;  %1811 = vmatpush.msrb.mxu3 %v5758_v40  ;;  %v8012_v24 = vld [vmem:[#allocation11_spill] sm:$0xff]  ;;  %v234_v49 = vadd.f32 %v8013_v7, %v8000_v31  ;;  %v5841_v2 = vld [vmem:[%s7720_s3 + $0xc0] sm:$0xff]  ;;  %v5846_v5 = vld [vmem:[%s7720_s3 + $0xc8] sm:$0xff] }
 0x3fb   :  { %v1448_v29 = vmul.f32 %v1426_v13, %v5591_v46  ;;  %v1436_v39 = vmul.f32 %v3857_v19, %v1435_v9  ;;  %v5621_v46 = vld [vmem:[%s7720_s3 + $0x1e0] sm:$0xff]  ;;  %1772 = vmatpush.msrb.mxu1 %v5770_v33  ;;  %v193_v20 = vadd.f32 %v8012_v24, %v7998_v26  ;;  %v5834_v25 = vld [vmem:[%s7720_s3 + $0xf8] sm:$0xff]  ;;  %v5851_v9 = vld [vmem:[%s7720_s3 + $0xd0] sm:$0xff] }
 0x3fc   :  { %1746 = vmatpush.msrb.mxu0 %v5621_v46  ;;  %1812 = vmatpush.msrb.mxu3 %v5782_v44  ;;  %v5899_v24 = vld [vmem:[%s7720_s3 + $0x90] sm:$0xff]  ;;  %v5980_v26 = vld [vmem:[%s7720_s3 + $0x38] sm:$0xff] }
 0x3fd   :  { %v5609_v4 = vadd.f32 %v1449_v60, %v1448_v29  ;;  %v1437_v58 = vadd.f32 %v3857_v19, %v1436_v39  ;;  %1773 = vmatpush.msrb.mxu1 %v5794_v50  ;;  %v5858_v29 = vld [vmem:[%s7720_s3 + $0xd8] sm:$0xff]  ;;  %v5865_v39 = vld [vmem:[%s7720_s3 + $0xa0] sm:$0xff]  ;;  %v8014_v7 = vld [vmem:[#allocation14_spill] sm:$0xff] }
 0x3fe   :  { %1747 = vmatpush.msrb.mxu0 %v5645_v8  ;;  %1813 = vmatpush.msrb.mxu3 %v5806_v55  ;;  %v5973_v31 = vld [vmem:[%s7720_s3 + $0x30] sm:$0xff] }
 0x3ff   :  { %3860 = vtanh.f32 %v5609_v4  ;;  %v1441_v30 = vsel %vm1440_vm2, %v3857_v19, %v1437_v58  ;;  %v5823_v19 = vld [vmem:[%s7720_s3 + $0xf0] sm:$0xff]  ;;  %1774 = vmatpush.msrb.mxu1 %v5818_v6  ;;  %v5870_v58 = vld [vmem:[%s7720_s3 + $0xa8] sm:$0xff] }
 0x400   :  { %v1446_v37 = vsel %vm1443_vm3, %v1445_v1, %v1441_v30  ;;  %1748 = vmatpush.msrb.mxu0 %v5669_v10  ;;  %1794 = vmatpush.msrb.mxu2 %v5823_v19  ;;  %v5882_v1 = vld [vmem:[%s7720_s3 + $0xb8] sm:$0xff] }
 0x401   :  { %1814 = vmatpush.msrb.mxu3 %v5834_v25  ;;  %1775 = vmatpush.msrb.mxu1 %v5846_v5 }
 0x402   :  { %1749 = vmatpush.msrb.mxu0 %v5693_v45  ;;  %1795 = vmatpush.msrb.mxu2 %v5851_v9 }
 0x403   :  { %1815 = vmatpush.msrb.mxu3 %v5858_v29  ;;  %1776 = vmatpush.msrb.mxu1 %v5870_v58 }
 0x404   :  { %1750 = vmatpush.msrb.mxu0 %v5717_v56  ;;  %1796 = vmatpush.msrb.mxu2 %v5875_v36 }
 0x405   :  { %v3861_v35 = vpop.eup %3860  ;;  %1816 = vmatpush.msrb.mxu3 %v5882_v1 }
 0x406   :  { %v5612_v47 = vmul.f32 %v3861_v35, %v1446_v37  ;;  %1751 = vmatpush.msrb.mxu0 %v5741_v16  ;;  %v5889_v35 = vld [vmem:[%s7720_s3 + $0x80] sm:$0xff]  ;;  %v5894_v37 = vld [vmem:[%s7720_s3 + $0x88] sm:$0xff]  ;;  %1797 = vmatpush.msrb.mxu2 %v5899_v24 }
 0x407   :  { %1777 = vmatpush.msrb.mxu1 %v5894_v37 }
 0x408   :  { %8011 = vst [vmem:[#allocation44_spill] sm:$0xff] %v5612_v47  ;;  %1542 = vmatmul.f32.vlgmr.msra.gmra.mxu0 %v5612_v47  ;;  %1562 = vmatmul.f32.vlgmr.msra.gmra.mxu1 %v5612_v47 }
 0x409   :  { %1582 = vmatmul.f32.vlgmr.msra.gmra.mxu2 %v5612_v47  ;;  %1602 = vmatmul.f32.vlgmr.msra.gmra.mxu3 %v5612_v47  ;;  %v5944_v47 = vld [vmem:[%s7720_s3 + $0x48] sm:$0xff] }
 0x40a   :  { %1752 = vmatpush.msrb.mxu0 %v5765_v41  ;;  %8017 = vst [vmem:[#allocation47_spill] sm:$0xff] %v5944_v47 }
 0x40c   :  { %1753 = vmatpush.msrb.mxu0 %v5789_v27 }
 0x40e   :  { %1754 = vmatpush.msrb.mxu0 %v5813_v14 }
 0x410   :  { %1755 = vmatpush.msrb.mxu0 %v5841_v2 }
 0x412   :  { %1756 = vmatpush.msrb.mxu0 %v5865_v39 }
 0x414   :  { %1757 = vmatpush.msrb.mxu0 %v5889_v35 }
 0x485   :  { %v1543_v23 = vpop.f32.mrf.mxu0  ;;  %v1563_v0 = vpop.f32.mrf.mxu1 }
 0x486   :  { %v1606_v13 = vadd.f32 %v1543_v23, %v193_v20  ;;  %v1607_v60 = vadd.f32 %v1563_v0, %v234_v49  ;;  %v5906_v20 = vld [vmem:[%s7720_s3 + $0x98] sm:$0xff]  ;;  %v316_v49 = vadd.f32 %v8014_v7, %v8002_v22  ;;  %v5915_v23 = vld [vmem:[%s7720_s3 + $0x60] sm:$0xff]  ;;  %v5920_v0 = vld [vmem:[%s7720_s3 + $0x68] sm:$0xff] }
 0x487   :  { %1817 = vmatpush.msrb.mxu3 %v5906_v20  ;;  %1758 = vmatpush.msrb.mxu0 %v5915_v23  ;;  %v5939_v7 = vld [vmem:[%s7720_s3 + $0x40] sm:$0xff]  ;;  %v5968_v22 = vld [vmem:[%s7720_s3 + $0x28] sm:$0xff] }
 0x488   :  { %v3741_v28 = vmul.f32 -1.442695, %v1606_v13  ;;  %v3742_v30 = vmul.f32 -1.442695, %v1607_v60  ;;  %v5925_v13 = vld [vmem:[%s7720_s3 + $0x70] sm:$0xff]  ;;  %1778 = vmatpush.msrb.mxu1 %v5920_v0  ;;  %8016 = vst [vmem:[#allocation46_spill] sm:$0xff] %v5939_v7 }
 0x489   :  { %1798 = vmatpush.msrb.mxu2 %v5925_v13  ;;  %1759 = vmatpush.msrb.mxu0 %v5939_v7  ;;  %8021 = vst [vmem:[#allocation31_spill] sm:$0xff] %v5968_v22 }
 0x48a   :  { %3862 = vpow2.f32 %v3741_v28  ;;  %v5932_v28 = vld [vmem:[%s7720_s3 + $0x78] sm:$0xff]  ;;  %1779 = vmatpush.msrb.mxu1 %v5944_v47 }
 0x48b   :  { %3864 = vpow2.f32 %v3742_v30  ;;  %8015 = vst [vmem:[#allocation45_spill] sm:$0xff] %v5932_v28  ;;  %1818 = vmatpush.msrb.mxu3 %v5932_v28  ;;  %1799 = vmatpush.msrb.mxu2 %v5949_v32  ;;  %v5990_v32 = vld [vmem:[%s7720_s3 + $0x8] sm:$0xff] }
 0x48c   :  { %v1603_v60 = vpop.f32.mrf.mxu3  ;;  %1760 = vmatpush.msrb.mxu0 %v5963_v3  ;;  %1780 = vmatpush.msrb.mxu1 %v5968_v22  ;;  %v5999_v22 = vld [vmem:[%s7720_s3 + $0x10] sm:$0xff]  ;;  %v6004_v3 = vld [vmem:[%s7720_s3 + $0x18] sm:$0xff] }
 0x48d   :  { %v1609_v30 = vadd.f32 %v1603_v60, %v316_v49  ;;  %v5956_v49 = vld [vmem:[%s7720_s3 + $0x58] sm:$0xff]  ;;  %1800 = vmatpush.msrb.mxu2 %v5973_v31  ;;  %8022 = vst [vmem:[#allocation32_spill] sm:$0xff] %v5999_v22 }
 0x48e   :  { %8019 = vst [vmem:[#allocation49_spill] sm:$0xff] %v5956_v49  ;;  %1819 = vmatpush.msrb.mxu3 %v5956_v49  ;;  %v5985_v49 = vld [vmem:[%s7720_s3] sm:$0xff]  ;;  %1781 = vmatpush.msrb.mxu1 %v5990_v32 }
 0x48f   :  { %v3743_v60 = vmul.f32 -1.442695, %v1609_v30  ;;  %1761 = vmatpush.msrb.mxu0 %v5985_v49  ;;  %1801 = vmatpush.msrb.mxu2 %v5999_v22 }
 0x490   :  { %v3863_v30 = vpop.eup %3862  ;;  %1820 = vmatpush.msrb.mxu3 %v5980_v26  ;;  %1986 = vmatpush.msra.mxu1 %v5626_v57 }
 0x491   :  { %v3865_v47 = vpop.eup %3864  ;;  %v5992_v7 = vadd.f32 1.0, %v3863_v30  ;;  %3866 = vpow2.f32 %v3743_v60  ;;  %1966 = vmatpush.msra.mxu0 %v5621_v46  ;;  %2006 = vmatpush.msra.mxu2 %v5631_v42  ;;  %v8023_v30 = vld [vmem:[#allocation17_spill] sm:$0xff] }
 0x492   :  { %v6006_v28 = vadd.f32 1.0, %v3865_v47  ;;  %1821 = vmatpush.msrb.mxu3 %v6004_v3  ;;  %v1583_v47 = vpop.f32.mrf.mxu2  ;;  %1987 = vmatpush.msra.mxu1 %v5650_v15  ;;  %v275_v22 = vadd.f32 %v8023_v30, %v8004_v52  ;;  %v2169_v30 = vld [vmem:[%s7722_s2 + $0x160] sm:$0xff] }
 0x493   :  { %3868 = vrcp.f32 %v5992_v7  ;;  %1967 = vmatpush.msra.mxu0 %v5645_v8  ;;  %2007 = vmatpush.msra.mxu2 %v5655_v53  ;;  %vm1619_vm6 = vweird.f32 %v5992_v7 }
 0x494   :  { %3870 = vrcp.f32 %v6006_v28  ;;  %2026 = vmatpush.msra.mxu3 %v5638_v63  ;;  %1988 = vmatpush.msra.mxu1 %v5674_v43  ;;  %v1608_v42 = vadd.f32 %v1583_v47, %v275_v22  ;;  %vm1638_vm7 = vweird.f32 %v6006_v28  ;;  %v2175_v47 = vld [vmem:[%s7722_s2 + $0x190] sm:$0xff] }
 0x495   :  { %1968 = vmatpush.msra.mxu0 %v5669_v10  ;;  %2008 = vmatpush.msra.mxu2 %v5679_v12  ;;  %v1644_v10 = vand.u32 2147483648, %v6006_v28  ;;  %v1623_v12 = vand.u32 2147483647, %v5992_v7 }
 0x496   :  { %2027 = vmatpush.msra.mxu3 %v5662_v21  ;;  %1989 = vmatpush.msra.mxu1 %v5698_v48  ;;  %v1625_v21 = vand.u32 2147483648, %v5992_v7 }
 0x497   :  { %v3867_v60 = vpop.eup %3866  ;;  %1969 = vmatpush.msra.mxu0 %v5693_v45  ;;  %2009 = vmatpush.msra.mxu2 %v5703_v11  ;;  %v1642_v45 = vand.u32 2147483647, %v6006_v28  ;;  %vm1624_vm10 = vcmp.eq.f32.partialorder %v1623_v12, 8.507059e+37  ;;  %v2165_v12 = vld [vmem:[%s7722_s2 + $0x140] sm:$0xff] }
 0x498   :  { %v6024_v46 = vadd.f32 1.0, %v3867_v60  ;;  %2028 = vmatpush.msra.mxu3 %v5686_v38  ;;  %1990 = vmatpush.msra.mxu1 %v5722_v59  ;;  %v2176_v60 = vld [vmem:[%s7722_s2 + $0x198] sm:$0xff] }
 0x499   :  { %v3869_v57 = vpop.eup %3868  ;;  %1970 = vmatpush.msra.mxu0 %v5717_v56  ;;  %2010 = vmatpush.msra.mxu2 %v5727_v61  ;;  %v1645_v61 = vor.u32 1.1754944e-38, %v1644_v10  ;;  %vm1643_vm11 = vcmp.eq.f32.partialorder %v1642_v45, 8.507059e+37  ;;  %v2167_v45 = vld [vmem:[%s7722_s2 + $0x150] sm:$0xff] }
 0x49a   :  { %v3871_v63 = vpop.eup %3870  ;;  %v1615_v8 = vmul.f32 %v3869_v57, %v5992_v7  ;;  %3872 = vrcp.f32 %v6024_v46  ;;  %2029 = vmatpush.msra.mxu3 %v5710_v51  ;;  %vm1620_vm4 = vweird.f32 %v3869_v57  ;;  %1991 = vmatpush.msra.mxu1 %v5746_v17  ;;  %v1626_v51 = vor.u32 1.1754944e-38, %v1625_v21  ;;  %v2173_v7 = vld [vmem:[%s7722_s2 + $0x180] sm:$0xff]  ;;  %v2172_v21 = vld [vmem:[%s7722_s2 + $0x178] sm:$0xff] }
 0x49b   :  { %v1634_v15 = vmul.f32 %v3871_v63, %v6006_v28  ;;  %3874 = vtanh.f32 %v1608_v42  ;;  %1971 = vmatpush.msra.mxu0 %v5741_v16  ;;  %vm1639_vm5 = vweird.f32 %v3871_v63  ;;  %2011 = vmatpush.msra.mxu2 %v5751_v18  ;;  %vm1621_vm8 = vmor %vm1619_vm6, %vm1620_vm4  ;;  %vm1658_vm13 = vweird.f32 %v6024_v46  ;;  %v2180_v28 = vld [vmem:[%s7722_s2 + $0x1b8] sm:$0xff]  ;;  %v8032_v42 = vld [vmem:[#allocation21_spill] sm:$0xff] }
 0x49c   :  { %v1616_v22 = vsub.f32 1.0, %v1615_v8  ;;  %2030 = vmatpush.msra.mxu3 %v5734_v62  ;;  %1992 = vmatpush.msra.mxu1 %v5770_v33  ;;  %vm1640_vm9 = vmor %vm1638_vm7, %vm1639_vm5 }
 0x49d   :  { %v1635_v53 = vsub.f32 1.0, %v1634_v15  ;;  %1972 = vmatpush.msra.mxu0 %v5765_v41  ;;  %2012 = vmatpush.msra.mxu2 %v5775_v34  ;;  %v8034_v15 = vld [vmem:[#allocation22_spill] sm:$0xff] }
 0x49e   :  { %v1617_v43 = vmul.f32 %v3869_v57, %v1616_v22  ;;  %2031 = vmatpush.msra.mxu3 %v5758_v40  ;;  %1993 = vmatpush.msra.mxu1 %v5794_v50  ;;  %v8035_v22 = vld [vmem:[#allocation16_spill] sm:$0xff] }
 0x49f   :  { %v1636_v38 = vmul.f32 %v3871_v63, %v1635_v53  ;;  %1973 = vmatpush.msra.mxu0 %v5789_v27  ;;  %2013 = vmatpush.msra.mxu2 %v5799_v54  ;;  %v1662_v54 = vand.u32 2147483647, %v6024_v46  ;;  %v237_v53 = vadd.f32 %v8035_v22, %v8034_v15  ;;  %v2132_v22 = vld [vmem:[%s7722_s2 + $0x38] sm:$0xff] }
 0x4a0   :  { %v6049_v48 = vpop.eup %3872  ;;  %v1618_v11 = vadd.f32 %v3869_v57, %v1617_v43  ;;  %2032 = vmatpush.msra.mxu3 %v5782_v44  ;;  %1994 = vmatpush.msra.mxu1 %v5818_v6  ;;  %v8024_v6 = vld [vmem:[#allocation45_spill] sm:$0xff] }
 0x4a1   :  { %v1637_v56 = vadd.f32 %v3871_v63, %v1636_v38  ;;  %v1654_v59 = vmul.f32 %v6049_v48, %v6024_v46  ;;  %v3875_v16 = vpop.eup %3874  ;;  %1974 = vmatpush.msra.mxu0 %v5813_v14  ;;  %2014 = vmatpush.msra.mxu2 %v5823_v19  ;;  %vm1659_vm12 = vweird.f32 %v6049_v48  ;;  %vm1663_vm15 = vcmp.eq.f32.partialorder %v1662_v54, 8.507059e+37  ;;  %v8025_v19 = vld [vmem:[#allocation46_spill] sm:$0xff]  ;;  %v2166_v38 = vld [vmem:[%s7722_s2 + $0x148] sm:$0xff] }
 0x4a2   :  { %v1622_v62 = vsel %vm1621_vm8, %v3869_v57, %v1618_v11  ;;  %2033 = vmatpush.msra.mxu3 %v5806_v55  ;;  %1995 = vmatpush.msra.mxu1 %v5846_v5  ;;  %vm1660_vm14 = vmor %vm1658_vm13, %vm1659_vm12  ;;  %v2171_v57 = vld [vmem:[%s7722_s2 + $0x170] sm:$0xff]  ;;  %v2154_v54 = vld [vmem:[%s7722_s2 + $0xe8] sm:$0xff] }
 0x4a3   :  { %v1627_v17 = vsel %vm1624_vm10, %v1626_v51, %v1622_v62  ;;  %v1641_v18 = vsel %vm1640_vm9, %v3871_v63, %v1637_v56  ;;  %v1655_v40 = vsub.f32 1.0, %v1654_v59  ;;  %1975 = vmatpush.msra.mxu0 %v5841_v2  ;;  %2015 = vmatpush.msra.mxu2 %v5851_v9  ;;  %v8027_v9 = vld [vmem:[#allocation48_spill] sm:$0xff]  ;;  %v8033_v63 = vld [vmem:[#allocation15_spill] sm:$0xff]  ;;  %v2162_v59 = vld [vmem:[%s7722_s2 + $0x128] sm:$0xff] }
 0x4a4   :  { %v1646_v41 = vsel %vm1643_vm11, %v1645_v61, %v1641_v18  ;;  %v1669_v33 = vmul.f32 %v3875_v16, %v1627_v17  ;;  %2034 = vmatpush.msra.mxu3 %v5834_v25  ;;  %1996 = vmatpush.msra.mxu1 %v5870_v58  ;;  %v8026_v25 = vld [vmem:[#allocation47_spill] sm:$0xff]  ;;  %v8029_v58 = vld [vmem:[#allocation30_spill] sm:$0xff]  ;;  %v196_v8 = vadd.f32 %v8033_v63, %v8032_v42  ;;  %v2161_v56 = vld [vmem:[%s7722_s2 + $0x120] sm:$0xff] }
 0x4a5   :  { %v1668_v34 = vmul.f32 %v1646_v41, %v5609_v4  ;;  %v1656_v44 = vmul.f32 %v6049_v48, %v1655_v40  ;;  %1976 = vmatpush.msra.mxu0 %v5865_v39  ;;  %v1664_v4 = vand.u32 2147483648, %v6024_v46  ;;  %2016 = vmatpush.msra.mxu2 %v5875_v36  ;;  %v8030_v36 = vld [vmem:[#allocation31_spill] sm:$0xff]  ;;  %v2170_v46 = vld [vmem:[%s7722_s2 + $0x168] sm:$0xff]  ;;  %v2163_v61 = vld [vmem:[%s7722_s2 + $0x130] sm:$0xff] }
 0x4a6   :  { %2035 = vmatpush.msra.mxu3 %v5858_v29  ;;  %1997 = vmatpush.msra.mxu1 %v5894_v37  ;;  %v8028_v29 = vld [vmem:[#allocation49_spill] sm:$0xff]  ;;  %v2168_v51 = vld [vmem:[%s7722_s2 + $0x158] sm:$0xff]  ;;  %v2157_v18 = vld [vmem:[%s7722_s2 + $0x100] sm:$0xff] }
 0x4a7   :  { %v6073_v27 = vadd.f32 %v1669_v33, %v1668_v34  ;;  %v1657_v50 = vadd.f32 %v6049_v48, %v1656_v44  ;;  %1977 = vmatpush.msra.mxu0 %v5889_v35  ;;  %2017 = vmatpush.msra.mxu2 %v5899_v24  ;;  %v1665_v14 = vor.u32 1.1754944e-38, %v1664_v4  ;;  %v2187_v35 = vld [vmem:[%s7722_s2 + $0x1f0] sm:$0xff]  ;;  %v2182_v37 = vld [vmem:[%s7722_s2 + $0x1c8] sm:$0xff]  ;;  %v2164_v17 = vld [vmem:[%s7722_s2 + $0x138] sm:$0xff] }
 0x4a8   :  { %2036 = vmatpush.msra.mxu3 %v5882_v1  ;;  %1998 = vmatpush.msra.mxu1 %v5920_v0  ;;  %v8031_v1 = vld [vmem:[#allocation32_spill] sm:$0xff]  ;;  %v2183_v24 = vld [vmem:[%s7722_s2 + $0x1d0] sm:$0xff]  ;;  %v2178_v0 = vld [vmem:[%s7722_s2 + $0x1a8] sm:$0xff] }
 0x4a9   :  { %3876 = vtanh.f32 %v6073_v27  ;;  %v1661_v55 = vsel %vm1660_vm14, %v6049_v48, %v1657_v50  ;;  %1978 = vmatpush.msra.mxu0 %v5915_v23  ;;  %2018 = vmatpush.msra.mxu2 %v5925_v13  ;;  %v2177_v23 = vld [vmem:[%s7722_s2 + $0x1a0] sm:$0xff]  ;;  %v2179_v13 = vld [vmem:[%s7722_s2 + $0x1b0] sm:$0xff]  ;;  %v2158_v40 = vld [vmem:[%s7722_s2 + $0x108] sm:$0xff] }
 0x4aa   :  { %2037 = vmatpush.msra.mxu3 %v5906_v20  ;;  %1999 = vmatpush.msra.mxu1 %v8026_v25  ;;  %v1666_v5 = vsel %vm1663_vm15, %v1665_v14, %v1661_v55  ;;  %v2184_v20 = vld [vmem:[%s7722_s2 + $0x1d8] sm:$0xff]  ;;  %v2159_v41 = vld [vmem:[%s7722_s2 + $0x110] sm:$0xff]  ;;  %v8036_v34 = vld [vmem:[#allocation25_spill] sm:$0xff] }
 0x4ab   :  { %1979 = vmatpush.msra.mxu0 %v8025_v19  ;;  %2019 = vmatpush.msra.mxu2 %v8027_v9  ;;  %v2160_v33 = vld [vmem:[%s7722_s2 + $0x118] sm:$0xff]  ;;  %v8037_v44 = vld [vmem:[#allocation18_spill] sm:$0xff]  ;;  %v2153_v4 = vld [vmem:[%s7722_s2 + $0xe0] sm:$0xff] }
 0x4ac   :  { %2038 = vmatpush.msra.mxu3 %v8024_v6  ;;  %2000 = vmatpush.msra.mxu1 %v8030_v36  ;;  %v319_v50 = vadd.f32 %v8037_v44, %v8036_v34  ;;  %v2155_v55 = vld [vmem:[%s7722_s2 + $0xf0] sm:$0xff]  ;;  %v2156_v6 = vld [vmem:[%s7722_s2 + $0xf8] sm:$0xff]  ;;  %v2149_v25 = vld [vmem:[%s7722_s2 + $0xc0] sm:$0xff] }
 0x4ad   :  { %1980 = vmatpush.msra.mxu0 %v8029_v58  ;;  %2020 = vmatpush.msra.mxu2 %v5973_v31  ;;  %v2186_v31 = vld [vmem:[%s7722_s2 + $0x1e8] sm:$0xff]  ;;  %v2152_v9 = vld [vmem:[%s7722_s2 + $0xd8] sm:$0xff]  ;;  %v2145_v58 = vld [vmem:[%s7722_s2 + $0xa0] sm:$0xff] }
 0x4ae   :  { %2039 = vmatpush.msra.mxu3 %v8028_v29  ;;  %2001 = vmatpush.msra.mxu1 %v5990_v32  ;;  %v2188_v32 = vld [vmem:[%s7722_s2 + $0x1f8] sm:$0xff]  ;;  %v2146_v36 = vld [vmem:[%s7722_s2 + $0xa8] sm:$0xff] }
 0x4af   :  { %v3877_v2 = vpop.eup %3876  ;;  %1981 = vmatpush.msra.mxu0 %v5985_v49  ;;  %2021 = vmatpush.msra.mxu2 %v8031_v1  ;;  %v2174_v49 = vld [vmem:[%s7722_s2 + $0x188] sm:$0xff]  ;;  %v2147_v1 = vld [vmem:[%s7722_s2 + $0xb0] sm:$0xff] }
 0x4b0   :  { %v6100_v39 = vmul.f32 %v3877_v2, %v1666_v5  ;;  %2040 = vmatpush.msra.mxu3 %v5980_v26  ;;  %v2185_v26 = vld [vmem:[%s7722_s2 + $0x1e0] sm:$0xff]  ;;  %v2150_v2 = vld [vmem:[%s7722_s2 + $0xc8] sm:$0xff]  ;;  %v2151_v5 = vld [vmem:[%s7722_s2 + $0xd0] sm:$0xff] }
 0x4b1   :  { %v2130_v63 = vld [vmem:[%s7722_s2 + $0x28] sm:$0xff] }
 0x4b2   :  { %1762 = vmatmul.f32.vlgmr.msrb.gmra.mxu0 %v6100_v39  ;;  %1782 = vmatmul.f32.vlgmr.msrb.gmra.mxu1 %v6100_v39 }
 0x4b3   :  { %1802 = vmatmul.f32.vlgmr.msrb.gmra.mxu2 %v6100_v39  ;;  %1822 = vmatmul.f32.vlgmr.msrb.gmra.mxu3 %v6100_v39 }
 0x4b4   :  { %2041 = vmatpush.msra.mxu3 %v6004_v3  ;;  %2199 = vmatpush.msrb.mxu0 %v2185_v26  ;;  %v2181_v3 = vld [vmem:[%s7722_s2 + $0x1c0] sm:$0xff] }
 0x4b5   :  { %2240 = vmatpush.msrb.mxu1 %v2186_v31  ;;  %2281 = vmatpush.msrb.mxu2 %v2187_v35  ;;  %v2148_v31 = vld [vmem:[%s7722_s2 + $0xb8] sm:$0xff]  ;;  %v2141_v35 = vld [vmem:[%s7722_s2 + $0x80] sm:$0xff] }
 0x4b6   :  { %2322 = vmatpush.msrb.mxu3 %v2188_v32  ;;  %2200 = vmatpush.msrb.mxu0 %v2181_v3  ;;  %v2142_v32 = vld [vmem:[%s7722_s2 + $0x88] sm:$0xff] }
 0x4b7   :  { %2241 = vmatpush.msrb.mxu1 %v2182_v37  ;;  %2282 = vmatpush.msrb.mxu2 %v2183_v24  ;;  %v2143_v24 = vld [vmem:[%s7722_s2 + $0x90] sm:$0xff] }
 0x4b8   :  { %2323 = vmatpush.msrb.mxu3 %v2184_v20  ;;  %2201 = vmatpush.msrb.mxu0 %v2177_v23  ;;  %v2144_v20 = vld [vmem:[%s7722_s2 + $0x98] sm:$0xff] }
 0x4b9   :  { %2242 = vmatpush.msrb.mxu1 %v2178_v0  ;;  %2283 = vmatpush.msrb.mxu2 %v2179_v13  ;;  %v2137_v0 = vld [vmem:[%s7722_s2 + $0x60] sm:$0xff]  ;;  %v2138_v13 = vld [vmem:[%s7722_s2 + $0x68] sm:$0xff] }
 0x4ba   :  { %2324 = vmatpush.msrb.mxu3 %v2180_v28  ;;  %2202 = vmatpush.msrb.mxu0 %v2173_v7  ;;  %v2139_v28 = vld [vmem:[%s7722_s2 + $0x70] sm:$0xff]  ;;  %v2140_v7 = vld [vmem:[%s7722_s2 + $0x78] sm:$0xff] }
 0x4bb   :  { %2243 = vmatpush.msrb.mxu1 %v2174_v49  ;;  %2284 = vmatpush.msrb.mxu2 %v2175_v47  ;;  %v2133_v49 = vld [vmem:[%s7722_s2 + $0x40] sm:$0xff]  ;;  %v2134_v47 = vld [vmem:[%s7722_s2 + $0x48] sm:$0xff] }
 0x4bc   :  { %2325 = vmatpush.msrb.mxu3 %v2176_v60  ;;  %2203 = vmatpush.msrb.mxu0 %v2169_v30  ;;  %v2135_v60 = vld [vmem:[%s7722_s2 + $0x50] sm:$0xff]  ;;  %v2136_v30 = vld [vmem:[%s7722_s2 + $0x58] sm:$0xff] }
 0x4bd   :  { %2244 = vmatpush.msrb.mxu1 %v2170_v46  ;;  %2285 = vmatpush.msrb.mxu2 %v2171_v57  ;;  %v2129_v46 = vld [vmem:[%s7722_s2 + $0x20] sm:$0xff] }
 0x4be   :  { %2326 = vmatpush.msrb.mxu3 %v2172_v21  ;;  %2204 = vmatpush.msrb.mxu0 %v2165_v12  ;;  %v8038_v21 = vld [vmem:[#allocation23_spill] sm:$0xff]  ;;  %v2126_v12 = vld [vmem:[%s7722_s2 + $0x8] sm:$0xff] }
 0x4bf   :  { %2245 = vmatpush.msrb.mxu1 %v2166_v38  ;;  %2286 = vmatpush.msrb.mxu2 %v2167_v45  ;;  %v2127_v45 = vld [vmem:[%s7722_s2 + $0x10] sm:$0xff] }
 0x4c0   :  { %2327 = vmatpush.msrb.mxu3 %v2168_v51  ;;  %2205 = vmatpush.msrb.mxu0 %v2161_v56 }
 0x4c1   :  { %2246 = vmatpush.msrb.mxu1 %v2162_v59  ;;  %2287 = vmatpush.msrb.mxu2 %v2163_v61 }
 0x4c2   :  { %2328 = vmatpush.msrb.mxu3 %v2164_v17  ;;  %2206 = vmatpush.msrb.mxu0 %v2157_v18 }
 0x4c3   :  { %2247 = vmatpush.msrb.mxu1 %v2158_v40  ;;  %2288 = vmatpush.msrb.mxu2 %v2159_v41 }
 0x4c4   :  { %2329 = vmatpush.msrb.mxu3 %v2160_v33  ;;  %2207 = vmatpush.msrb.mxu0 %v2153_v4 }
 0x4c5   :  { %2248 = vmatpush.msrb.mxu1 %v2154_v54  ;;  %2289 = vmatpush.msrb.mxu2 %v2155_v55 }
 0x4c6   :  { %2330 = vmatpush.msrb.mxu3 %v2156_v6  ;;  %2208 = vmatpush.msrb.mxu0 %v2149_v25 }
 0x4c7   :  { %2249 = vmatpush.msrb.mxu1 %v2150_v2  ;;  %2290 = vmatpush.msrb.mxu2 %v2151_v5 }
 0x4c8   :  { %2331 = vmatpush.msrb.mxu3 %v2152_v9  ;;  %2209 = vmatpush.msrb.mxu0 %v2145_v58 }
 0x4c9   :  { %2250 = vmatpush.msrb.mxu1 %v2146_v36  ;;  %2291 = vmatpush.msrb.mxu2 %v2147_v1 }
 0x4ca   :  { %2332 = vmatpush.msrb.mxu3 %v2148_v31  ;;  %2210 = vmatpush.msrb.mxu0 %v2141_v35 }
 0x4cb   :  { %2251 = vmatpush.msrb.mxu1 %v2142_v32  ;;  %2292 = vmatpush.msrb.mxu2 %v2143_v24 }
 0x4cc   :  { %2333 = vmatpush.msrb.mxu3 %v2144_v20  ;;  %2211 = vmatpush.msrb.mxu0 %v2137_v0  ;;  %v8040_v0 = vld [vmem:[#allocation29_spill] sm:$0xff] }
 0x4cd   :  { %2252 = vmatpush.msrb.mxu1 %v2138_v13  ;;  %2293 = vmatpush.msrb.mxu2 %v2139_v28  ;;  %v8041_v13 = vld [vmem:[#allocation42_spill] sm:$0xff]  ;;  %v6347_v28 = vld [vmem:[%s7723_s4 + $0x1e0] sm:$0xff] }
 0x4ce   :  { %2334 = vmatpush.msrb.mxu3 %v2140_v7  ;;  %2212 = vmatpush.msrb.mxu0 %v2133_v49  ;;  %v6352_v7 = vld [vmem:[%s7723_s4 + $0x1e8] sm:$0xff]  ;;  %v6357_v49 = vld [vmem:[%s7723_s4 + $0x1c0] sm:$0xff] }
 0x4cf   :  { %2253 = vmatpush.msrb.mxu1 %v2134_v47  ;;  %2294 = vmatpush.msrb.mxu2 %v2135_v60  ;;  %v6364_v47 = vld [vmem:[%s7723_s4 + $0x1c8] sm:$0xff]  ;;  %v6369_v60 = vld [vmem:[%s7723_s4 + $0x1f8] sm:$0xff] }
 0x4d0   :  { %2335 = vmatpush.msrb.mxu3 %v2136_v30  ;;  %2213 = vmatpush.msrb.mxu0 %v2129_v46  ;;  %8042 = vst [vmem:[#allocation33_spill] sm:$0xff] %v6364_v47  ;;  %v6375_v30 = vld [vmem:[%s7723_s4 + $0x1a0] sm:$0xff]  ;;  %v6380_v46 = vld [vmem:[%s7723_s4 + $0x1a8] sm:$0xff] }
 0x4d1   :  { %2254 = vmatpush.msrb.mxu1 %v2130_v63  ;;  %8043 = vst [vmem:[#allocation34_spill] sm:$0xff] %v6369_v60  ;;  %v8046_v63 = vld [vmem:[#allocation43_spill] sm:$0xff] }
 0x4d2   :  { %2336 = vmatpush.msrb.mxu3 %v2132_v22  ;;  %8044 = vst [vmem:[#allocation35_spill] sm:$0xff] %v6375_v30  ;;  %v6407_v22 = vld [vmem:[%s7723_s4 + $0x1f0] sm:$0xff] }
 0x4d3   :  { %2255 = vmatpush.msrb.mxu1 %v2126_v12  ;;  %8045 = vst [vmem:[#allocation36_spill] sm:$0xff] %v6380_v46  ;;  %v6442_v12 = vld [vmem:[%s7723_s4 + $0x168] sm:$0xff] }
 0x52f   :  { %v1763_v10 = vpop.f32.mrf.mxu0  ;;  %v1783_v43 = vpop.f32.mrf.mxu1 }
 0x530   :  { %v1826_v48 = vadd.f32 %v1763_v10, %v196_v8  ;;  %v1827_v11 = vadd.f32 %v1783_v43, %v237_v53  ;;  %v2131_v8 = vld [vmem:[%s7722_s2 + $0x30] sm:$0xff]  ;;  %v278_v10 = vadd.f32 %v8038_v21, %v8004_v52  ;;  %v2125_v43 = vld [vmem:[%s7722_s2] sm:$0xff] }
 0x531   :  { %2295 = vmatpush.msrb.mxu2 %v2131_v8  ;;  %2214 = vmatpush.msrb.mxu0 %v2125_v43  ;;  %v8047_v8 = vld [vmem:[#allocation44_spill] sm:$0xff] }
 0x532   :  { %v3744_v62 = vmul.f32 -1.442695, %v1826_v48  ;;  %v3745_v16 = vmul.f32 -1.442695, %v1827_v11  ;;  %v2128_v48 = vld [vmem:[%s7722_s2 + $0x18] sm:$0xff]  ;;  %v6424_v21 = vld [vmem:[%s7723_s4 + $0x180] sm:$0xff] }
 0x533   :  { %2296 = vmatpush.msrb.mxu2 %v2127_v45  ;;  %2337 = vmatpush.msrb.mxu3 %v2128_v48  ;;  %v6435_v43 = vld [vmem:[%s7723_s4 + $0x160] sm:$0xff]  ;;  %v6452_v45 = vld [vmem:[%s7723_s4 + $0x1b0] sm:$0xff] }
 0x534   :  { %3878 = vpow2.f32 %v3744_v62  ;;  %v6459_v48 = vld [vmem:[%s7723_s4 + $0x190] sm:$0xff] }
 0x535   :  { %3880 = vpow2.f32 %v3745_v16 }
 0x536   :  { %v1823_v14 = vpop.f32.mrf.mxu3  ;;  %v1803_v57 = vpop.f32.mrf.mxu2 }
 0x537   :  { %v1829_v19 = vadd.f32 %v1823_v14, %v319_v50  ;;  %v1828_v51 = vadd.f32 %v1803_v57, %v278_v10  ;;  %v6385_v57 = vld [vmem:[%s7723_s4 + $0x1d8] sm:$0xff]  ;;  %v6429_v10 = vld [vmem:[%s7723_s4 + $0x188] sm:$0xff] }
 0x539   :  { %v3746_v29 = vmul.f32 -1.442695, %v1829_v19 }
 0x53a   :  { %v3879_v26 = vpop.eup %3878 }
 0x53b   :  { %v3881_v3 = vpop.eup %3880  ;;  %v6258_v37 = vadd.f32 1.0, %v3879_v26  ;;  %3882 = vpow2.f32 %v3746_v29 }
 0x53c   :  { %v6266_v23 = vadd.f32 1.0, %v3881_v3 }
 0x53d   :  { %3884 = vrcp.f32 %v6258_v37  ;;  %v1845_v17 = vand.u32 2147483648, %v6258_v37  ;;  %v1843_v41 = vand.u32 2147483647, %v6258_v37  ;;  %vm1839_vm2 = vweird.f32 %v6258_v37 }
 0x53e   :  { %3886 = vrcp.f32 %v6266_v23  ;;  %v1864_v18 = vand.u32 2147483648, %v6266_v23  ;;  %v1862_v44 = vand.u32 2147483647, %v6266_v23  ;;  %vm1858_vm3 = vweird.f32 %v6266_v23 }
 0x53f   :  { %v1846_v54 = vor.u32 1.1754944e-38, %v1845_v17  ;;  %vm1844_vm6 = vcmp.eq.f32.partialorder %v1843_v41, 8.507059e+37 }
 0x540   :  { %v1865_v6 = vor.u32 1.1754944e-38, %v1864_v18  ;;  %vm1863_vm7 = vcmp.eq.f32.partialorder %v1862_v44, 8.507059e+37  ;;  %v6482_v18 = vld [vmem:[%s7723_s4 + $0x140] sm:$0xff] }
 0x541   :  { %v3883_v53 = vpop.eup %3882  ;;  %v6505_v44 = vld [vmem:[%s7723_s4 + $0x120] sm:$0xff] }
 0x542   :  { %v1872_v38 = vadd.f32 1.0, %v3883_v53  ;;  %v6413_v53 = vld [vmem:[%s7723_s4 + $0x1d0] sm:$0xff] }
 0x543   :  { %v3885_v11 = vpop.eup %3884 }
 0x544   :  { %v3887_v56 = vpop.eup %3886  ;;  %v1835_v59 = vmul.f32 %v3885_v11, %v6258_v37  ;;  %3888 = vrcp.f32 %v1872_v38  ;;  %vm1840_vm0 = vweird.f32 %v3885_v11  ;;  %v1884_v35 = vand.u32 2147483648, %v1872_v38 }
 0x545   :  { %v1854_v61 = vmul.f32 %v3887_v56, %v6266_v23  ;;  %3890 = vtanh.f32 %v1828_v51  ;;  %vm1859_vm1 = vweird.f32 %v3887_v56  ;;  %vm1841_vm4 = vmor %vm1839_vm2, %vm1840_vm0  ;;  %vm1878_vm9 = vweird.f32 %v1872_v38  ;;  %v6472_v51 = vld [vmem:[%s7723_s4 + $0x170] sm:$0xff] }
 0x546   :  { %v1836_v62 = vsub.f32 1.0, %v1835_v59  ;;  %vm1860_vm5 = vmor %vm1858_vm3, %vm1859_vm1  ;;  %v1882_v32 = vand.u32 2147483647, %v1872_v38  ;;  %v1885_v37 = vor.u32 1.1754944e-38, %v1884_v35  ;;  %v6583_v35 = vld [vmem:[%s7723_s4 + $0x110] sm:$0xff] }
 0x547   :  { %v1855_v16 = vsub.f32 1.0, %v1854_v61  ;;  %v8050_v61 = vld [vmem:[#allocation20_spill] sm:$0xff] }
 0x548   :  { %v1837_v40 = vmul.f32 %v3885_v11, %v1836_v62  ;;  %vm1883_vm11 = vcmp.eq.f32.partialorder %v1882_v32, 8.507059e+37  ;;  %v240_v62 = vadd.f32 %v8050_v61, %v8034_v15 }
 0x549   :  { %v1856_v33 = vmul.f32 %v3887_v56, %v1855_v16 }
 0x54a   :  { %v3889_v50 = vpop.eup %3888  ;;  %v1838_v4 = vadd.f32 %v3885_v11, %v1837_v40  ;;  %v6487_v40 = vld [vmem:[%s7723_s4 + $0x148] sm:$0xff] }
 0x54b   :  { %v1857_v55 = vadd.f32 %v3887_v56, %v1856_v33  ;;  %v1874_v14 = vmul.f32 %v3889_v50, %v1872_v38  ;;  %v3891_v25 = vpop.eup %3890  ;;  %vm1879_vm8 = vweird.f32 %v3889_v50  ;;  %v6447_v38 = vld [vmem:[%s7723_s4 + $0x198] sm:$0xff]  ;;  %v6500_v33 = vld [vmem:[%s7723_s4 + $0x150] sm:$0xff] }
 0x54c   :  { %v1842_v19 = vsel %vm1841_vm4, %v3885_v11, %v1838_v4  ;;  %vm1880_vm10 = vmor %vm1878_vm9, %vm1879_vm8  ;;  %v6466_v11 = vld [vmem:[%s7723_s4 + $0x178] sm:$0xff] }
 0x54d   :  { %v1847_v2 = vsel %vm1844_vm6, %v1846_v54, %v1842_v19  ;;  %v1861_v5 = vsel %vm1860_vm5, %v3887_v56, %v1857_v55  ;;  %v1875_v9 = vsub.f32 1.0, %v1874_v14  ;;  %v8049_v56 = vld [vmem:[#allocation19_spill] sm:$0xff]  ;;  %v6524_v14 = vld [vmem:[%s7723_s4 + $0x130] sm:$0xff]  ;;  %v6534_v19 = vld [vmem:[%s7723_s4 + $0x108] sm:$0xff] }
 0x54e   :  { %v1866_v29 = vsel %vm1863_vm7, %v1865_v6, %v1861_v5  ;;  %v1889_v58 = vmul.f32 %v3891_v25, %v1847_v2  ;;  %v199_v59 = vadd.f32 %v8049_v56, %v8032_v42  ;;  %v6492_v42 = vld [vmem:[%s7723_s4 + $0x158] sm:$0xff]  ;;  %v6529_v6 = vld [vmem:[%s7723_s4 + $0x100] sm:$0xff]  ;;  %v6548_v2 = vld [vmem:[%s7723_s4 + $0xe8] sm:$0xff] }
 0x54f   :  { %v1888_v36 = vmul.f32 %v1866_v29, %v6073_v27  ;;  %v1876_v1 = vmul.f32 %v3889_v50, %v1875_v9  ;;  %v8039_v27 = vld [vmem:[#allocation28_spill] sm:$0xff]  ;;  %v6516_v4 = vld [vmem:[%s7723_s4 + $0x138] sm:$0xff]  ;;  %v6636_v56 = vld [vmem:[%s7723_s4 + $0xb0] sm:$0xff] }
 0x550   :  { %v6540_v25 = vld [vmem:[%s7723_s4 + $0xe0] sm:$0xff]  ;;  %v6553_v5 = vld [vmem:[%s7723_s4 + $0x118] sm:$0xff]  ;;  %8060 = vst [vmem:[#allocation6_spill] sm:$0xff] %v6636_v56 }
 0x551   :  { %v6329_v26 = vadd.f32 %v1889_v58, %v1888_v36  ;;  %v1877_v31 = vadd.f32 %v3889_v50, %v1876_v1  ;;  %v8051_v9 = vld [vmem:[#allocation24_spill] sm:$0xff]  ;;  %v6566_v36 = vld [vmem:[%s7723_s4 + $0xc8] sm:$0xff]  ;;  %v6571_v1 = vld [vmem:[%s7723_s4 + $0xf8] sm:$0xff] }
 0x552   :  { %v322_v29 = vadd.f32 %v8051_v9, %v8036_v34  ;;  %v6561_v58 = vld [vmem:[%s7723_s4 + $0xc0] sm:$0xff]  ;;  %v6578_v34 = vld [vmem:[%s7723_s4 + $0xd8] sm:$0xff]  ;;  %v6685_v9 = vld [vmem:[%s7723_s4 + $0x70] sm:$0xff] }
 0x553   :  { %3892 = vtanh.f32 %v6329_v26  ;;  %v1881_v3 = vsel %vm1880_vm10, %v3889_v50, %v1877_v31  ;;  %v6510_v50 = vld [vmem:[%s7723_s4 + $0x128] sm:$0xff]  ;;  %8052 = vst [vmem:[#allocation38_spill] sm:$0xff] %v6578_v34 }
 0x554   :  { %v1886_v20 = vsel %vm1883_vm11, %v1885_v37, %v1881_v3  ;;  %v6589_v3 = vld [vmem:[%s7723_s4 + $0xa0] sm:$0xff]  ;;  %v6594_v37 = vld [vmem:[%s7723_s4 + $0xa8] sm:$0xff]  ;;  %8067 = vst [vmem:[#allocation14_spill] sm:$0xff] %v6685_v9 }
 0x555   :  { %8053 = vst [vmem:[#allocation39_spill] sm:$0xff] %v6589_v3 }
 0x556   :  { %8054 = vst [vmem:[#allocation40_spill] sm:$0xff] %v6594_v37 }
 0x559   :  { %v3893_v24 = vpop.eup %3892 }
 0x55a   :  { %v1892_v23 = vmul.f32 %v3893_v24, %v1886_v20  ;;  %v6602_v24 = vld [vmem:[%s7723_s4 + $0xb8] sm:$0xff]  ;;  %v6607_v20 = vld [vmem:[%s7723_s4 + $0xf0] sm:$0xff] }
 0x55b   :  { %8055 = vst [vmem:[#allocation41_spill] sm:$0xff] %v6602_v24 }
 0x55c   :  { %1982 = vmatmul.f32.vlgmr.msra.gmra.mxu0 %v1892_v23  ;;  %2002 = vmatmul.f32.vlgmr.msra.gmra.mxu1 %v1892_v23 }
 0x55d   :  { %2022 = vmatmul.f32.vlgmr.msra.gmra.mxu2 %v1892_v23  ;;  %2042 = vmatmul.f32.vlgmr.msra.gmra.mxu3 %v1892_v23 }
 0x55e   :  { %2463 = vmatpush.msra.mxu0 %v6347_v28  ;;  %2483 = vmatpush.msra.mxu1 %v6352_v7 }
 0x55f   :  { %2523 = vmatpush.msra.mxu3 %v6369_v60  ;;  %2503 = vmatpush.msra.mxu2 %v6407_v22 }
 0x560   :  { %2464 = vmatpush.msra.mxu0 %v6357_v49  ;;  %2484 = vmatpush.msra.mxu1 %v6364_v47 }
 0x561   :  { %2524 = vmatpush.msra.mxu3 %v6385_v57  ;;  %2504 = vmatpush.msra.mxu2 %v6413_v53 }
 0x562   :  { %2465 = vmatpush.msra.mxu0 %v6375_v30  ;;  %2485 = vmatpush.msra.mxu1 %v6380_v46 }
 0x563   :  { %2505 = vmatpush.msra.mxu2 %v6452_v45 }
 0x564   :  { %2215 = vmatmul.f32.vlgmr.msrb.gmra.mxu0 %v8039_v27  ;;  %2256 = vmatmul.f32.vlgmr.msrb.gmra.mxu1 %v8039_v27 }
 0x565   :  { %2297 = vmatmul.f32.vlgmr.msrb.gmra.mxu2 %v8039_v27  ;;  %2338 = vmatmul.f32.vlgmr.msrb.gmra.mxu3 %v8039_v27  ;;  %v6613_v27 = vld [vmem:[%s7723_s4 + $0x80] sm:$0xff] }
 0x566   :  { %2466 = vmatpush.msra.mxu0 %v6424_v21  ;;  %2486 = vmatpush.msra.mxu1 %v6429_v10  ;;  %8056 = vst [vmem:[#allocation4_spill] sm:$0xff] %v6613_v27 }
 0x567   :  { %2506 = vmatpush.msra.mxu2 %v6459_v48 }
 0x568   :  { %2467 = vmatpush.msra.mxu0 %v6435_v43  ;;  %2487 = vmatpush.msra.mxu1 %v6442_v12 }
 0x569   :  { %2507 = vmatpush.msra.mxu2 %v6472_v51 }
 0x56a   :  { %2468 = vmatpush.msra.mxu0 %v6482_v18  ;;  %2488 = vmatpush.msra.mxu1 %v6487_v40 }
 0x56b   :  { %2508 = vmatpush.msra.mxu2 %v6500_v33 }
 0x56c   :  { %2218 = vmatmul.f32.gmra.mxu0 %v8040_v0  ;;  %2259 = vmatmul.f32.gmra.mxu1 %v8040_v0 }
 0x56d   :  { %2300 = vmatmul.f32.gmra.mxu2 %v8040_v0  ;;  %2341 = vmatmul.f32.gmra.mxu3 %v8040_v0  ;;  %v6618_v0 = vld [vmem:[%s7723_s4 + $0x88] sm:$0xff] }
 0x56e   :  { %2469 = vmatpush.msra.mxu0 %v6505_v44  ;;  %2489 = vmatpush.msra.mxu1 %v6510_v50  ;;  %8057 = vst [vmem:[#allocation5_spill] sm:$0xff] %v6618_v0 }
 0x56f   :  { %2509 = vmatpush.msra.mxu2 %v6524_v14 }
 0x570   :  { %2470 = vmatpush.msra.mxu0 %v6529_v6  ;;  %2490 = vmatpush.msra.mxu1 %v6534_v19 }
 0x571   :  { %2510 = vmatpush.msra.mxu2 %v6583_v35 }
 0x572   :  { %2471 = vmatpush.msra.mxu0 %v6540_v25  ;;  %2491 = vmatpush.msra.mxu1 %v6548_v2 }
 0x573   :  { %2511 = vmatpush.msra.mxu2 %v6607_v20 }
 0x574   :  { %2221 = vmatmul.f32.gmra.mxu0 %v8041_v13  ;;  %2262 = vmatmul.f32.gmra.mxu1 %v8041_v13 }
 0x575   :  { %2303 = vmatmul.f32.gmra.mxu2 %v8041_v13  ;;  %2344 = vmatmul.f32.gmra.mxu3 %v8041_v13  ;;  %v6624_v13 = vld [vmem:[%s7723_s4 + $0xd0] sm:$0xff] }
 0x576   :  { %2472 = vmatpush.msra.mxu0 %v6561_v58  ;;  %2492 = vmatpush.msra.mxu1 %v6566_v36  ;;  %8058 = vst [vmem:[#allocation7_spill] sm:$0xff] %v6624_v13 }
 0x577   :  { %2512 = vmatpush.msra.mxu2 %v6624_v13 }
 0x578   :  { %2473 = vmatpush.msra.mxu0 %v6589_v3  ;;  %2493 = vmatpush.msra.mxu1 %v6594_v37 }
 0x579   :  { %2513 = vmatpush.msra.mxu2 %v6636_v56 }
 0x57a   :  { %2474 = vmatpush.msra.mxu0 %v6613_v27  ;;  %2494 = vmatpush.msra.mxu1 %v6618_v0 }
 0x57c   :  { %2224 = vmatmul.f32.gmra.mxu0 %v8046_v63  ;;  %2265 = vmatmul.f32.gmra.mxu1 %v8046_v63 }
 0x57d   :  { %2306 = vmatmul.f32.gmra.mxu2 %v8046_v63  ;;  %2347 = vmatmul.f32.gmra.mxu3 %v8046_v63 }
 0x584   :  { %2227 = vmatmul.f32.gmra.mxu0 %v8047_v8  ;;  %2268 = vmatmul.f32.gmra.mxu1 %v8047_v8 }
 0x585   :  { %2309 = vmatmul.f32.gmra.mxu2 %v8047_v8  ;;  %2350 = vmatmul.f32.gmra.mxu3 %v8047_v8  ;;  %v6631_v8 = vld [vmem:[%s7723_s4 + $0x98] sm:$0xff] }
 0x586   :  { %8059 = vst [vmem:[#allocation27_spill] sm:$0xff] %v6631_v8 }
 0x58c   :  { %2230 = vmatmul.f32.gmra.mxu0 %v6100_v39  ;;  %2271 = vmatmul.f32.gmra.mxu1 %v6100_v39 }
 0x58d   :  { %2312 = vmatmul.f32.gmra.mxu2 %v6100_v39  ;;  %2353 = vmatmul.f32.gmra.mxu3 %v6100_v39  ;;  %v6418_v39 = vld [vmem:[%s7723_s4 + $0x1b8] sm:$0xff] }
 0x58e   :  { %8048 = vst [vmem:[#allocation37_spill] sm:$0xff] %v6418_v39  ;;  %2525 = vmatpush.msra.mxu3 %v6418_v39 }
 0x590   :  { %2526 = vmatpush.msra.mxu3 %v6447_v38 }
 0x592   :  { %2527 = vmatpush.msra.mxu3 %v6466_v11 }
 0x594   :  { %2233 = vmatmul.f32.gmra.mxu0 %v1892_v23  ;;  %2274 = vmatmul.f32.gmra.mxu1 %v1892_v23 }
 0x595   :  { %2315 = vmatmul.f32.gmra.mxu2 %v1892_v23  ;;  %2356 = vmatmul.f32.gmra.mxu3 %v1892_v23 }
 0x596   :  { %2528 = vmatpush.msra.mxu3 %v6492_v42 }
 0x598   :  { %2529 = vmatpush.msra.mxu3 %v6516_v4 }
 0x59a   :  { %2530 = vmatpush.msra.mxu3 %v6553_v5 }
 0x59c   :  { %2531 = vmatpush.msra.mxu3 %v6571_v1 }
 0x59e   :  { %2532 = vmatpush.msra.mxu3 %v6578_v34 }
 0x5a0   :  { %2533 = vmatpush.msra.mxu3 %v6602_v24 }
 0x5a2   :  { %2534 = vmatpush.msra.mxu3 %v6631_v8 }
 0x5d9   :  { %v1983_v16 = vpop.f32.mrf.mxu0  ;;  %v2003_v17 = vpop.f32.mrf.mxu1 }
 0x5da   :  { %v2046_v15 = vadd.f32 %v1983_v16, %v199_v59  ;;  %v2047_v41 = vadd.f32 %v2003_v17, %v240_v62  ;;  %v6644_v62 = vld [vmem:[%s7723_s4 + $0x60] sm:$0xff]  ;;  %v6649_v16 = vld [vmem:[%s7723_s4 + $0x68] sm:$0xff] }
 0x5db   :  { %8061 = vst [vmem:[#allocation8_spill] sm:$0xff] %v6644_v62  ;;  %2475 = vmatpush.msra.mxu0 %v6644_v62  ;;  %2495 = vmatpush.msra.mxu1 %v6649_v16  ;;  %v6718_v62 = vld [vmem:[%s7723_s4] sm:$0xff] }
 0x5dc   :  { %v3747_v54 = vmul.f32 -1.442695, %v2046_v15  ;;  %v3748_v55 = vmul.f32 -1.442695, %v2047_v41  ;;  %8062 = vst [vmem:[#allocation9_spill] sm:$0xff] %v6649_v16  ;;  %v6659_v15 = vld [vmem:[%s7723_s4 + $0x78] sm:$0xff] }
 0x5dd   :  { %8063 = vst [vmem:[#allocation10_spill] sm:$0xff] %v6659_v15  ;;  %v6664_v41 = vld [vmem:[%s7723_s4 + $0x90] sm:$0xff]  ;;  %2535 = vmatpush.msra.mxu3 %v6659_v15 }
 0x5de   :  { %3894 = vpow2.f32 %v3747_v54  ;;  %8064 = vst [vmem:[#allocation13_spill] sm:$0xff] %v6664_v41  ;;  %v6671_v54 = vld [vmem:[%s7723_s4 + $0x40] sm:$0xff]  ;;  %2514 = vmatpush.msra.mxu2 %v6664_v41  ;;  %v8072_v15 = vld [vmem:[#allocation26_spill] sm:$0xff] }
 0x5df   :  { %3896 = vpow2.f32 %v3748_v55  ;;  %8065 = vst [vmem:[#allocation11_spill] sm:$0xff] %v6671_v54  ;;  %v6676_v55 = vld [vmem:[%s7723_s4 + $0x48] sm:$0xff]  ;;  %2476 = vmatpush.msra.mxu0 %v6671_v54  ;;  %v281_v16 = vadd.f32 %v8072_v15, %v8004_v52  ;;  %v6728_v54 = vld [vmem:[%s7723_s4 + $0x38] sm:$0xff]  ;;  %v6737_v15 = vld [vmem:[%s7723_s4 + $0x30] sm:$0xff] }
 0x5e0   :  { %v2043_v31 = vpop.f32.mrf.mxu3  ;;  %8066 = vst [vmem:[#allocation12_spill] sm:$0xff] %v6676_v55  ;;  %2496 = vmatpush.msra.mxu1 %v6676_v55  ;;  %2515 = vmatpush.msra.mxu2 %v6685_v9  ;;  %v6723_v55 = vld [vmem:[%s7723_s4 + $0x8] sm:$0xff] }
 0x5e1   :  { %v2049_v32 = vadd.f32 %v2043_v31, %v322_v29  ;;  %v6690_v29 = vld [vmem:[%s7723_s4 + $0x58] sm:$0xff]  ;;  %v6697_v31 = vld [vmem:[%s7723_s4 + $0x20] sm:$0xff]  ;;  %8073 = vst [vmem:[#allocation48_spill] sm:$0xff] %v6718_v62 }
 0x5e2   :  { %8068 = vst [vmem:[#allocation17_spill] sm:$0xff] %v6690_v29  ;;  %2536 = vmatpush.msra.mxu3 %v6690_v29  ;;  %2477 = vmatpush.msra.mxu0 %v6697_v31  ;;  %v6742_v29 = vld [vmem:[%s7723_s4 + $0x18] sm:$0xff] }
 0x5e3   :  { %v3749_v23 = vmul.f32 -1.442695, %v2049_v32  ;;  %8069 = vst [vmem:[#allocation45_spill] sm:$0xff] %v6697_v31  ;;  %v6702_v32 = vld [vmem:[%s7723_s4 + $0x28] sm:$0xff] }
 0x5e4   :  { %v3895_v63 = vpop.eup %3894  ;;  %8070 = vst [vmem:[#allocation46_spill] sm:$0xff] %v6702_v32  ;;  %2497 = vmatpush.msra.mxu1 %v6702_v32  ;;  %2537 = vmatpush.msra.mxu3 %v6728_v54  ;;  %v6753_v32 = vld [vmem:[%s7723_s4 + $0x10] sm:$0xff] }
 0x5e5   :  { %v3897_v59 = vpop.eup %3896  ;;  %v6638_v61 = vadd.f32 1.0, %v3895_v63  ;;  %3898 = vpow2.f32 %v3749_v23  ;;  %v2023_v23 = vpop.f32.mrf.mxu2  ;;  %v6709_v63 = vld [vmem:[%s7723_s4 + $0x50] sm:$0xff]  ;;  %8074 = vst [vmem:[#allocation49_spill] sm:$0xff] %v6723_v55  ;;  %2478 = vmatpush.msra.mxu0 %v6718_v62 }
 0x5e6   :  { %v6652_v17 = vadd.f32 1.0, %v3897_v59  ;;  %8071 = vst [vmem:[#allocation47_spill] sm:$0xff] %v6709_v63  ;;  %v2048_v8 = vadd.f32 %v2023_v23, %v281_v16  ;;  %2516 = vmatpush.msra.mxu2 %v6709_v63  ;;  %2498 = vmatpush.msra.mxu1 %v6723_v55 }
 0x5e7   :  { %3900 = vrcp.f32 %v6638_v61  ;;  %8075 = vst [vmem:[#allocation30_spill] sm:$0xff] %v6728_v54  ;;  %2538 = vmatpush.msra.mxu3 %v6742_v29  ;;  %2614 = vmatpush.msrb.mxu0 %v6347_v28  ;;  %v2065_v62 = vand.u32 2147483648, %v6638_v61  ;;  %vm2059_vm14 = vweird.f32 %v6638_v61 }
 0x5e8   :  { %3902 = vrcp.f32 %v6652_v17  ;;  %8076 = vst [vmem:[#allocation31_spill] sm:$0xff] %v6737_v15  ;;  %2517 = vmatpush.msra.mxu2 %v6737_v15  ;;  %2634 = vmatpush.msrb.mxu1 %v6352_v7  ;;  %v2084_v55 = vand.u32 2147483648, %v6652_v17  ;;  %v2063_v15 = vand.u32 2147483647, %v6638_v61  ;;  %vm2078_vm15 = vweird.f32 %v6652_v17 }
 0x5e9   :  { %8077 = vst [vmem:[#allocation32_spill] sm:$0xff] %v6742_v29  ;;  %2674 = vmatpush.msrb.mxu3 %v6369_v60  ;;  %2615 = vmatpush.msrb.mxu0 %v6357_v49 }
 0x5ea   :  { %8078 = vst [vmem:[#allocation21_spill] sm:$0xff] %v6753_v32  ;;  %2518 = vmatpush.msra.mxu2 %v6753_v32  ;;  %2635 = vmatpush.msrb.mxu1 %v6364_v47  ;;  %vm2064_vm2 = vcmp.eq.f32.partialorder %v2063_v15, 8.507059e+37 }
 0x5eb   :  { %v3899_v59 = vpop.eup %3898  ;;  %2675 = vmatpush.msrb.mxu3 %v6385_v57  ;;  %2616 = vmatpush.msrb.mxu0 %v6375_v30 }
 0x5ec   :  { %v6730_v52 = vadd.f32 1.0, %v3899_v59  ;;  %2654 = vmatpush.msrb.mxu2 %v6407_v22  ;;  %2636 = vmatpush.msrb.mxu1 %v6380_v46 }
 0x5ed   :  { %v3901_v9 = vpop.eup %3900  ;;  %2676 = vmatpush.msrb.mxu3 %v6418_v39  ;;  %2617 = vmatpush.msrb.mxu0 %v6424_v21 }
 0x5ee   :  { %v3903_v59 = vpop.eup %3902  ;;  %v2055_v31 = vmul.f32 %v3901_v9, %v6638_v61  ;;  %3904 = vrcp.f32 %v6730_v52  ;;  %vm2060_vm12 = vweird.f32 %v3901_v9  ;;  %2655 = vmatpush.msrb.mxu2 %v6413_v53  ;;  %v2085_v61 = vor.u32 1.1754944e-38, %v2084_v55  ;;  %2637 = vmatpush.msrb.mxu1 %v6429_v10 }
 0x5ef   :  { %v2074_v16 = vmul.f32 %v3903_v59, %v6652_v17  ;;  %3906 = vtanh.f32 %v2048_v8  ;;  %vm2079_vm13 = vweird.f32 %v3903_v59  ;;  %vm2061_vm0 = vmor %vm2059_vm14, %vm2060_vm12  ;;  %2677 = vmatpush.msrb.mxu3 %v6447_v38  ;;  %2618 = vmatpush.msrb.mxu0 %v6435_v43  ;;  %vm2098_vm5 = vweird.f32 %v6730_v52 }
 0x5f0   :  { %v2056_v23 = vsub.f32 1.0, %v2055_v31  ;;  %vm2080_vm1 = vmor %vm2078_vm15, %vm2079_vm13  ;;  %2656 = vmatpush.msrb.mxu2 %v6452_v45  ;;  %2638 = vmatpush.msrb.mxu1 %v6442_v12 }
 0x5f1   :  { %v2075_v54 = vsub.f32 1.0, %v2074_v16  ;;  %v2082_v16 = vand.u32 2147483647, %v6652_v17  ;;  %2678 = vmatpush.msrb.mxu3 %v6466_v11  ;;  %2619 = vmatpush.msrb.mxu0 %v6482_v18 }
 0x5f2   :  { %v2057_v63 = vmul.f32 %v3901_v9, %v2056_v23  ;;  %2657 = vmatpush.msrb.mxu2 %v6459_v48  ;;  %2639 = vmatpush.msrb.mxu1 %v6487_v40 }
 0x5f3   :  { %v2076_v31 = vmul.f32 %v3903_v59, %v2075_v54  ;;  %v2066_v54 = vor.u32 1.1754944e-38, %v2065_v62  ;;  %vm2083_vm3 = vcmp.eq.f32.partialorder %v2082_v16, 8.507059e+37  ;;  %2679 = vmatpush.msrb.mxu3 %v6492_v42  ;;  %2620 = vmatpush.msrb.mxu0 %v6505_v44  ;;  %v8079_v16 = vld [vmem:[#allocation27_spill] sm:$0xff] }
 0x5f4   :  { %v6770_v8 = vpop.eup %3904  ;;  %v2058_v60 = vadd.f32 %v3901_v9, %v2057_v63  ;;  %2658 = vmatpush.msrb.mxu2 %v6472_v51  ;;  %2640 = vmatpush.msrb.mxu1 %v6510_v50 }
 0x5f5   :  { %v2077_v23 = vadd.f32 %v3903_v59, %v2076_v31  ;;  %v2094_v47 = vmul.f32 %v6770_v8, %v6730_v52  ;;  %v3907_v17 = vpop.eup %3906  ;;  %vm2099_vm4 = vweird.f32 %v6770_v8  ;;  %2680 = vmatpush.msrb.mxu3 %v6516_v4  ;;  %2621 = vmatpush.msrb.mxu0 %v6529_v6 }
 0x5f6   :  { %v2062_v63 = vsel %vm2061_vm0, %v3901_v9, %v2058_v60  ;;  %2659 = vmatpush.msrb.mxu2 %v6500_v33  ;;  %vm2100_vm6 = vmor %vm2098_vm5, %vm2099_vm4  ;;  %2641 = vmatpush.msrb.mxu1 %v6534_v19 }
 0x5f7   :  { %v2067_v30 = vsel %vm2064_vm2, %v2066_v54, %v2062_v63  ;;  %v2081_v62 = vsel %vm2080_vm1, %v3903_v59, %v2077_v23  ;;  %v2095_v31 = vsub.f32 1.0, %v2094_v47  ;;  %2681 = vmatpush.msrb.mxu3 %v6553_v5  ;;  %2622 = vmatpush.msrb.mxu0 %v6540_v25  ;;  %v8081_v54 = vld [vmem:[#allocation9_spill] sm:$0xff]  ;;  %v8082_v23 = vld [vmem:[#allocation14_spill] sm:$0xff]  ;;  %v8084_v63 = vld [vmem:[#allocation11_spill] sm:$0xff] }
 0x5f8   :  { %v2086_v46 = vsel %vm2083_vm3, %v2085_v61, %v2081_v62  ;;  %v2109_v39 = vmul.f32 %v3907_v17, %v2067_v30  ;;  %2660 = vmatpush.msrb.mxu2 %v6524_v14  ;;  %2642 = vmatpush.msrb.mxu1 %v6548_v2  ;;  %v8083_v61 = vld [vmem:[#allocation10_spill] sm:$0xff]  ;;  %v8085_v17 = vld [vmem:[#allocation12_spill] sm:$0xff]  ;;  %v8086_v62 = vmov 0.0  }
 0x5f9   :  { %v2108_v60 = vmul.f32 %v2086_v46, %v6329_v26  ;;  %v2096_v55 = vmul.f32 %v6770_v8, %v2095_v31  ;;  %v2104_v26 = vand.u32 2147483648, %v6730_v52  ;;  %v2102_v46 = vand.u32 2147483647, %v6730_v52  ;;  %2682 = vmatpush.msrb.mxu3 %v6571_v1  ;;  %2623 = vmatpush.msrb.mxu0 %v6561_v58  ;;  %v8087_v31 = vld [vmem:[#allocation47_spill] sm:$0xff] }
 0x5fa   :  { %2661 = vmatpush.msrb.mxu2 %v6583_v35  ;;  %2643 = vmatpush.msrb.mxu1 %v6566_v36 }
 0x5fb   :  { %v2110_v47 = vadd.f32 %v2109_v39, %v2108_v60  ;;  %v2097_v30 = vadd.f32 %v6770_v8, %v2096_v55  ;;  %v2105_v9 = vor.u32 1.1754944e-38, %v2104_v26  ;;  %vm2103_vm7 = vcmp.eq.f32.partialorder %v2102_v46, 8.507059e+37  ;;  %2683 = vmatpush.msrb.mxu3 %v6578_v34  ;;  %2624 = vmatpush.msrb.mxu0 %v6589_v3  ;;  %v8088_v60 = vld [vmem:[#allocation17_spill] sm:$0xff]  ;;  %v8092_v26 = vld [vmem:[#allocation30_spill] sm:$0xff]  ;;  %v8093_v46 = vld [vmem:[#allocation48_spill] sm:$0xff] }
 0x5fc   :  { %2662 = vmatpush.msrb.mxu2 %v6607_v20  ;;  %2644 = vmatpush.msrb.mxu1 %v6594_v37  ;;  %v8089_v55 = vld [vmem:[#allocation45_spill] sm:$0xff] }
 0x5fd   :  { %3908 = vtanh.f32 %v2110_v47  ;;  %2116 = vst [vmem:[%s7724_s8] sm:$0xff] %v2110_v47  ;;  %v2101_v39 = vsel %vm2100_vm6, %v6770_v8, %v2097_v30  ;;  %2684 = vmatpush.msrb.mxu3 %v6602_v24  ;;  %2625 = vmatpush.msrb.mxu0 %v6613_v27  ;;  %v8080_v8 = vld [vmem:[#allocation8_spill] sm:$0xff]  ;;  %v8090_v47 = vld [vmem:[#allocation46_spill] sm:$0xff]  ;;  %v8091_v30 = vld [vmem:[#allocation31_spill] sm:$0xff] }
 0x5fe   :  { %v2106_v15 = vsel %vm2103_vm7, %v2105_v9, %v2101_v39  ;;  %2663 = vmatpush.msrb.mxu2 %v6624_v13  ;;  %2645 = vmatpush.msrb.mxu1 %v6618_v0  ;;  %v8094_v39 = vld [vmem:[#allocation49_spill] sm:$0xff]  ;;  %v8095_v9 = vld [vmem:[#allocation34_spill] sm:$0xff] }
 0x5ff   :  { %2685 = vmatpush.msrb.mxu3 %v8079_v16  ;;  %2626 = vmatpush.msrb.mxu0 %v8080_v8 }
 0x600   :  { %2664 = vmatpush.msrb.mxu2 %v6636_v56  ;;  %2646 = vmatpush.msrb.mxu1 %v8081_v54 }
 0x601   :  { %2686 = vmatpush.msrb.mxu3 %v8083_v61  ;;  %2627 = vmatpush.msrb.mxu0 %v8084_v63 }
 0x602   :  { %2665 = vmatpush.msrb.mxu2 %v6664_v41  ;;  %2647 = vmatpush.msrb.mxu1 %v8085_v17 }
 0x603   :  { %v3909_v52 = vpop.eup %3908  ;;  %2687 = vmatpush.msrb.mxu3 %v8088_v60  ;;  %2628 = vmatpush.msrb.mxu0 %v8089_v55 }
 0x604   :  { %v2112_v59 = vmul.f32 %v3909_v52, %v2106_v15  ;;  %2666 = vmatpush.msrb.mxu2 %v8082_v23  ;;  %2648 = vmatpush.msrb.mxu1 %v8090_v47  ;;  %v8096_v52 = vld [vmem:[#allocation33_spill] sm:$0xff]  ;;  %v8097_v15 = vld [vmem:[#allocation35_spill] sm:$0xff] }
 0x605   :  { %2688 = vmatpush.msrb.mxu3 %v8092_v26  ;;  %2629 = vmatpush.msrb.mxu0 %v8093_v46 }
 0x606   :  { %2236 = vmatmul.f32.gmra.mxu0 %v2112_v59  ;;  %2277 = vmatmul.f32.gmra.mxu1 %v2112_v59  ;;  %2115 = vst [vmem:[%s7725_s7] sm:$0xff] %v2112_v59 }
 0x607   :  { %2318 = vmatmul.f32.gmra.mxu2 %v2112_v59  ;;  %2359 = vmatmul.f32.gmra.mxu3 %v2112_v59  ;;  %v8098_v59 = vld [vmem:[#allocation36_spill] sm:$0xff] }
 0x608   :  { %2667 = vmatpush.msrb.mxu2 %v8087_v31  ;;  %2649 = vmatpush.msrb.mxu1 %v8094_v39 }
 0x609   :  { %2689 = vmatpush.msrb.mxu3 %v6742_v29 }
 0x60a   :  { %2668 = vmatpush.msrb.mxu2 %v8091_v30 }
 0x60c   :  { %2669 = vmatpush.msrb.mxu2 %v6753_v32 }
 0x60e   :  { %2479 = vmatmul.f32.vlgmr.msra.gmra.mxu0 %v8086_v62  ;;  %2499 = vmatmul.f32.vlgmr.msra.gmra.mxu1 %v8086_v62 }
 0x60f   :  { %2519 = vmatmul.f32.vlgmr.msra.gmra.mxu2 %v8086_v62  ;;  %2539 = vmatmul.f32.vlgmr.msra.gmra.mxu3 %v8086_v62  ;;  %v8099_v62 = vld [vmem:[#allocation37_spill] sm:$0xff] }
 0x610   :  { %2765 = vmatpush.msra.mxu0 %v6347_v28  ;;  %2785 = vmatpush.msra.mxu1 %v6352_v7 }
 0x611   :  { %2805 = vmatpush.msra.mxu2 %v6407_v22  ;;  %2825 = vmatpush.msra.mxu3 %v8095_v9 }
 0x612   :  { %2766 = vmatpush.msra.mxu0 %v6357_v49  ;;  %2786 = vmatpush.msra.mxu1 %v8096_v52 }
 0x613   :  { %2806 = vmatpush.msra.mxu2 %v6413_v53  ;;  %2826 = vmatpush.msra.mxu3 %v6385_v57 }
 0x614   :  { %2767 = vmatpush.msra.mxu0 %v8097_v15  ;;  %2787 = vmatpush.msra.mxu1 %v8098_v59 }
 0x615   :  { %2807 = vmatpush.msra.mxu2 %v6452_v45  ;;  %2827 = vmatpush.msra.mxu3 %v8099_v62 }
 0x616   :  { %2768 = vmatpush.msra.mxu0 %v6424_v21  ;;  %2788 = vmatpush.msra.mxu1 %v6429_v10 }
 0x617   :  { %2808 = vmatpush.msra.mxu2 %v6459_v48  ;;  %2828 = vmatpush.msra.mxu3 %v6447_v38 }
 0x618   :  { %2769 = vmatpush.msra.mxu0 %v6435_v43  ;;  %2789 = vmatpush.msra.mxu1 %v6442_v12 }
 0x619   :  { %2809 = vmatpush.msra.mxu2 %v6472_v51  ;;  %2829 = vmatpush.msra.mxu3 %v6466_v11 }
 0x61a   :  { %2770 = vmatpush.msra.mxu0 %v6482_v18  ;;  %2790 = vmatpush.msra.mxu1 %v6487_v40 }
 0x61b   :  { %2810 = vmatpush.msra.mxu2 %v6500_v33  ;;  %2830 = vmatpush.msra.mxu3 %v6492_v42 }
 0x61c   :  { %2771 = vmatpush.msra.mxu0 %v6505_v44  ;;  %2791 = vmatpush.msra.mxu1 %v6510_v50 }
 0x61d   :  { %2811 = vmatpush.msra.mxu2 %v6524_v14  ;;  %2831 = vmatpush.msra.mxu3 %v6516_v4 }
 0x61e   :  { %2772 = vmatpush.msra.mxu0 %v6529_v6  ;;  %2792 = vmatpush.msra.mxu1 %v6534_v19 }
 0x61f   :  { %2812 = vmatpush.msra.mxu2 %v6583_v35  ;;  %2832 = vmatpush.msra.mxu3 %v6553_v5 }
 0x620   :  { %2773 = vmatpush.msra.mxu0 %v6540_v25  ;;  %2793 = vmatpush.msra.mxu1 %v6548_v2 }
 0x621   :  { %2813 = vmatpush.msra.mxu2 %v6607_v20  ;;  %2833 = vmatpush.msra.mxu3 %v6571_v1 }
 0x622   :  { %2774 = vmatpush.msra.mxu0 %v6561_v58  ;;  %2794 = vmatpush.msra.mxu1 %v6566_v36 }
 0x623   :  { %2814 = vmatpush.msra.mxu2 %v6624_v13  ;;  %2834 = vmatpush.msra.mxu3 %v6578_v34 }
 0x624   :  { %2775 = vmatpush.msra.mxu0 %v6589_v3  ;;  %2795 = vmatpush.msra.mxu1 %v6594_v37 }
 0x625   :  { %2815 = vmatpush.msra.mxu2 %v6636_v56  ;;  %2835 = vmatpush.msra.mxu3 %v6602_v24 }
 0x626   :  { %2776 = vmatpush.msra.mxu0 %v6613_v27  ;;  %2796 = vmatpush.msra.mxu1 %v6618_v0 }
 0x627   :  { %2816 = vmatpush.msra.mxu2 %v6664_v41  ;;  %2836 = vmatpush.msra.mxu3 %v8079_v16 }
 0x628   :  { %2777 = vmatpush.msra.mxu0 %v8080_v8  ;;  %2797 = vmatpush.msra.mxu1 %v8081_v54 }
 0x629   :  { %2817 = vmatpush.msra.mxu2 %v8082_v23  ;;  %2837 = vmatpush.msra.mxu3 %v8083_v61 }
 0x62a   :  { %2778 = vmatpush.msra.mxu0 %v8084_v63  ;;  %2798 = vmatpush.msra.mxu1 %v8085_v17  ;;  %v2216_v17 = vpop.f32.mrf.mxu0  ;;  %v2339_v63 = vpop.f32.mrf.mxu3 }
 0x62b   :  { %2818 = vmatpush.msra.mxu2 %v8087_v31  ;;  %2838 = vmatpush.msra.mxu3 %v8088_v60  ;;  %v2257_v31 = vpop.f32.mrf.mxu1 }
 0x62c   :  { %2779 = vmatpush.msra.mxu0 %v8089_v55  ;;  %2799 = vmatpush.msra.mxu1 %v8090_v47  ;;  %v2298_v47 = vpop.f32.mrf.mxu2 }
 0x62d   :  { %2819 = vmatpush.msra.mxu2 %v8091_v30  ;;  %2839 = vmatpush.msra.mxu3 %v8092_v26 }
 0x62e   :  { %2780 = vmatpush.msra.mxu0 %v8093_v46  ;;  %2800 = vmatpush.msra.mxu1 %v8094_v39 }
 0x62f   :  { %2820 = vmatpush.msra.mxu2 %v6753_v32  ;;  %2840 = vmatpush.msra.mxu3 %v6742_v29 }
 0x632   :  { %v6917_v60 = vpop.f32.mrf.mxu0  ;;  %v6921_v61 = vpop.f32.mrf.mxu3 }
 0x633   :  { %8100 = vst [vmem:[#allocation15_spill] sm:$0xff] %v6917_v60  ;;  %v6919_v55 = vpop.f32.mrf.mxu1 }
 0x634   :  { %8101 = vst [vmem:[#allocation22_spill] sm:$0xff] %v6919_v55  ;;  %v6927_v46 = vpop.f32.mrf.mxu2 }
 0x635   :  { %8102 = vst [vmem:[#allocation16_spill] sm:$0xff] %v6921_v61 }
 0x636   :  { %8105 = vst [vmem:[#allocation23_spill] sm:$0xff] %v6927_v46 }
 0x63a   :  { %v6923_v30 = vpop.f32.mrf.mxu0  ;;  %v6929_v39 = vpop.f32.mrf.mxu3 }
 0x63b   :  { %8103 = vst [vmem:[#allocation25_spill] sm:$0xff] %v6923_v30  ;;  %v6925_v26 = vpop.f32.mrf.mxu1 }
 0x63c   :  { %8104 = vst [vmem:[#allocation18_spill] sm:$0xff] %v6925_v26  ;;  %v6935_v23 = vpop.f32.mrf.mxu2 }
 0x63d   :  { %8106 = vst [vmem:[#allocation28_spill] sm:$0xff] %v6929_v39 }
 0x63e   :  { %8109 = vst [vmem:[#allocation43_spill] sm:$0xff] %v6935_v23 }
 0x642   :  { %v6931_v32 = vpop.f32.mrf.mxu0  ;;  %v6937_v60 = vpop.f32.mrf.mxu3 }
 0x643   :  { %8107 = vst [vmem:[#allocation29_spill] sm:$0xff] %v6931_v32  ;;  %v6933_v29 = vpop.f32.mrf.mxu1 }
 0x644   :  { %8108 = vst [vmem:[#allocation42_spill] sm:$0xff] %v6933_v29  ;;  %v6943_v61 = vpop.f32.mrf.mxu2 }
 0x645   :  { %8110 = vst [vmem:[#allocation44_spill] sm:$0xff] %v6937_v60 }
 0x646   :  { %8113 = vst [vmem:[#allocation24_spill] sm:$0xff] %v6943_v61 }
 0x64a   :  { %v6939_v55 = vpop.f32.mrf.mxu0  ;;  %v6945_v30 = vpop.f32.mrf.mxu3 }
 0x64b   :  { %8111 = vst [vmem:[#allocation19_spill] sm:$0xff] %v6939_v55  ;;  %v6941_v54 = vpop.f32.mrf.mxu1 }
 0x64c   :  { %8112 = vst [vmem:[#allocation20_spill] sm:$0xff] %v6941_v54  ;;  %v6951_v39 = vpop.f32.mrf.mxu2 }
 0x64d   :  { %8114 = vst [vmem:[#allocation26_spill] sm:$0xff] %v6945_v30  ;;  %v2189_v30 = vld [vmem:[%s7726_s6] sm:$0xf] }
 0x64e   :  { %8117 = vst [vmem:[#allocation35_spill] sm:$0xff] %v6951_v39  ;;  %v6972_v39 = vperm.slane %v2189_v30, 1  ;;  %v6980_v41 = vperm.slane %v2189_v30, 3 }
 0x650   :  { %8126 = vst [vmem:[#allocation56_spill] sm:$0xff] %v6972_v39  ;;  %v2340_v0 = vadd.f32 %v2339_v63, %v6980_v41 }
 0x651   :  { %8129 = vst [vmem:[#allocation59_spill] sm:$0xff] %v6980_v41 }
 0x652   :  { %v6947_v26 = vpop.f32.mrf.mxu0  ;;  %v6953_v32 = vpop.f32.mrf.mxu3 }
 0x653   :  { %8115 = vst [vmem:[#allocation34_spill] sm:$0xff] %v6947_v26  ;;  %v6949_v46 = vpop.f32.mrf.mxu1 }
 0x654   :  { %8116 = vst [vmem:[#allocation33_spill] sm:$0xff] %v6949_v46  ;;  %v6959_v60 = vpop.f32.mrf.mxu2  ;;  %v6970_v46 = vperm.slane %v2189_v30, 0 }
 0x655   :  { %8118 = vst [vmem:[#allocation36_spill] sm:$0xff] %v6953_v32 }
 0x656   :  { %8121 = vst [vmem:[#allocation51_spill] sm:$0xff] %v6959_v60 }
 0x657   :  { %8125 = vst [vmem:[#allocation55_spill] sm:$0xff] %v6970_v46 }
 0x65a   :  { %v6955_v29 = vpop.f32.mrf.mxu0  ;;  %v6961_v55 = vpop.f32.mrf.mxu3 }
 0x65b   :  { %8119 = vst [vmem:[#allocation37_spill] sm:$0xff] %v6955_v29  ;;  %v6957_v23 = vpop.f32.mrf.mxu1  ;;  %v2217_v29 = vadd.f32 %v2216_v17, %v6970_v46 }
 0x65c   :  { %8120 = vst [vmem:[#allocation50_spill] sm:$0xff] %v6957_v23  ;;  %v2258_v23 = vadd.f32 %v2257_v31, %v6972_v39  ;;  %v6976_v32 = vpop.f32.mrf.mxu2 }
 0x65d   :  { %8122 = vst [vmem:[#allocation52_spill] sm:$0xff] %v6961_v55 }
 0x65e   :  { %8127 = vst [vmem:[#allocation57_spill] sm:$0xff] %v6976_v32 }
 0x683   :  { %v6966_v54 = vpop.f32.mrf.mxu0  ;;  %v6968_v26 = vpop.f32.mrf.mxu1 }
 0x684   :  { %8123 = vst [vmem:[#allocation53_spill] sm:$0xff] %v6966_v54 }
 0x685   :  { %8124 = vst [vmem:[#allocation54_spill] sm:$0xff] %v6968_v26 }
 0x68a   :  { %v6978_v60 = vpop.f32.mrf.mxu3  ;;  %v6983_v27 = vpop.f32.mrf.mxu2 }
 0x68b   :  { %8128 = vst [vmem:[#allocation58_spill] sm:$0xff] %v6978_v60  ;;  %v2480_v55 = vpop.f32.mrf.mxu0  ;;  %v2500_v61 = vpop.f32.mrf.mxu1 }
 0x68c   :  { %v2543_v8 = vadd.f32 %v2480_v55, %v2217_v29  ;;  %v2544_v16 = vadd.f32 %v2500_v61, %v2258_v23  ;;  %8130 = vst [vmem:[#allocation60_spill] sm:$0xff] %v6983_v27  ;;  %v6985_v29 = vperm.slane %v2189_v30, 2 }
 0x68e   :  { %v3750_v54 = vmul.f32 -1.442695, %v2543_v8  ;;  %v3751_v26 = vmul.f32 -1.442695, %v2544_v16  ;;  %8131 = vst [vmem:[#allocation61_spill] sm:$0xff] %v6985_v29 }
 0x690   :  { %3910 = vpow2.f32 %v3750_v54  ;;  %v2299_v54 = vadd.f32 %v2298_v47, %v6985_v29 }
 0x691   :  { %3912 = vpow2.f32 %v3751_v26 }
 0x692   :  { %v2540_v17 = vpop.f32.mrf.mxu3  ;;  %v2520_v8 = vpop.f32.mrf.mxu2 }
 0x693   :  { %v2546_v31 = vadd.f32 %v2540_v17, %v2340_v0  ;;  %v2545_v63 = vadd.f32 %v2520_v8, %v2299_v54 }
 0x695   :  { %v3752_v39 = vmul.f32 -1.442695, %v2546_v31 }
 0x696   :  { %v3911_v32 = vpop.eup %3910 }
 0x697   :  { %v3913_v46 = vpop.eup %3912  ;;  %v2550_v60 = vadd.f32 1.0, %v3911_v32  ;;  %3914 = vpow2.f32 %v3752_v39 }
 0x698   :  { %v2569_v24 = vadd.f32 1.0, %v3913_v46 }
 0x699   :  { %3916 = vrcp.f32 %v2550_v60  ;;  %v2562_v32 = vand.u32 2147483648, %v2550_v60  ;;  %v2560_v39 = vand.u32 2147483647, %v2550_v60  ;;  %vm2556_vm10 = vweird.f32 %v2550_v60 }
 0x69a   :  { %3918 = vrcp.f32 %v2569_v24  ;;  %v2581_v46 = vand.u32 2147483648, %v2569_v24  ;;  %v2579_v41 = vand.u32 2147483647, %v2569_v24  ;;  %vm2575_vm11 = vweird.f32 %v2569_v24 }
 0x69b   :  { %v2563_v8 = vor.u32 1.1754944e-38, %v2562_v32  ;;  %vm2561_vm13 = vcmp.eq.f32.partialorder %v2560_v39, 8.507059e+37 }
 0x69c   :  { %v2582_v29 = vor.u32 1.1754944e-38, %v2581_v46  ;;  %vm2580_vm15 = vcmp.eq.f32.partialorder %v2579_v41, 8.507059e+37 }
 0x69d   :  { %v3915_v16 = vpop.eup %3914 }
 0x69e   :  { %v2589_v23 = vadd.f32 1.0, %v3915_v16 }
 0x69f   :  { %v3917_v61 = vpop.eup %3916 }
 0x6a0   :  { %v3919_v55 = vpop.eup %3918  ;;  %v2552_v26 = vmul.f32 %v3917_v61, %v2550_v60  ;;  %3920 = vrcp.f32 %v2589_v23  ;;  %vm2557_vm8 = vweird.f32 %v3917_v61  ;;  %vm2595_vm1 = vweird.f32 %v2589_v23 }
 0x6a1   :  { %v2571_v0 = vmul.f32 %v3919_v55, %v2569_v24  ;;  %3922 = vtanh.f32 %v2545_v63  ;;  %vm2576_vm9 = vweird.f32 %v3919_v55  ;;  %vm2558_vm12 = vmor %vm2556_vm10, %vm2557_vm8  ;;  %v2599_v60 = vand.u32 2147483647, %v2589_v23 }
 0x6a2   :  { %v2553_v17 = vsub.f32 1.0, %v2552_v26  ;;  %vm2577_vm14 = vmor %vm2575_vm11, %vm2576_vm9 }
 0x6a3   :  { %v2572_v31 = vsub.f32 1.0, %v2571_v0  ;;  %vm2600_vm3 = vcmp.eq.f32.partialorder %v2599_v60, 8.507059e+37 }
 0x6a4   :  { %v2554_v30 = vmul.f32 %v3917_v61, %v2553_v17 }
 0x6a5   :  { %v2573_v27 = vmul.f32 %v3919_v55, %v2572_v31 }
 0x6a6   :  { %v3921_v56 = vpop.eup %3920  ;;  %v2555_v47 = vadd.f32 %v3917_v61, %v2554_v30 }
 0x6a7   :  { %v2574_v16 = vadd.f32 %v3919_v55, %v2573_v27  ;;  %v2591_v54 = vmul.f32 %v3921_v56, %v2589_v23  ;;  %v3923_v63 = vpop.eup %3922  ;;  %vm2596_vm0 = vweird.f32 %v3921_v56  ;;  %v2601_v27 = vand.u32 2147483648, %v2589_v23 }
 0x6a8   :  { %v2559_v26 = vsel %vm2558_vm12, %v3917_v61, %v2555_v47  ;;  %vm2597_vm2 = vmor %vm2595_vm1, %vm2596_vm0 }
 0x6a9   :  { %v2564_v0 = vsel %vm2561_vm13, %v2563_v8, %v2559_v26  ;;  %v2578_v17 = vsel %vm2577_vm14, %v3919_v55, %v2574_v16  ;;  %v2592_v37 = vsub.f32 1.0, %v2591_v54  ;;  %v2602_v32 = vor.u32 1.1754944e-38, %v2601_v27  ;;  %v8164_v26 = vld [vmem:[#allocation61_spill] sm:$0xff] }
 0x6aa   :  { %v2583_v31 = vsel %vm2580_vm15, %v2582_v29, %v2578_v17  ;;  %v2606_v3 = vmul.f32 %v3923_v63, %v2564_v0  ;;  %v8165_v63 = vld [vmem:[#allocation23_spill] sm:$0xff] }
 0x6ab   :  { %v2605_v34 = vmul.f32 0.0, %v2583_v31  ;;  %v2593_v13 = vmul.f32 %v3921_v56, %v2592_v37  ;;  %v2302_v0 = vadd.f32 %v8165_v63, %v8164_v26  ;;  %v7190_v63 = vld [vmem:[%s7723_s4 + $0x140] sm:$0xff] }
 0x6ad   :  { %v6988_v30 = vadd.f32 %v2606_v3, %v2605_v34  ;;  %v2594_v24 = vadd.f32 %v3921_v56, %v2593_v13 }
 0x6af   :  { %3924 = vtanh.f32 %v6988_v30  ;;  %v2598_v61 = vsel %vm2597_vm2, %v3921_v56, %v2594_v24 }
 0x6b0   :  { %v2603_v41 = vsel %vm2600_vm3, %v2602_v32, %v2598_v61 }
 0x6b5   :  { %v3925_v55 = vpop.eup %3924 }
 0x6b6   :  { %v2609_v46 = vmul.f32 %v3925_v55, %v2603_v41 }
 0x6b8   :  { %2630 = vmatmul.f32.vlgmr.msrb.gmra.mxu0 %v2609_v46  ;;  %2650 = vmatmul.f32.vlgmr.msrb.gmra.mxu1 %v2609_v46 }
 0x6b9   :  { %2670 = vmatmul.f32.vlgmr.msrb.gmra.mxu2 %v2609_v46  ;;  %2690 = vmatmul.f32.vlgmr.msrb.gmra.mxu3 %v2609_v46 }
 0x6ba   :  { %2916 = vmatpush.msrb.mxu0 %v6347_v28  ;;  %2936 = vmatpush.msrb.mxu1 %v6352_v7  ;;  %v8132_v28 = vld [vmem:[#allocation7_spill] sm:$0xff]  ;;  %v8133_v7 = vld [vmem:[#allocation38_spill] sm:$0xff] }
 0x6bb   :  { %2956 = vmatpush.msrb.mxu2 %v6407_v22  ;;  %2976 = vmatpush.msrb.mxu3 %v8095_v9  ;;  %v8136_v22 = vld [vmem:[#allocation6_spill] sm:$0xff]  ;;  %v8162_v9 = vld [vmem:[#allocation59_spill] sm:$0xff] }
 0x6bc   :  { %2917 = vmatpush.msrb.mxu0 %v6357_v49  ;;  %2937 = vmatpush.msrb.mxu1 %v8096_v52  ;;  %v8134_v49 = vld [vmem:[#allocation39_spill] sm:$0xff]  ;;  %v8163_v52 = vld [vmem:[#allocation16_spill] sm:$0xff] }
 0x6bd   :  { %2957 = vmatpush.msrb.mxu2 %v6413_v53  ;;  %2977 = vmatpush.msrb.mxu3 %v6385_v57  ;;  %v8135_v57 = vld [vmem:[#allocation40_spill] sm:$0xff]  ;;  %v8137_v53 = vld [vmem:[#allocation41_spill] sm:$0xff] }
 0x6be   :  { %2918 = vmatpush.msrb.mxu0 %v8097_v15  ;;  %2938 = vmatpush.msrb.mxu1 %v8098_v59  ;;  %v2343_v15 = vadd.f32 %v8163_v52, %v8162_v9  ;;  %v7124_v52 = vld [vmem:[%s7723_s4 + $0x1a8] sm:$0xff] }
 0x6bf   :  { %2958 = vmatpush.msrb.mxu2 %v6452_v45  ;;  %2978 = vmatpush.msrb.mxu3 %v8099_v62  ;;  %v8143_v45 = vld [vmem:[#allocation9_spill] sm:$0xff] }
 0x6c0   :  { %2919 = vmatpush.msrb.mxu0 %v6424_v21  ;;  %2939 = vmatpush.msrb.mxu1 %v6429_v10  ;;  %v8138_v21 = vld [vmem:[#allocation4_spill] sm:$0xff]  ;;  %v8139_v10 = vld [vmem:[#allocation5_spill] sm:$0xff] }
 0x6c1   :  { %2959 = vmatpush.msrb.mxu2 %v6459_v48  ;;  %2979 = vmatpush.msrb.mxu3 %v6447_v38  ;;  %v8142_v38 = vld [vmem:[#allocation8_spill] sm:$0xff]  ;;  %v8144_v48 = vld [vmem:[#allocation14_spill] sm:$0xff] }
 0x6c2   :  { %2920 = vmatpush.msrb.mxu0 %v6435_v43  ;;  %2940 = vmatpush.msrb.mxu1 %v6442_v12  ;;  %v8140_v43 = vld [vmem:[#allocation13_spill] sm:$0xff]  ;;  %v8141_v12 = vld [vmem:[#allocation27_spill] sm:$0xff] }
 0x6c3   :  { %2960 = vmatpush.msrb.mxu2 %v6472_v51  ;;  %2980 = vmatpush.msrb.mxu3 %v6466_v11  ;;  %v8145_v11 = vld [vmem:[#allocation10_spill] sm:$0xff]  ;;  %v8146_v51 = vld [vmem:[#allocation11_spill] sm:$0xff] }
 0x6c4   :  { %2921 = vmatpush.msrb.mxu0 %v6482_v18  ;;  %2941 = vmatpush.msrb.mxu1 %v6487_v40  ;;  %v8147_v18 = vld [vmem:[#allocation12_spill] sm:$0xff]  ;;  %v8148_v40 = vld [vmem:[#allocation47_spill] sm:$0xff] }
 0x6c5   :  { %2961 = vmatpush.msrb.mxu2 %v6500_v33  ;;  %2981 = vmatpush.msrb.mxu3 %v6492_v42  ;;  %v8149_v42 = vld [vmem:[#allocation17_spill] sm:$0xff] }
 0x6c6   :  { %2922 = vmatpush.msrb.mxu0 %v6505_v44  ;;  %2942 = vmatpush.msrb.mxu1 %v6510_v50  ;;  %v8150_v33 = vld [vmem:[#allocation45_spill] sm:$0xff]  ;;  %v8151_v44 = vld [vmem:[#allocation46_spill] sm:$0xff]  ;;  %v8152_v50 = vld [vmem:[#allocation31_spill] sm:$0xff] }
 0x6c7   :  { %2962 = vmatpush.msrb.mxu2 %v6524_v14  ;;  %2982 = vmatpush.msrb.mxu3 %v6516_v4  ;;  %v8153_v4 = vld [vmem:[#allocation30_spill] sm:$0xff]  ;;  %v8154_v14 = vld [vmem:[#allocation48_spill] sm:$0xff] }
 0x6c8   :  { %2923 = vmatpush.msrb.mxu0 %v6529_v6  ;;  %2943 = vmatpush.msrb.mxu1 %v6534_v19  ;;  %v8155_v6 = vld [vmem:[#allocation49_spill] sm:$0xff] }
 0x6c9   :  { %2963 = vmatpush.msrb.mxu2 %v6583_v35  ;;  %2983 = vmatpush.msrb.mxu3 %v6553_v5  ;;  %v8156_v19 = vld [vmem:[#allocation21_spill] sm:$0xff]  ;;  %v8159_v5 = vld [vmem:[#allocation15_spill] sm:$0xff] }
 0x6ca   :  { %2924 = vmatpush.msrb.mxu0 %v6540_v25  ;;  %2944 = vmatpush.msrb.mxu1 %v6548_v2  ;;  %v8157_v25 = vld [vmem:[#allocation32_spill] sm:$0xff]  ;;  %v8158_v2 = vld [vmem:[#allocation55_spill] sm:$0xff] }
 0x6cb   :  { %2964 = vmatpush.msrb.mxu2 %v6607_v20  ;;  %2984 = vmatpush.msrb.mxu3 %v6571_v1  ;;  %v8161_v1 = vld [vmem:[#allocation22_spill] sm:$0xff] }
 0x6cc   :  { %2925 = vmatpush.msrb.mxu0 %v6561_v58  ;;  %2945 = vmatpush.msrb.mxu1 %v6566_v36  ;;  %v2220_v58 = vadd.f32 %v8159_v5, %v8158_v2  ;;  %v8160_v36 = vld [vmem:[#allocation56_spill] sm:$0xff] }
 0x6cd   :  { %2965 = vmatpush.msrb.mxu2 %v8132_v28  ;;  %2985 = vmatpush.msrb.mxu3 %v8133_v7  ;;  %v2261_v34 = vadd.f32 %v8161_v1, %v8160_v36  ;;  %v7076_v1 = vld [vmem:[%s7723_s4 + $0x1e8] sm:$0xff] }
 0x6ce   :  { %2926 = vmatpush.msrb.mxu0 %v8134_v49  ;;  %2946 = vmatpush.msrb.mxu1 %v8135_v57 }
 0x6cf   :  { %2966 = vmatpush.msrb.mxu2 %v8136_v22  ;;  %2986 = vmatpush.msrb.mxu3 %v8137_v53 }
 0x6d0   :  { %2927 = vmatpush.msrb.mxu0 %v8138_v21  ;;  %2947 = vmatpush.msrb.mxu1 %v8139_v10 }
 0x6d1   :  { %2967 = vmatpush.msrb.mxu2 %v8140_v43  ;;  %2987 = vmatpush.msrb.mxu3 %v8141_v12 }
 0x6d2   :  { %2928 = vmatpush.msrb.mxu0 %v8142_v38  ;;  %2948 = vmatpush.msrb.mxu1 %v8143_v45 }
 0x6d3   :  { %2968 = vmatpush.msrb.mxu2 %v8144_v48  ;;  %2988 = vmatpush.msrb.mxu3 %v8145_v11 }
 0x6d4   :  { %2929 = vmatpush.msrb.mxu0 %v8146_v51  ;;  %2949 = vmatpush.msrb.mxu1 %v8147_v18 }
 0x6d5   :  { %2969 = vmatpush.msrb.mxu2 %v8148_v40  ;;  %2989 = vmatpush.msrb.mxu3 %v8149_v42 }
 0x6d6   :  { %2930 = vmatpush.msrb.mxu0 %v8150_v33  ;;  %2950 = vmatpush.msrb.mxu1 %v8151_v44 }
 0x6d7   :  { %2970 = vmatpush.msrb.mxu2 %v8152_v50  ;;  %2990 = vmatpush.msrb.mxu3 %v8153_v4 }
 0x6d8   :  { %2931 = vmatpush.msrb.mxu0 %v8154_v14  ;;  %2951 = vmatpush.msrb.mxu1 %v8155_v6 }
 0x6d9   :  { %2971 = vmatpush.msrb.mxu2 %v8156_v19  ;;  %2991 = vmatpush.msrb.mxu3 %v8157_v25 }
 0x735   :  { %v2631_v35 = vpop.f32.mrf.mxu0  ;;  %v2651_v3 = vpop.f32.mrf.mxu1 }
 0x736   :  { %v2694_v37 = vadd.f32 %v2631_v35, %v2220_v58  ;;  %v2695_v20 = vadd.f32 %v2651_v3, %v2261_v34  ;;  %v7082_v34 = vld [vmem:[%s7723_s4 + $0x1f0] sm:$0xff]  ;;  %v7088_v35 = vld [vmem:[%s7723_s4 + $0x1f8] sm:$0xff]  ;;  %v7094_v3 = vld [vmem:[%s7723_s4 + $0x1c0] sm:$0xff] }
 0x738   :  { %v3753_v13 = vmul.f32 -1.442695, %v2694_v37  ;;  %v3754_v56 = vmul.f32 -1.442695, %v2695_v20  ;;  %v7100_v37 = vld [vmem:[%s7723_s4 + $0x1c8] sm:$0xff]  ;;  %v7106_v20 = vld [vmem:[%s7723_s4 + $0x1d0] sm:$0xff] }
 0x73a   :  { %3926 = vpow2.f32 %v3753_v13  ;;  %v7112_v13 = vld [vmem:[%s7723_s4 + $0x1d8] sm:$0xff] }
 0x73b   :  { %3928 = vpow2.f32 %v3754_v56  ;;  %v7118_v56 = vld [vmem:[%s7723_s4 + $0x1a0] sm:$0xff] }
 0x73c   :  { %v2691_v59 = vpop.f32.mrf.mxu3  ;;  %v2671_v16 = vpop.f32.mrf.mxu2 }
 0x73d   :  { %v2697_v62 = vadd.f32 %v2691_v59, %v2343_v15  ;;  %v2696_v24 = vadd.f32 %v2671_v16, %v2302_v0  ;;  %v7130_v15 = vld [vmem:[%s7723_s4 + $0x1b0] sm:$0xff]  ;;  %v7136_v59 = vld [vmem:[%s7723_s4 + $0x1b8] sm:$0xff]  ;;  %v7196_v0 = vld [vmem:[%s7723_s4 + $0x148] sm:$0xff] }
 0x73e   :  { %v7178_v16 = vld [vmem:[%s7723_s4 + $0x170] sm:$0xff] }
 0x73f   :  { %v3755_v29 = vmul.f32 -1.442695, %v2697_v62  ;;  %v7142_v62 = vld [vmem:[%s7723_s4 + $0x180] sm:$0xff] }
 0x740   :  { %v3927_v23 = vpop.eup %3926 }
 0x741   :  { %v3929_v39 = vpop.eup %3928  ;;  %v2701_v47 = vadd.f32 1.0, %v3927_v23  ;;  %3930 = vpow2.f32 %v3755_v29  ;;  %v7148_v29 = vld [vmem:[%s7723_s4 + $0x188] sm:$0xff]  ;;  %v7154_v23 = vld [vmem:[%s7723_s4 + $0x190] sm:$0xff] }
 0x742   :  { %v2720_v8 = vadd.f32 1.0, %v3929_v39  ;;  %v7160_v39 = vld [vmem:[%s7723_s4 + $0x198] sm:$0xff] }
 0x743   :  { %3932 = vrcp.f32 %v2701_v47  ;;  %v2713_v41 = vand.u32 2147483648, %v2701_v47  ;;  %v2711_v7 = vand.u32 2147483647, %v2701_v47  ;;  %vm2707_vm6 = vweird.f32 %v2701_v47 }
 0x744   :  { %3934 = vrcp.f32 %v2720_v8  ;;  %v2732_v46 = vand.u32 2147483648, %v2720_v8  ;;  %v2730_v57 = vand.u32 2147483647, %v2720_v8  ;;  %vm2726_vm7 = vweird.f32 %v2720_v8 }
 0x745   :  { %v2714_v21 = vor.u32 1.1754944e-38, %v2713_v41  ;;  %vm2712_vm10 = vcmp.eq.f32.partialorder %v2711_v7, 8.507059e+37  ;;  %v7250_v41 = vld [vmem:[%s7723_s4 + $0x110] sm:$0xff]  ;;  %v7268_v7 = vld [vmem:[%s7723_s4 + $0xe8] sm:$0xff] }
 0x746   :  { %v2733_v12 = vor.u32 1.1754944e-38, %v2732_v46  ;;  %vm2731_vm11 = vcmp.eq.f32.partialorder %v2730_v57, 8.507059e+37  ;;  %v7256_v46 = vld [vmem:[%s7723_s4 + $0x118] sm:$0xff] }
 0x747   :  { %v3931_v54 = vpop.eup %3930  ;;  %v7280_v57 = vld [vmem:[%s7723_s4 + $0xf8] sm:$0xff] }
 0x748   :  { %v2740_v17 = vadd.f32 1.0, %v3931_v54  ;;  %v7184_v54 = vld [vmem:[%s7723_s4 + $0x178] sm:$0xff] }
 0x749   :  { %v3933_v31 = vpop.eup %3932 }
 0x74a   :  { %v3935_v27 = vpop.eup %3934  ;;  %v2703_v60 = vmul.f32 %v3933_v31, %v2701_v47  ;;  %3936 = vrcp.f32 %v2740_v17  ;;  %vm2708_vm4 = vweird.f32 %v3933_v31  ;;  %v2752_v4 = vand.u32 2147483648, %v2740_v17  ;;  %v7166_v47 = vld [vmem:[%s7723_s4 + $0x160] sm:$0xff] }
 0x74b   :  { %v2722_v61 = vmul.f32 %v3935_v27, %v2720_v8  ;;  %3938 = vtanh.f32 %v2696_v24  ;;  %vm2727_vm5 = vweird.f32 %v3935_v27  ;;  %vm2709_vm8 = vmor %vm2707_vm6, %vm2708_vm4  ;;  %vm2746_vm13 = vweird.f32 %v2740_v17  ;;  %v7172_v8 = vld [vmem:[%s7723_s4 + $0x168] sm:$0xff]  ;;  %v7214_v24 = vld [vmem:[%s7723_s4 + $0x120] sm:$0xff] }
 0x74c   :  { %v2704_v32 = vsub.f32 1.0, %v2703_v60  ;;  %vm2728_vm9 = vmor %vm2726_vm7, %vm2727_vm5  ;;  %v2750_v14 = vand.u32 2147483647, %v2740_v17  ;;  %v2753_v19 = vor.u32 1.1754944e-38, %v2752_v4  ;;  %v7226_v60 = vld [vmem:[%s7723_s4 + $0x130] sm:$0xff]  ;;  %v7382_v4 = vld [vmem:[%s7723_s4 + $0x40] sm:$0xff] }
 0x74d   :  { %v2723_v55 = vsub.f32 1.0, %v2722_v61  ;;  %v7232_v61 = vld [vmem:[%s7723_s4 + $0x138] sm:$0xff]  ;;  %8180 = vst [vmem:[#allocation11_spill] sm:$0xff] %v7382_v4 }
 0x74e   :  { %v2705_v28 = vmul.f32 %v3933_v31, %v2704_v32  ;;  %vm2751_vm15 = vcmp.eq.f32.partialorder %v2750_v14, 8.507059e+37  ;;  %v7238_v32 = vld [vmem:[%s7723_s4 + $0x100] sm:$0xff]  ;;  %v7388_v14 = vld [vmem:[%s7723_s4 + $0x48] sm:$0xff] }
 0x74f   :  { %v2724_v49 = vmul.f32 %v3935_v27, %v2723_v55  ;;  %v7244_v55 = vld [vmem:[%s7723_s4 + $0x108] sm:$0xff]  ;;  %8181 = vst [vmem:[#allocation12_spill] sm:$0xff] %v7388_v14 }
 0x750   :  { %v3937_v22 = vpop.eup %3936  ;;  %v2706_v53 = vadd.f32 %v3933_v31, %v2705_v28  ;;  %v7262_v28 = vld [vmem:[%s7723_s4 + $0xe0] sm:$0xff] }
 0x751   :  { %v2725_v10 = vadd.f32 %v3935_v27, %v2724_v49  ;;  %v2742_v43 = vmul.f32 %v3937_v22, %v2740_v17  ;;  %v3939_v45 = vpop.eup %3938  ;;  %vm2747_vm12 = vweird.f32 %v3937_v22  ;;  %v7202_v17 = vld [vmem:[%s7723_s4 + $0x150] sm:$0xff] }
 0x752   :  { %v2710_v38 = vsel %vm2709_vm8, %v3933_v31, %v2706_v53  ;;  %vm2748_vm14 = vmor %vm2746_vm13, %vm2747_vm12  ;;  %v7208_v31 = vld [vmem:[%s7723_s4 + $0x158] sm:$0xff]  ;;  %v7274_v49 = vld [vmem:[%s7723_s4 + $0xf0] sm:$0xff] }
 0x753   :  { %v2715_v48 = vsel %vm2712_vm10, %v2714_v21, %v2710_v38  ;;  %v2729_v11 = vsel %vm2728_vm9, %v3935_v27, %v2725_v10  ;;  %v2743_v51 = vsub.f32 1.0, %v2742_v43  ;;  %v7220_v27 = vld [vmem:[%s7723_s4 + $0x128] sm:$0xff]  ;;  %v7298_v21 = vld [vmem:[%s7723_s4 + $0xd0] sm:$0xff]  ;;  %v7304_v10 = vld [vmem:[%s7723_s4 + $0xd8] sm:$0xff] }
 0x754   :  { %v2734_v18 = vsel %vm2731_vm11, %v2733_v12, %v2729_v11  ;;  %v2757_v40 = vmul.f32 %v3939_v45, %v2715_v48  ;;  %v7292_v53 = vld [vmem:[%s7723_s4 + $0xc8] sm:$0xff]  ;;  %8166 = vst [vmem:[#allocation7_spill] sm:$0xff] %v7298_v21  ;;  %v7310_v43 = vld [vmem:[%s7723_s4 + $0xa0] sm:$0xff]  ;;  %v7322_v38 = vld [vmem:[%s7723_s4 + $0xb0] sm:$0xff] }
 0x755   :  { %v2756_v42 = vmul.f32 %v2734_v18, %v6988_v30  ;;  %v2744_v33 = vmul.f32 %v3937_v22, %v2743_v51  ;;  %v7070_v30 = vld [vmem:[%s7723_s4 + $0x1e0] sm:$0xff]  ;;  %8167 = vst [vmem:[#allocation38_spill] sm:$0xff] %v7304_v10  ;;  %v7316_v12 = vld [vmem:[%s7723_s4 + $0xa8] sm:$0xff]  ;;  %v7328_v45 = vld [vmem:[%s7723_s4 + $0xb8] sm:$0xff] }
 0x756   :  { %8168 = vst [vmem:[#allocation39_spill] sm:$0xff] %v7310_v43  ;;  %v7334_v48 = vld [vmem:[%s7723_s4 + $0x80] sm:$0xff]  ;;  %v7340_v11 = vld [vmem:[%s7723_s4 + $0x88] sm:$0xff]  ;;  %v7346_v51 = vld [vmem:[%s7723_s4 + $0x90] sm:$0xff] }
 0x757   :  { %v7064_v44 = vadd.f32 %v2757_v40, %v2756_v42  ;;  %v2745_v50 = vadd.f32 %v3937_v22, %v2744_v33  ;;  %8169 = vst [vmem:[#allocation40_spill] sm:$0xff] %v7316_v12  ;;  %v7352_v18 = vld [vmem:[%s7723_s4 + $0x98] sm:$0xff]  ;;  %v7358_v40 = vld [vmem:[%s7723_s4 + $0x60] sm:$0xff]  ;;  %v7364_v42 = vld [vmem:[%s7723_s4 + $0x68] sm:$0xff] }
 0x758   :  { %8170 = vst [vmem:[#allocation6_spill] sm:$0xff] %v7322_v38  ;;  %v7370_v33 = vld [vmem:[%s7723_s4 + $0x70] sm:$0xff] }
 0x759   :  { %3940 = vtanh.f32 %v7064_v44  ;;  %v2749_v6 = vsel %vm2748_vm14, %v3937_v22, %v2745_v50  ;;  %v7286_v22 = vld [vmem:[%s7723_s4 + $0xc0] sm:$0xff]  ;;  %8171 = vst [vmem:[#allocation41_spill] sm:$0xff] %v7328_v45  ;;  %v7376_v50 = vld [vmem:[%s7723_s4 + $0x78] sm:$0xff] }
 0x75a   :  { %v2754_v5 = vsel %vm2751_vm15, %v2753_v19, %v2749_v6  ;;  %8172 = vst [vmem:[#allocation4_spill] sm:$0xff] %v7334_v48  ;;  %v7394_v6 = vld [vmem:[%s7723_s4 + $0x50] sm:$0xff]  ;;  %v7400_v19 = vld [vmem:[%s7723_s4 + $0x58] sm:$0xff] }
 0x75b   :  { %8173 = vst [vmem:[#allocation5_spill] sm:$0xff] %v7340_v11 }
 0x75c   :  { %8174 = vst [vmem:[#allocation13_spill] sm:$0xff] %v7346_v51 }
 0x75d   :  { %8175 = vst [vmem:[#allocation27_spill] sm:$0xff] %v7352_v18 }
 0x75e   :  { %8176 = vst [vmem:[#allocation8_spill] sm:$0xff] %v7358_v40 }
 0x75f   :  { %v3941_v25 = vpop.eup %3940  ;;  %8177 = vst [vmem:[#allocation9_spill] sm:$0xff] %v7364_v42 }
 0x760   :  { %v2760_v58 = vmul.f32 %v3941_v25, %v2754_v5  ;;  %8178 = vst [vmem:[#allocation14_spill] sm:$0xff] %v7370_v33  ;;  %v7406_v25 = vld [vmem:[%s7723_s4 + $0x20] sm:$0xff]  ;;  %v7412_v5 = vld [vmem:[%s7723_s4 + $0x28] sm:$0xff] }
 0x761   :  { %8179 = vst [vmem:[#allocation10_spill] sm:$0xff] %v7376_v50 }
 0x762   :  { %2781 = vmatmul.f32.vlgmr.msra.gmra.mxu0 %v2760_v58  ;;  %2801 = vmatmul.f32.vlgmr.msra.gmra.mxu1 %v2760_v58  ;;  %8182 = vst [vmem:[#allocation47_spill] sm:$0xff] %v7394_v6 }
 0x763   :  { %2821 = vmatmul.f32.vlgmr.msra.gmra.mxu2 %v2760_v58  ;;  %2841 = vmatmul.f32.vlgmr.msra.gmra.mxu3 %v2760_v58  ;;  %8183 = vst [vmem:[#allocation17_spill] sm:$0xff] %v7400_v19  ;;  %v7418_v58 = vld [vmem:[%s7723_s4 + $0x30] sm:$0xff] }
 0x764   :  { %3067 = vmatpush.msra.mxu0 %v7070_v30  ;;  %3087 = vmatpush.msra.mxu1 %v7076_v1  ;;  %8184 = vst [vmem:[#allocation45_spill] sm:$0xff] %v7406_v25 }
 0x765   :  { %3107 = vmatpush.msra.mxu2 %v7082_v34  ;;  %3127 = vmatpush.msra.mxu3 %v7088_v35  ;;  %8185 = vst [vmem:[#allocation46_spill] sm:$0xff] %v7412_v5 }
 0x766   :  { %3068 = vmatpush.msra.mxu0 %v7094_v3  ;;  %3088 = vmatpush.msra.mxu1 %v7100_v37  ;;  %8186 = vst [vmem:[#allocation31_spill] sm:$0xff] %v7418_v58 }
 0x767   :  { %3108 = vmatpush.msra.mxu2 %v7106_v20  ;;  %3128 = vmatpush.msra.mxu3 %v7112_v13 }
 0x768   :  { %3069 = vmatpush.msra.mxu0 %v7118_v56  ;;  %3089 = vmatpush.msra.mxu1 %v7124_v52 }
 0x769   :  { %3109 = vmatpush.msra.mxu2 %v7130_v15  ;;  %3129 = vmatpush.msra.mxu3 %v7136_v59 }
 0x76a   :  { %3070 = vmatpush.msra.mxu0 %v7142_v62  ;;  %3090 = vmatpush.msra.mxu1 %v7148_v29 }
 0x76b   :  { %3110 = vmatpush.msra.mxu2 %v7154_v23  ;;  %3130 = vmatpush.msra.mxu3 %v7160_v39 }
 0x76c   :  { %3071 = vmatpush.msra.mxu0 %v7166_v47  ;;  %3091 = vmatpush.msra.mxu1 %v7172_v8 }
 0x76d   :  { %3111 = vmatpush.msra.mxu2 %v7178_v16  ;;  %3131 = vmatpush.msra.mxu3 %v7184_v54 }
 0x76e   :  { %3072 = vmatpush.msra.mxu0 %v7190_v63  ;;  %3092 = vmatpush.msra.mxu1 %v7196_v0 }
 0x76f   :  { %3112 = vmatpush.msra.mxu2 %v7202_v17  ;;  %3132 = vmatpush.msra.mxu3 %v7208_v31 }
 0x770   :  { %3073 = vmatpush.msra.mxu0 %v7214_v24  ;;  %3093 = vmatpush.msra.mxu1 %v7220_v27 }
 0x771   :  { %3113 = vmatpush.msra.mxu2 %v7226_v60  ;;  %3133 = vmatpush.msra.mxu3 %v7232_v61 }
 0x772   :  { %3074 = vmatpush.msra.mxu0 %v7238_v32  ;;  %3094 = vmatpush.msra.mxu1 %v7244_v55 }
 0x773   :  { %3114 = vmatpush.msra.mxu2 %v7250_v41  ;;  %3134 = vmatpush.msra.mxu3 %v7256_v46 }
 0x774   :  { %3075 = vmatpush.msra.mxu0 %v7262_v28  ;;  %3095 = vmatpush.msra.mxu1 %v7268_v7 }
 0x775   :  { %3115 = vmatpush.msra.mxu2 %v7274_v49  ;;  %3135 = vmatpush.msra.mxu3 %v7280_v57 }
 0x776   :  { %3076 = vmatpush.msra.mxu0 %v7286_v22  ;;  %3096 = vmatpush.msra.mxu1 %v7292_v53 }
 0x777   :  { %3116 = vmatpush.msra.mxu2 %v7298_v21  ;;  %3136 = vmatpush.msra.mxu3 %v7304_v10 }
 0x778   :  { %3077 = vmatpush.msra.mxu0 %v7310_v43  ;;  %3097 = vmatpush.msra.mxu1 %v7316_v12 }
 0x779   :  { %3117 = vmatpush.msra.mxu2 %v7322_v38  ;;  %3137 = vmatpush.msra.mxu3 %v7328_v45 }
 0x77a   :  { %3078 = vmatpush.msra.mxu0 %v7334_v48  ;;  %3098 = vmatpush.msra.mxu1 %v7340_v11 }
 0x77b   :  { %3118 = vmatpush.msra.mxu2 %v7346_v51  ;;  %3138 = vmatpush.msra.mxu3 %v7352_v18 }
 0x77c   :  { %3079 = vmatpush.msra.mxu0 %v7358_v40  ;;  %3099 = vmatpush.msra.mxu1 %v7364_v42 }
 0x77d   :  { %3119 = vmatpush.msra.mxu2 %v7370_v33  ;;  %3139 = vmatpush.msra.mxu3 %v7376_v50 }
 0x77e   :  { %3080 = vmatpush.msra.mxu0 %v7382_v4  ;;  %3100 = vmatpush.msra.mxu1 %v7388_v14  ;;  %v8193_v14 = vld [vmem:[#allocation18_spill] sm:$0xff] }
 0x77f   :  { %3120 = vmatpush.msra.mxu2 %v7394_v6  ;;  %3140 = vmatpush.msra.mxu3 %v7400_v19  ;;  %v7424_v19 = vld [vmem:[%s7723_s4 + $0x38] sm:$0xff] }
 0x780   :  { %3081 = vmatpush.msra.mxu0 %v7406_v25  ;;  %3101 = vmatpush.msra.mxu1 %v7412_v5  ;;  %8187 = vst [vmem:[#allocation30_spill] sm:$0xff] %v7424_v19  ;;  %v7430_v25 = vld [vmem:[%s7723_s4] sm:$0xff]  ;;  %v7436_v5 = vld [vmem:[%s7723_s4 + $0x8] sm:$0xff] }
 0x781   :  { %3121 = vmatpush.msra.mxu2 %v7418_v58  ;;  %3141 = vmatpush.msra.mxu3 %v7424_v19  ;;  %8188 = vst [vmem:[#allocation48_spill] sm:$0xff] %v7430_v25  ;;  %v7442_v58 = vld [vmem:[%s7723_s4 + $0x10] sm:$0xff]  ;;  %v7448_v19 = vld [vmem:[%s7723_s4 + $0x18] sm:$0xff] }
 0x782   :  { %3082 = vmatpush.msra.mxu0 %v7430_v25  ;;  %8189 = vst [vmem:[#allocation49_spill] sm:$0xff] %v7436_v5  ;;  %3102 = vmatpush.msra.mxu1 %v7436_v5  ;;  %v8192_v25 = vld [vmem:[#allocation25_spill] sm:$0xff]  ;;  %v2264_v5 = vadd.f32 %v8193_v14, %v8160_v36 }
 0x783   :  { %8190 = vst [vmem:[#allocation21_spill] sm:$0xff] %v7442_v58  ;;  %3122 = vmatpush.msra.mxu2 %v7442_v58  ;;  %3142 = vmatpush.msra.mxu3 %v7448_v19  ;;  %v2223_v6 = vadd.f32 %v8192_v25, %v8158_v2  ;;  %v8194_v58 = vld [vmem:[#allocation28_spill] sm:$0xff] }
 0x784   :  { %8191 = vst [vmem:[#allocation32_spill] sm:$0xff] %v7448_v19  ;;  %v2346_v51 = vadd.f32 %v8194_v58, %v8162_v9 }
 0x7df   :  { %v2782_v4 = vpop.f32.mrf.mxu0  ;;  %v2802_v50 = vpop.f32.mrf.mxu1 }
 0x7e0   :  { %v2845_v33 = vadd.f32 %v2782_v4, %v2223_v6  ;;  %v2846_v42 = vadd.f32 %v2802_v50, %v2264_v5 }
 0x7e2   :  { %v3756_v40 = vmul.f32 -1.442695, %v2845_v33  ;;  %v3757_v18 = vmul.f32 -1.442695, %v2846_v42  ;;  %v8195_v33 = vld [vmem:[#allocation43_spill] sm:$0xff] }
 0x7e3   :  { %v2305_v42 = vadd.f32 %v8195_v33, %v8164_v26 }
 0x7e4   :  { %3942 = vpow2.f32 %v3756_v40 }
 0x7e5   :  { %3944 = vpow2.f32 %v3757_v18 }
 0x7e6   :  { %v2842_v11 = vpop.f32.mrf.mxu3  ;;  %v2822_v14 = vpop.f32.mrf.mxu2 }
 0x7e7   :  { %v2848_v48 = vadd.f32 %v2842_v11, %v2346_v51  ;;  %v2847_v6 = vadd.f32 %v2822_v14, %v2305_v42 }
 0x7e9   :  { %v3758_v19 = vmul.f32 -1.442695, %v2848_v48 }
 0x7ea   :  { %v3943_v45 = vpop.eup %3942 }
 0x7eb   :  { %v3945_v38 = vpop.eup %3944  ;;  %v2852_v25 = vadd.f32 1.0, %v3943_v45  ;;  %3946 = vpow2.f32 %v3758_v19 }
 0x7ec   :  { %v2871_v2 = vadd.f32 1.0, %v3945_v38 }
 0x7ed   :  { %3948 = vrcp.f32 %v2852_v25  ;;  %v2864_v58 = vand.u32 2147483648, %v2852_v25  ;;  %v2862_v19 = vand.u32 2147483647, %v2852_v25  ;;  %vm2858_vm2 = vweird.f32 %v2852_v25 }
 0x7ee   :  { %3950 = vrcp.f32 %v2871_v2  ;;  %v2883_v45 = vand.u32 2147483648, %v2871_v2  ;;  %v2881_v36 = vand.u32 2147483647, %v2871_v2  ;;  %vm2877_vm3 = vweird.f32 %v2871_v2 }
 0x7ef   :  { %v2865_v14 = vor.u32 1.1754944e-38, %v2864_v58  ;;  %vm2863_vm6 = vcmp.eq.f32.partialorder %v2862_v19, 8.507059e+37 }
 0x7f0   :  { %vm2882_vm7 = vcmp.eq.f32.partialorder %v2881_v36, 8.507059e+37 }
 0x7f1   :  { %v3947_v4 = vpop.eup %3946 }
 0x7f2   :  { %v2891_v40 = vadd.f32 1.0, %v3947_v4 }
 0x7f3   :  { %v3949_v50 = vpop.eup %3948 }
 0x7f4   :  { %v3951_v5 = vpop.eup %3950  ;;  %v2854_v18 = vmul.f32 %v3949_v50, %v2852_v25  ;;  %3952 = vrcp.f32 %v2891_v40  ;;  %vm2859_vm0 = vweird.f32 %v3949_v50  ;;  %vm2897_vm9 = vweird.f32 %v2891_v40 }
 0x7f5   :  { %v2873_v11 = vmul.f32 %v3951_v5, %v2871_v2  ;;  %3954 = vtanh.f32 %v2847_v6  ;;  %vm2878_vm1 = vweird.f32 %v3951_v5  ;;  %vm2860_vm4 = vmor %vm2858_vm2, %vm2859_vm0 }
 0x7f6   :  { %v2855_v48 = vsub.f32 1.0, %v2854_v18  ;;  %vm2879_vm5 = vmor %vm2877_vm3, %vm2878_vm1  ;;  %v2884_v18 = vor.u32 1.1754944e-38, %v2883_v45 }
 0x7f7   :  { %v2874_v51 = vsub.f32 1.0, %v2873_v11 }
 0x7f8   :  { %v2856_v38 = vmul.f32 %v3949_v50, %v2855_v48 }
 0x7f9   :  { %v2875_v9 = vmul.f32 %v3951_v5, %v2874_v51 }
 0x7fa   :  { %v3953_v12 = vpop.eup %3952  ;;  %v2857_v33 = vadd.f32 %v3949_v50, %v2856_v38 }
 0x7fb   :  { %v2876_v4 = vadd.f32 %v3951_v5, %v2875_v9  ;;  %v2893_v42 = vmul.f32 %v3953_v12, %v2891_v40  ;;  %v3955_v6 = vpop.eup %3954  ;;  %vm2898_vm8 = vweird.f32 %v3953_v12  ;;  %v2903_v9 = vand.u32 2147483648, %v2891_v40 }
 0x7fc   :  { %v2861_v11 = vsel %vm2860_vm4, %v3949_v50, %v2857_v33  ;;  %v2901_v50 = vand.u32 2147483647, %v2891_v40  ;;  %vm2899_vm10 = vmor %vm2897_vm9, %vm2898_vm8  ;;  %v8202_v40 = vld [vmem:[#allocation4_spill] sm:$0xff]  ;;  %v8203_v33 = vld [vmem:[#allocation5_spill] sm:$0xff] }
 0x7fd   :  { %v2866_v26 = vsel %vm2863_vm6, %v2865_v14, %v2861_v11  ;;  %v2880_v48 = vsel %vm2879_vm5, %v3951_v5, %v2876_v4  ;;  %v2894_v43 = vsub.f32 1.0, %v2893_v42  ;;  %v2904_v45 = vor.u32 1.1754944e-38, %v2903_v9  ;;  %v8204_v14 = vld [vmem:[#allocation13_spill] sm:$0xff]  ;;  %v8205_v4 = vld [vmem:[#allocation27_spill] sm:$0xff]  ;;  %v8206_v42 = vld [vmem:[#allocation8_spill] sm:$0xff] }
 0x7fe   :  { %v2885_v51 = vsel %vm2882_vm7, %v2884_v18, %v2880_v48  ;;  %v2908_v10 = vmul.f32 %v3955_v6, %v2866_v26  ;;  %vm2902_vm11 = vcmp.eq.f32.partialorder %v2901_v50, 8.507059e+37  ;;  %v8196_v26 = vld [vmem:[#allocation7_spill] sm:$0xff]  ;;  %v8207_v18 = vld [vmem:[#allocation9_spill] sm:$0xff]  ;;  %v8208_v11 = vld [vmem:[#allocation14_spill] sm:$0xff] }
 0x7ff   :  { %v2907_v21 = vmul.f32 %v2885_v51, %v7064_v44  ;;  %v2895_v38 = vmul.f32 %v3953_v12, %v2894_v43  ;;  %v8197_v44 = vld [vmem:[#allocation38_spill] sm:$0xff]  ;;  %v8210_v48 = vld [vmem:[#allocation11_spill] sm:$0xff]  ;;  %v8211_v51 = vld [vmem:[#allocation12_spill] sm:$0xff] }
 0x800   :  { %v8200_v43 = vld [vmem:[#allocation6_spill] sm:$0xff]  ;;  %v8214_v9 = vld [vmem:[#allocation45_spill] sm:$0xff] }
 0x801   :  { %v7460_v25 = vadd.f32 %v2908_v10, %v2907_v21  ;;  %v2896_v2 = vadd.f32 %v3953_v12, %v2895_v38  ;;  %v8198_v21 = vld [vmem:[#allocation39_spill] sm:$0xff]  ;;  %v8199_v10 = vld [vmem:[#allocation40_spill] sm:$0xff]  ;;  %v8209_v6 = vld [vmem:[#allocation10_spill] sm:$0xff] }
 0x802   :  { %v8212_v38 = vld [vmem:[#allocation47_spill] sm:$0xff]  ;;  %v8215_v50 = vld [vmem:[#allocation46_spill] sm:$0xff] }
 0x803   :  { %3956 = vtanh.f32 %v7460_v25  ;;  %v2900_v58 = vsel %vm2899_vm10, %v3953_v12, %v2896_v2  ;;  %v8201_v12 = vld [vmem:[#allocation41_spill] sm:$0xff] }
 0x804   :  { %v2905_v5 = vsel %vm2902_vm11, %v2904_v45, %v2900_v58  ;;  %v8213_v2 = vld [vmem:[#allocation17_spill] sm:$0xff]  ;;  %v8216_v58 = vld [vmem:[#allocation31_spill] sm:$0xff]  ;;  %v8217_v45 = vld [vmem:[#allocation30_spill] sm:$0xff] }
 0x809   :  { %v3957_v36 = vpop.eup %3956 }
 0x80a   :  { %v2911_v19 = vmul.f32 %v3957_v36, %v2905_v5  ;;  %v8218_v36 = vld [vmem:[#allocation48_spill] sm:$0xff]  ;;  %v8219_v5 = vld [vmem:[#allocation49_spill] sm:$0xff] }
 0x80c   :  { %2932 = vmatmul.f32.vlgmr.msrb.gmra.mxu0 %v2911_v19  ;;  %2952 = vmatmul.f32.vlgmr.msrb.gmra.mxu1 %v2911_v19 }
 0x80d   :  { %2972 = vmatmul.f32.vlgmr.msrb.gmra.mxu2 %v2911_v19  ;;  %2992 = vmatmul.f32.vlgmr.msrb.gmra.mxu3 %v2911_v19  ;;  %v8220_v19 = vld [vmem:[#allocation21_spill] sm:$0xff] }
 0x80e   :  { %3218 = vmatpush.msrb.mxu0 %v7070_v30  ;;  %3238 = vmatpush.msrb.mxu1 %v7076_v1 }
 0x80f   :  { %3258 = vmatpush.msrb.mxu2 %v7082_v34  ;;  %3278 = vmatpush.msrb.mxu3 %v7088_v35 }
 0x810   :  { %3219 = vmatpush.msrb.mxu0 %v7094_v3  ;;  %3239 = vmatpush.msrb.mxu1 %v7100_v37 }
 0x811   :  { %3259 = vmatpush.msrb.mxu2 %v7106_v20  ;;  %3279 = vmatpush.msrb.mxu3 %v7112_v13 }
 0x812   :  { %3220 = vmatpush.msrb.mxu0 %v7118_v56  ;;  %3240 = vmatpush.msrb.mxu1 %v7124_v52 }
 0x813   :  { %3260 = vmatpush.msrb.mxu2 %v7130_v15  ;;  %3280 = vmatpush.msrb.mxu3 %v7136_v59 }
 0x814   :  { %3221 = vmatpush.msrb.mxu0 %v7142_v62  ;;  %3241 = vmatpush.msrb.mxu1 %v7148_v29 }
 0x815   :  { %3261 = vmatpush.msrb.mxu2 %v7154_v23  ;;  %3281 = vmatpush.msrb.mxu3 %v7160_v39 }
 0x816   :  { %3222 = vmatpush.msrb.mxu0 %v7166_v47  ;;  %3242 = vmatpush.msrb.mxu1 %v7172_v8 }
 0x817   :  { %3262 = vmatpush.msrb.mxu2 %v7178_v16  ;;  %3282 = vmatpush.msrb.mxu3 %v7184_v54 }
 0x818   :  { %3223 = vmatpush.msrb.mxu0 %v7190_v63  ;;  %3243 = vmatpush.msrb.mxu1 %v7196_v0 }
 0x819   :  { %3263 = vmatpush.msrb.mxu2 %v7202_v17  ;;  %3283 = vmatpush.msrb.mxu3 %v7208_v31 }
 0x81a   :  { %3224 = vmatpush.msrb.mxu0 %v7214_v24  ;;  %3244 = vmatpush.msrb.mxu1 %v7220_v27 }
 0x81b   :  { %3264 = vmatpush.msrb.mxu2 %v7226_v60  ;;  %3284 = vmatpush.msrb.mxu3 %v7232_v61 }
 0x81c   :  { %3225 = vmatpush.msrb.mxu0 %v7238_v32  ;;  %3245 = vmatpush.msrb.mxu1 %v7244_v55 }
 0x81d   :  { %3265 = vmatpush.msrb.mxu2 %v7250_v41  ;;  %3285 = vmatpush.msrb.mxu3 %v7256_v46 }
 0x81e   :  { %3226 = vmatpush.msrb.mxu0 %v7262_v28  ;;  %3246 = vmatpush.msrb.mxu1 %v7268_v7 }
 0x81f   :  { %3266 = vmatpush.msrb.mxu2 %v7274_v49  ;;  %3286 = vmatpush.msrb.mxu3 %v7280_v57 }
 0x820   :  { %3227 = vmatpush.msrb.mxu0 %v7286_v22  ;;  %3247 = vmatpush.msrb.mxu1 %v7292_v53 }
 0x821   :  { %3267 = vmatpush.msrb.mxu2 %v8196_v26  ;;  %3287 = vmatpush.msrb.mxu3 %v8197_v44 }
 0x822   :  { %3228 = vmatpush.msrb.mxu0 %v8198_v21  ;;  %3248 = vmatpush.msrb.mxu1 %v8199_v10 }
 0x823   :  { %3268 = vmatpush.msrb.mxu2 %v8200_v43  ;;  %3288 = vmatpush.msrb.mxu3 %v8201_v12 }
 0x824   :  { %3229 = vmatpush.msrb.mxu0 %v8202_v40  ;;  %3249 = vmatpush.msrb.mxu1 %v8203_v33 }
 0x825   :  { %3269 = vmatpush.msrb.mxu2 %v8204_v14  ;;  %3289 = vmatpush.msrb.mxu3 %v8205_v4  ;;  %v8227_v14 = vld [vmem:[#allocation44_spill] sm:$0xff] }
 0x826   :  { %3230 = vmatpush.msrb.mxu0 %v8206_v42  ;;  %3250 = vmatpush.msrb.mxu1 %v8207_v18 }
 0x827   :  { %3270 = vmatpush.msrb.mxu2 %v8208_v11  ;;  %3290 = vmatpush.msrb.mxu3 %v8209_v6  ;;  %v8225_v11 = vld [vmem:[#allocation42_spill] sm:$0xff] }
 0x828   :  { %3231 = vmatpush.msrb.mxu0 %v8210_v48  ;;  %3251 = vmatpush.msrb.mxu1 %v8211_v51  ;;  %v8221_v48 = vld [vmem:[#allocation32_spill] sm:$0xff]  ;;  %v8222_v51 = vld [vmem:[#allocation55_spill] sm:$0xff] }
 0x829   :  { %3271 = vmatpush.msrb.mxu2 %v8212_v38  ;;  %3291 = vmatpush.msrb.mxu3 %v8213_v2  ;;  %v8223_v38 = vld [vmem:[#allocation29_spill] sm:$0xff]  ;;  %v8224_v2 = vld [vmem:[#allocation56_spill] sm:$0xff] }
 0x82a   :  { %3232 = vmatpush.msrb.mxu0 %v8214_v9  ;;  %3252 = vmatpush.msrb.mxu1 %v8215_v50  ;;  %v2226_v6 = vadd.f32 %v8223_v38, %v8222_v51  ;;  %v2267_v9 = vadd.f32 %v8225_v11, %v8224_v2 }
 0x82b   :  { %3272 = vmatpush.msrb.mxu2 %v8216_v58  ;;  %3292 = vmatpush.msrb.mxu3 %v8217_v45 }
 0x82c   :  { %3233 = vmatpush.msrb.mxu0 %v8218_v36  ;;  %3253 = vmatpush.msrb.mxu1 %v8219_v5  ;;  %v8226_v36 = vld [vmem:[#allocation59_spill] sm:$0xff] }
 0x82d   :  { %3273 = vmatpush.msrb.mxu2 %v8220_v19  ;;  %3293 = vmatpush.msrb.mxu3 %v8221_v48  ;;  %v2349_v5 = vadd.f32 %v8227_v14, %v8226_v36 }
 0x889   :  { %v2933_v18 = vpop.f32.mrf.mxu0  ;;  %v2953_v50 = vpop.f32.mrf.mxu1 }
 0x88a   :  { %v2996_v42 = vadd.f32 %v2933_v18, %v2226_v6  ;;  %v2997_v58 = vadd.f32 %v2953_v50, %v2267_v9  ;;  %v8228_v6 = vld [vmem:[#allocation61_spill] sm:$0xff] }
 0x88c   :  { %v3759_v4 = vmul.f32 -1.442695, %v2996_v42  ;;  %v3760_v45 = vmul.f32 -1.442695, %v2997_v58  ;;  %v8229_v42 = vld [vmem:[#allocation24_spill] sm:$0xff] }
 0x88d   :  { %v2308_v9 = vadd.f32 %v8229_v42, %v8228_v6 }
 0x88e   :  { %3958 = vpow2.f32 %v3759_v4 }
 0x88f   :  { %3960 = vpow2.f32 %v3760_v45 }
 0x890   :  { %v2993_v19 = vpop.f32.mrf.mxu3  ;;  %v2973_v11 = vpop.f32.mrf.mxu2 }
 0x891   :  { %v2999_v33 = vadd.f32 %v2993_v19, %v2349_v5  ;;  %v2998_v58 = vadd.f32 %v2973_v11, %v2308_v9 }
 0x893   :  { %v3761_v48 = vmul.f32 -1.442695, %v2999_v33 }
 0x894   :  { %v3959_v40 = vpop.eup %3958 }
 0x895   :  { %v3961_v12 = vpop.eup %3960  ;;  %v3003_v38 = vadd.f32 1.0, %v3959_v40  ;;  %3962 = vpow2.f32 %v3761_v48 }
 0x896   :  { %v3022_v51 = vadd.f32 1.0, %v3961_v12 }
 0x897   :  { %3964 = vrcp.f32 %v3003_v38  ;;  %v3015_v36 = vand.u32 2147483648, %v3003_v38  ;;  %v3013_v48 = vand.u32 2147483647, %v3003_v38  ;;  %vm3009_vm14 = vweird.f32 %v3003_v38 }
 0x898   :  { %3966 = vrcp.f32 %v3022_v51  ;;  %v3034_v40 = vand.u32 2147483648, %v3022_v51  ;;  %v3032_v43 = vand.u32 2147483647, %v3022_v51  ;;  %vm3028_vm15 = vweird.f32 %v3022_v51 }
 0x899   :  { %v3016_v11 = vor.u32 1.1754944e-38, %v3015_v36  ;;  %vm3014_vm2 = vcmp.eq.f32.partialorder %v3013_v48, 8.507059e+37 }
 0x89a   :  { %vm3033_vm3 = vcmp.eq.f32.partialorder %v3032_v43, 8.507059e+37 }
 0x89b   :  { %v3963_v18 = vpop.eup %3962 }
 0x89c   :  { %v3042_v4 = vadd.f32 1.0, %v3963_v18 }
 0x89d   :  { %v3965_v50 = vpop.eup %3964 }
 0x89e   :  { %v3967_v14 = vpop.eup %3966  ;;  %v3005_v45 = vmul.f32 %v3965_v50, %v3003_v38  ;;  %3968 = vrcp.f32 %v3042_v4  ;;  %vm3010_vm12 = vweird.f32 %v3965_v50  ;;  %vm3048_vm5 = vweird.f32 %v3042_v4 }
 0x89f   :  { %v3024_v5 = vmul.f32 %v3967_v14, %v3022_v51  ;;  %3970 = vtanh.f32 %v2998_v58  ;;  %vm3029_vm13 = vweird.f32 %v3967_v14  ;;  %vm3011_vm0 = vmor %vm3009_vm14, %vm3010_vm12  ;;  %v3052_v36 = vand.u32 2147483647, %v3042_v4 }
 0x8a0   :  { %v3006_v33 = vsub.f32 1.0, %v3005_v45  ;;  %vm3030_vm1 = vmor %vm3028_vm15, %vm3029_vm13  ;;  %v3035_v45 = vor.u32 1.1754944e-38, %v3034_v40 }
 0x8a1   :  { %v3025_v19 = vsub.f32 1.0, %v3024_v5  ;;  %vm3053_vm7 = vcmp.eq.f32.partialorder %v3052_v36, 8.507059e+37  ;;  %v8249_v36 = vld [vmem:[#allocation46_spill] sm:$0xff] }
 0x8a2   :  { %v3007_v12 = vmul.f32 %v3965_v50, %v3006_v33 }
 0x8a3   :  { %v3026_v2 = vmul.f32 %v3967_v14, %v3025_v19 }
 0x8a4   :  { %v3969_v10 = vpop.eup %3968  ;;  %v3008_v42 = vadd.f32 %v3965_v50, %v3007_v12 }
 0x8a5   :  { %v3027_v18 = vadd.f32 %v3967_v14, %v3026_v2  ;;  %v3044_v9 = vmul.f32 %v3969_v10, %v3042_v4  ;;  %v3971_v58 = vpop.eup %3970  ;;  %vm3049_vm4 = vweird.f32 %v3969_v10  ;;  %v3054_v2 = vand.u32 2147483648, %v3042_v4  ;;  %v8236_v4 = vld [vmem:[#allocation4_spill] sm:$0xff] }
 0x8a6   :  { %v3012_v5 = vsel %vm3011_vm0, %v3965_v50, %v3008_v42  ;;  %vm3050_vm6 = vmor %vm3048_vm5, %vm3049_vm4  ;;  %v8237_v42 = vld [vmem:[#allocation5_spill] sm:$0xff] }
 0x8a7   :  { %v3017_v6 = vsel %vm3014_vm2, %v3016_v11, %v3012_v5  ;;  %v3031_v33 = vsel %vm3030_vm1, %v3967_v14, %v3027_v18  ;;  %v3045_v21 = vsub.f32 1.0, %v3044_v9  ;;  %v3055_v40 = vor.u32 1.1754944e-38, %v3054_v2  ;;  %v8238_v11 = vld [vmem:[#allocation13_spill] sm:$0xff]  ;;  %v8239_v18 = vld [vmem:[#allocation27_spill] sm:$0xff]  ;;  %v8240_v9 = vld [vmem:[#allocation8_spill] sm:$0xff] }
 0x8a8   :  { %v3036_v19 = vsel %vm3033_vm3, %v3035_v45, %v3031_v33  ;;  %v3059_v44 = vmul.f32 %v3971_v58, %v3017_v6  ;;  %v8235_v6 = vld [vmem:[#allocation41_spill] sm:$0xff]  ;;  %v8242_v5 = vld [vmem:[#allocation14_spill] sm:$0xff]  ;;  %v8244_v33 = vld [vmem:[#allocation11_spill] sm:$0xff] }
 0x8a9   :  { %v3058_v26 = vmul.f32 %v3036_v19, %v7460_v25  ;;  %v3046_v12 = vmul.f32 %v3969_v10, %v3045_v21  ;;  %v8230_v25 = vld [vmem:[#allocation7_spill] sm:$0xff]  ;;  %v8233_v21 = vld [vmem:[#allocation40_spill] sm:$0xff]  ;;  %v8241_v45 = vld [vmem:[#allocation9_spill] sm:$0xff] }
 0x8aa   :  { %v8243_v58 = vld [vmem:[#allocation10_spill] sm:$0xff]  ;;  %v8245_v19 = vld [vmem:[#allocation12_spill] sm:$0xff]  ;;  %v8248_v2 = vld [vmem:[#allocation45_spill] sm:$0xff] }
 0x8ab   :  { %v7536_v38 = vadd.f32 %v3059_v44, %v3058_v26  ;;  %v3047_v51 = vadd.f32 %v3969_v10, %v3046_v12  ;;  %v8231_v26 = vld [vmem:[#allocation38_spill] sm:$0xff]  ;;  %v8232_v44 = vld [vmem:[#allocation39_spill] sm:$0xff] }
 0x8ac   :  { %v8246_v12 = vld [vmem:[#allocation47_spill] sm:$0xff] }
 0x8ad   :  { %3972 = vtanh.f32 %v7536_v38  ;;  %v3051_v50 = vsel %vm3050_vm6, %v3969_v10, %v3047_v51  ;;  %v8234_v10 = vld [vmem:[#allocation6_spill] sm:$0xff]  ;;  %v8247_v51 = vld [vmem:[#allocation17_spill] sm:$0xff] }
 0x8ae   :  { %v3056_v14 = vsel %vm3053_vm7, %v3055_v40, %v3051_v50  ;;  %v8250_v50 = vld [vmem:[#allocation31_spill] sm:$0xff]  ;;  %v8251_v40 = vld [vmem:[#allocation30_spill] sm:$0xff] }
 0x8b3   :  { %v3973_v43 = vpop.eup %3972 }
 0x8b4   :  { %v3062_v48 = vmul.f32 %v3973_v43, %v3056_v14  ;;  %v8252_v43 = vld [vmem:[#allocation48_spill] sm:$0xff]  ;;  %v8253_v14 = vld [vmem:[#allocation49_spill] sm:$0xff] }
 0x8b6   :  { %3083 = vmatmul.f32.vlgmr.msra.gmra.mxu0 %v3062_v48  ;;  %3103 = vmatmul.f32.vlgmr.msra.gmra.mxu1 %v3062_v48 }
 0x8b7   :  { %3123 = vmatmul.f32.vlgmr.msra.gmra.mxu2 %v3062_v48  ;;  %3143 = vmatmul.f32.vlgmr.msra.gmra.mxu3 %v3062_v48  ;;  %v8254_v48 = vld [vmem:[#allocation21_spill] sm:$0xff] }
 0x8b8   :  { %3369 = vmatpush.msra.mxu0 %v7070_v30  ;;  %3389 = vmatpush.msra.mxu1 %v7076_v1 }
 0x8b9   :  { %3409 = vmatpush.msra.mxu2 %v7082_v34  ;;  %3429 = vmatpush.msra.mxu3 %v7088_v35 }
 0x8ba   :  { %3370 = vmatpush.msra.mxu0 %v7094_v3  ;;  %3390 = vmatpush.msra.mxu1 %v7100_v37 }
 0x8bb   :  { %3410 = vmatpush.msra.mxu2 %v7106_v20  ;;  %3430 = vmatpush.msra.mxu3 %v7112_v13 }
 0x8bc   :  { %3371 = vmatpush.msra.mxu0 %v7118_v56  ;;  %3391 = vmatpush.msra.mxu1 %v7124_v52 }
 0x8bd   :  { %3411 = vmatpush.msra.mxu2 %v7130_v15  ;;  %3431 = vmatpush.msra.mxu3 %v7136_v59 }
 0x8be   :  { %3372 = vmatpush.msra.mxu0 %v7142_v62  ;;  %3392 = vmatpush.msra.mxu1 %v7148_v29 }
 0x8bf   :  { %3412 = vmatpush.msra.mxu2 %v7154_v23  ;;  %3432 = vmatpush.msra.mxu3 %v7160_v39 }
 0x8c0   :  { %3373 = vmatpush.msra.mxu0 %v7166_v47  ;;  %3393 = vmatpush.msra.mxu1 %v7172_v8 }
 0x8c1   :  { %3413 = vmatpush.msra.mxu2 %v7178_v16  ;;  %3433 = vmatpush.msra.mxu3 %v7184_v54 }
 0x8c2   :  { %3374 = vmatpush.msra.mxu0 %v7190_v63  ;;  %3394 = vmatpush.msra.mxu1 %v7196_v0 }
 0x8c3   :  { %3414 = vmatpush.msra.mxu2 %v7202_v17  ;;  %3434 = vmatpush.msra.mxu3 %v7208_v31 }
 0x8c4   :  { %3375 = vmatpush.msra.mxu0 %v7214_v24  ;;  %3395 = vmatpush.msra.mxu1 %v7220_v27 }
 0x8c5   :  { %3415 = vmatpush.msra.mxu2 %v7226_v60  ;;  %3435 = vmatpush.msra.mxu3 %v7232_v61 }
 0x8c6   :  { %3376 = vmatpush.msra.mxu0 %v7238_v32  ;;  %3396 = vmatpush.msra.mxu1 %v7244_v55 }
 0x8c7   :  { %3416 = vmatpush.msra.mxu2 %v7250_v41  ;;  %3436 = vmatpush.msra.mxu3 %v7256_v46 }
 0x8c8   :  { %3377 = vmatpush.msra.mxu0 %v7262_v28  ;;  %3397 = vmatpush.msra.mxu1 %v7268_v7 }
 0x8c9   :  { %3417 = vmatpush.msra.mxu2 %v7274_v49  ;;  %3437 = vmatpush.msra.mxu3 %v7280_v57 }
 0x8ca   :  { %3378 = vmatpush.msra.mxu0 %v7286_v22  ;;  %3398 = vmatpush.msra.mxu1 %v7292_v53 }
 0x8cb   :  { %3418 = vmatpush.msra.mxu2 %v8230_v25  ;;  %3438 = vmatpush.msra.mxu3 %v8231_v26 }
 0x8cc   :  { %3379 = vmatpush.msra.mxu0 %v8232_v44  ;;  %3399 = vmatpush.msra.mxu1 %v8233_v21 }
 0x8cd   :  { %3419 = vmatpush.msra.mxu2 %v8234_v10  ;;  %3439 = vmatpush.msra.mxu3 %v8235_v6 }
 0x8ce   :  { %3380 = vmatpush.msra.mxu0 %v8236_v4  ;;  %3400 = vmatpush.msra.mxu1 %v8237_v42 }
 0x8cf   :  { %3420 = vmatpush.msra.mxu2 %v8238_v11  ;;  %3440 = vmatpush.msra.mxu3 %v8239_v18  ;;  %v8261_v11 = vld [vmem:[#allocation26_spill] sm:$0xff] }
 0x8d0   :  { %3381 = vmatpush.msra.mxu0 %v8240_v9  ;;  %3401 = vmatpush.msra.mxu1 %v8241_v45 }
 0x8d1   :  { %3421 = vmatpush.msra.mxu2 %v8242_v5  ;;  %3441 = vmatpush.msra.mxu3 %v8243_v58  ;;  %v8259_v5 = vld [vmem:[#allocation20_spill] sm:$0xff] }
 0x8d2   :  { %3382 = vmatpush.msra.mxu0 %v8244_v33  ;;  %3402 = vmatpush.msra.mxu1 %v8245_v19  ;;  %v8255_v33 = vld [vmem:[#allocation32_spill] sm:$0xff]  ;;  %v8256_v19 = vld [vmem:[#allocation55_spill] sm:$0xff] }
 0x8d3   :  { %3422 = vmatpush.msra.mxu2 %v8246_v12  ;;  %3442 = vmatpush.msra.mxu3 %v8247_v51  ;;  %v8257_v12 = vld [vmem:[#allocation19_spill] sm:$0xff]  ;;  %v8258_v51 = vld [vmem:[#allocation56_spill] sm:$0xff] }
 0x8d4   :  { %3383 = vmatpush.msra.mxu0 %v8248_v2  ;;  %3403 = vmatpush.msra.mxu1 %v8249_v36  ;;  %v2229_v58 = vadd.f32 %v8257_v12, %v8256_v19  ;;  %v2270_v2 = vadd.f32 %v8259_v5, %v8258_v51 }
 0x8d5   :  { %3423 = vmatpush.msra.mxu2 %v8250_v50  ;;  %3443 = vmatpush.msra.mxu3 %v8251_v40 }
 0x8d6   :  { %3384 = vmatpush.msra.mxu0 %v8252_v43  ;;  %3404 = vmatpush.msra.mxu1 %v8253_v14  ;;  %v8260_v43 = vld [vmem:[#allocation59_spill] sm:$0xff] }
 0x8d7   :  { %3424 = vmatpush.msra.mxu2 %v8254_v48  ;;  %3444 = vmatpush.msra.mxu3 %v8255_v33  ;;  %v2352_v14 = vadd.f32 %v8261_v11, %v8260_v43 }
 0x933   :  { %v3084_v45 = vpop.f32.mrf.mxu0  ;;  %v3104_v36 = vpop.f32.mrf.mxu1 }
 0x934   :  { %v3147_v9 = vadd.f32 %v3084_v45, %v2229_v58  ;;  %v3148_v50 = vadd.f32 %v3104_v36, %v2270_v2  ;;  %v8262_v58 = vld [vmem:[#allocation61_spill] sm:$0xff] }
 0x936   :  { %v3762_v18 = vmul.f32 -1.442695, %v3147_v9  ;;  %v3763_v40 = vmul.f32 -1.442695, %v3148_v50  ;;  %v8263_v9 = vld [vmem:[#allocation35_spill] sm:$0xff] }
 0x937   :  { %v2311_v2 = vadd.f32 %v8263_v9, %v8262_v58 }
 0x938   :  { %3974 = vpow2.f32 %v3762_v18 }
 0x939   :  { %3976 = vpow2.f32 %v3763_v40 }
 0x93a   :  { %v3144_v48 = vpop.f32.mrf.mxu3  ;;  %v3124_v5 = vpop.f32.mrf.mxu2 }
 0x93b   :  { %v3150_v42 = vadd.f32 %v3144_v48, %v2352_v14  ;;  %v3149_v50 = vadd.f32 %v3124_v5, %v2311_v2 }
 0x93d   :  { %v3764_v33 = vmul.f32 -1.442695, %v3150_v42 }
 0x93e   :  { %v3975_v4 = vpop.eup %3974 }
 0x93f   :  { %v3977_v6 = vpop.eup %3976  ;;  %v3154_v12 = vadd.f32 1.0, %v3975_v4  ;;  %3978 = vpow2.f32 %v3764_v33 }
 0x940   :  { %v3173_v19 = vadd.f32 1.0, %v3977_v6 }
 0x941   :  { %3980 = vrcp.f32 %v3154_v12  ;;  %v3166_v43 = vand.u32 2147483648, %v3154_v12  ;;  %v3164_v33 = vand.u32 2147483647, %v3154_v12  ;;  %vm3160_vm10 = vweird.f32 %v3154_v12 }
 0x942   :  { %3982 = vrcp.f32 %v3173_v19  ;;  %v3185_v4 = vand.u32 2147483648, %v3173_v19  ;;  %v3183_v10 = vand.u32 2147483647, %v3173_v19  ;;  %vm3179_vm11 = vweird.f32 %v3173_v19 }
 0x943   :  { %v3167_v5 = vor.u32 1.1754944e-38, %v3166_v43  ;;  %vm3165_vm14 = vcmp.eq.f32.partialorder %v3164_v33, 8.507059e+37 }
 0x944   :  { %vm3184_vm15 = vcmp.eq.f32.partialorder %v3183_v10, 8.507059e+37 }
 0x945   :  { %v3979_v45 = vpop.eup %3978 }
 0x946   :  { %v3193_v18 = vadd.f32 1.0, %v3979_v45 }
 0x947   :  { %v3981_v36 = vpop.eup %3980 }
 0x948   :  { %v3983_v11 = vpop.eup %3982  ;;  %v3156_v40 = vmul.f32 %v3981_v36, %v3154_v12  ;;  %3984 = vrcp.f32 %v3193_v18  ;;  %vm3161_vm8 = vweird.f32 %v3981_v36  ;;  %vm3199_vm1 = vweird.f32 %v3193_v18 }
 0x949   :  { %v3175_v14 = vmul.f32 %v3983_v11, %v3173_v19  ;;  %3986 = vtanh.f32 %v3149_v50  ;;  %vm3180_vm9 = vweird.f32 %v3983_v11  ;;  %vm3162_vm12 = vmor %vm3160_vm10, %vm3161_vm8  ;;  %v3203_v43 = vand.u32 2147483647, %v3193_v18 }
 0x94a   :  { %v3157_v42 = vsub.f32 1.0, %v3156_v40  ;;  %vm3181_vm13 = vmor %vm3179_vm11, %vm3180_vm9  ;;  %v3186_v40 = vor.u32 1.1754944e-38, %v3185_v4 }
 0x94b   :  { %v3176_v48 = vsub.f32 1.0, %v3175_v14  ;;  %vm3204_vm3 = vcmp.eq.f32.partialorder %v3203_v43, 8.507059e+37 }
 0x94c   :  { %v3158_v6 = vmul.f32 %v3981_v36, %v3157_v42 }
 0x94d   :  { %v3177_v51 = vmul.f32 %v3983_v11, %v3176_v48 }
 0x94e   :  { %v3985_v21 = vpop.eup %3984  ;;  %v3159_v9 = vadd.f32 %v3981_v36, %v3158_v6 }
 0x94f   :  { %v3178_v45 = vadd.f32 %v3983_v11, %v3177_v51  ;;  %v3195_v2 = vmul.f32 %v3985_v21, %v3193_v18  ;;  %v3987_v50 = vpop.eup %3986  ;;  %vm3200_vm0 = vweird.f32 %v3985_v21  ;;  %v3205_v51 = vand.u32 2147483648, %v3193_v18 }
 0x950   :  { %v3163_v14 = vsel %vm3162_vm12, %v3981_v36, %v3159_v9  ;;  %vm3201_vm2 = vmor %vm3199_vm1, %vm3200_vm0 }
 0x951   :  { %v3168_v58 = vsel %vm3165_vm14, %v3167_v5, %v3163_v14  ;;  %v3182_v42 = vsel %vm3181_vm13, %v3983_v11, %v3178_v45  ;;  %v3196_v44 = vsub.f32 1.0, %v3195_v2  ;;  %v3206_v4 = vor.u32 1.1754944e-38, %v3205_v51  ;;  %v8296_v14 = vld [vmem:[#allocation61_spill] sm:$0xff] }
 0x952   :  { %v3187_v48 = vsel %vm3184_vm15, %v3186_v40, %v3182_v42  ;;  %v3210_v26 = vmul.f32 %v3987_v50, %v3168_v58  ;;  %v8297_v50 = vld [vmem:[#allocation51_spill] sm:$0xff] }
 0x953   :  { %v3209_v25 = vmul.f32 %v3187_v48, %v7536_v38  ;;  %v3197_v6 = vmul.f32 %v3985_v21, %v3196_v44  ;;  %v8294_v38 = vld [vmem:[#allocation59_spill] sm:$0xff]  ;;  %v2314_v42 = vadd.f32 %v8297_v50, %v8296_v14 }
 0x955   :  { %v7612_v12 = vadd.f32 %v3210_v26, %v3209_v25  ;;  %v3198_v19 = vadd.f32 %v3985_v21, %v3197_v6  ;;  %v8295_v25 = vld [vmem:[#allocation36_spill] sm:$0xff] }
 0x956   :  { %v2355_v26 = vadd.f32 %v8295_v25, %v8294_v38 }
 0x957   :  { %3988 = vtanh.f32 %v7612_v12  ;;  %v3202_v36 = vsel %vm3201_vm2, %v3985_v21, %v3198_v19 }
 0x958   :  { %v3207_v11 = vsel %vm3204_vm3, %v3206_v4, %v3202_v36 }
 0x95d   :  { %v3989_v10 = vpop.eup %3988 }
 0x95e   :  { %v3213_v33 = vmul.f32 %v3989_v10, %v3207_v11 }
 0x960   :  { %3234 = vmatmul.f32.vlgmr.msrb.gmra.mxu0 %v3213_v33  ;;  %3254 = vmatmul.f32.vlgmr.msrb.gmra.mxu1 %v3213_v33 }
 0x961   :  { %3274 = vmatmul.f32.vlgmr.msrb.gmra.mxu2 %v3213_v33  ;;  %3294 = vmatmul.f32.vlgmr.msrb.gmra.mxu3 %v3213_v33 }
 0x962   :  { %3520 = vmatpush.msrb.mxu0 %v7070_v30  ;;  %3540 = vmatpush.msrb.mxu1 %v7076_v1  ;;  %v8264_v30 = vld [vmem:[#allocation7_spill] sm:$0xff]  ;;  %v8265_v1 = vld [vmem:[#allocation38_spill] sm:$0xff] }
 0x963   :  { %3560 = vmatpush.msrb.mxu2 %v7082_v34  ;;  %3580 = vmatpush.msrb.mxu3 %v7088_v35  ;;  %v8266_v34 = vld [vmem:[#allocation39_spill] sm:$0xff]  ;;  %v8267_v35 = vld [vmem:[#allocation40_spill] sm:$0xff] }
 0x964   :  { %3521 = vmatpush.msrb.mxu0 %v7094_v3  ;;  %3541 = vmatpush.msrb.mxu1 %v7100_v37  ;;  %v8268_v3 = vld [vmem:[#allocation6_spill] sm:$0xff]  ;;  %v8269_v37 = vld [vmem:[#allocation41_spill] sm:$0xff] }
 0x965   :  { %3561 = vmatpush.msrb.mxu2 %v7106_v20  ;;  %3581 = vmatpush.msrb.mxu3 %v7112_v13  ;;  %v8270_v20 = vld [vmem:[#allocation4_spill] sm:$0xff]  ;;  %v8271_v13 = vld [vmem:[#allocation5_spill] sm:$0xff] }
 0x966   :  { %3522 = vmatpush.msrb.mxu0 %v7118_v56  ;;  %3542 = vmatpush.msrb.mxu1 %v7124_v52  ;;  %v8272_v56 = vld [vmem:[#allocation13_spill] sm:$0xff]  ;;  %v8273_v52 = vld [vmem:[#allocation27_spill] sm:$0xff] }
 0x967   :  { %3562 = vmatpush.msrb.mxu2 %v7130_v15  ;;  %3582 = vmatpush.msrb.mxu3 %v7136_v59  ;;  %v8274_v15 = vld [vmem:[#allocation8_spill] sm:$0xff]  ;;  %v8275_v59 = vld [vmem:[#allocation9_spill] sm:$0xff] }
 0x968   :  { %3523 = vmatpush.msrb.mxu0 %v7142_v62  ;;  %3543 = vmatpush.msrb.mxu1 %v7148_v29  ;;  %v8276_v62 = vld [vmem:[#allocation14_spill] sm:$0xff] }
 0x969   :  { %3563 = vmatpush.msrb.mxu2 %v7154_v23  ;;  %3583 = vmatpush.msrb.mxu3 %v7160_v39  ;;  %v8277_v29 = vld [vmem:[#allocation10_spill] sm:$0xff]  ;;  %v8278_v23 = vld [vmem:[#allocation11_spill] sm:$0xff]  ;;  %v8279_v39 = vld [vmem:[#allocation12_spill] sm:$0xff] }
 0x96a   :  { %3524 = vmatpush.msrb.mxu0 %v7166_v47  ;;  %3544 = vmatpush.msrb.mxu1 %v7172_v8  ;;  %v8280_v47 = vld [vmem:[#allocation47_spill] sm:$0xff]  ;;  %v8281_v8 = vld [vmem:[#allocation17_spill] sm:$0xff] }
 0x96b   :  { %3564 = vmatpush.msrb.mxu2 %v7178_v16  ;;  %3584 = vmatpush.msrb.mxu3 %v7184_v54  ;;  %v8282_v16 = vld [vmem:[#allocation45_spill] sm:$0xff]  ;;  %v8283_v54 = vld [vmem:[#allocation46_spill] sm:$0xff] }
 0x96c   :  { %3525 = vmatpush.msrb.mxu0 %v7190_v63  ;;  %3545 = vmatpush.msrb.mxu1 %v7196_v0  ;;  %v8284_v63 = vld [vmem:[#allocation31_spill] sm:$0xff]  ;;  %v8285_v0 = vld [vmem:[#allocation30_spill] sm:$0xff] }
 0x96d   :  { %3565 = vmatpush.msrb.mxu2 %v7202_v17  ;;  %3585 = vmatpush.msrb.mxu3 %v7208_v31  ;;  %v8286_v17 = vld [vmem:[#allocation48_spill] sm:$0xff]  ;;  %v8287_v31 = vld [vmem:[#allocation49_spill] sm:$0xff] }
 0x96e   :  { %3526 = vmatpush.msrb.mxu0 %v7214_v24  ;;  %3546 = vmatpush.msrb.mxu1 %v7220_v27  ;;  %v8288_v24 = vld [vmem:[#allocation21_spill] sm:$0xff]  ;;  %v8289_v27 = vld [vmem:[#allocation32_spill] sm:$0xff] }
 0x96f   :  { %3566 = vmatpush.msrb.mxu2 %v7226_v60  ;;  %3586 = vmatpush.msrb.mxu3 %v7232_v61  ;;  %v8290_v60 = vld [vmem:[#allocation55_spill] sm:$0xff]  ;;  %v8291_v61 = vld [vmem:[#allocation34_spill] sm:$0xff] }
 0x970   :  { %3527 = vmatpush.msrb.mxu0 %v7238_v32  ;;  %3547 = vmatpush.msrb.mxu1 %v7244_v55  ;;  %v2232_v32 = vadd.f32 %v8291_v61, %v8290_v60  ;;  %v8292_v55 = vld [vmem:[#allocation56_spill] sm:$0xff] }
 0x971   :  { %3567 = vmatpush.msrb.mxu2 %v7250_v41  ;;  %3587 = vmatpush.msrb.mxu3 %v7256_v46  ;;  %v8293_v41 = vld [vmem:[#allocation33_spill] sm:$0xff] }
 0x972   :  { %3528 = vmatpush.msrb.mxu0 %v7262_v28  ;;  %3548 = vmatpush.msrb.mxu1 %v7268_v7  ;;  %v2273_v46 = vadd.f32 %v8293_v41, %v8292_v55 }
 0x973   :  { %3568 = vmatpush.msrb.mxu2 %v7274_v49  ;;  %3588 = vmatpush.msrb.mxu3 %v7280_v57 }
 0x974   :  { %3529 = vmatpush.msrb.mxu0 %v7286_v22  ;;  %3549 = vmatpush.msrb.mxu1 %v7292_v53 }
 0x975   :  { %3569 = vmatpush.msrb.mxu2 %v8264_v30  ;;  %3589 = vmatpush.msrb.mxu3 %v8265_v1 }
 0x976   :  { %3530 = vmatpush.msrb.mxu0 %v8266_v34  ;;  %3550 = vmatpush.msrb.mxu1 %v8267_v35 }
 0x977   :  { %3570 = vmatpush.msrb.mxu2 %v8268_v3  ;;  %3590 = vmatpush.msrb.mxu3 %v8269_v37 }
 0x978   :  { %3531 = vmatpush.msrb.mxu0 %v8270_v20  ;;  %3551 = vmatpush.msrb.mxu1 %v8271_v13 }
 0x979   :  { %3571 = vmatpush.msrb.mxu2 %v8272_v56  ;;  %3591 = vmatpush.msrb.mxu3 %v8273_v52 }
 0x97a   :  { %3532 = vmatpush.msrb.mxu0 %v8274_v15  ;;  %3552 = vmatpush.msrb.mxu1 %v8275_v59 }
 0x97b   :  { %3572 = vmatpush.msrb.mxu2 %v8276_v62  ;;  %3592 = vmatpush.msrb.mxu3 %v8277_v29 }
 0x97c   :  { %3533 = vmatpush.msrb.mxu0 %v8278_v23  ;;  %3553 = vmatpush.msrb.mxu1 %v8279_v39 }
 0x97d   :  { %3573 = vmatpush.msrb.mxu2 %v8280_v47  ;;  %3593 = vmatpush.msrb.mxu3 %v8281_v8 }
 0x97e   :  { %3534 = vmatpush.msrb.mxu0 %v8282_v16  ;;  %3554 = vmatpush.msrb.mxu1 %v8283_v54 }
 0x97f   :  { %3574 = vmatpush.msrb.mxu2 %v8284_v63  ;;  %3594 = vmatpush.msrb.mxu3 %v8285_v0 }
 0x980   :  { %3535 = vmatpush.msrb.mxu0 %v8286_v17  ;;  %3555 = vmatpush.msrb.mxu1 %v8287_v31 }
 0x981   :  { %3575 = vmatpush.msrb.mxu2 %v8288_v24  ;;  %3595 = vmatpush.msrb.mxu3 %v8289_v27 }
 0x9dd   :  { %v3235_v28 = vpop.f32.mrf.mxu0  ;;  %v3255_v7 = vpop.f32.mrf.mxu1 }
 0x9de   :  { %v3298_v49 = vadd.f32 %v3235_v28, %v2232_v32  ;;  %v3299_v57 = vadd.f32 %v3255_v7, %v2273_v46  ;;  %v8299_v46 = vld [vmem:[#allocation50_spill] sm:$0xff] }
 0x9df   :  { %v2276_v28 = vadd.f32 %v8299_v46, %v8292_v55 }
 0x9e0   :  { %v3765_v22 = vmul.f32 -1.442695, %v3298_v49  ;;  %v3766_v53 = vmul.f32 -1.442695, %v3299_v57 }
 0x9e2   :  { %3990 = vpow2.f32 %v3765_v22 }
 0x9e3   :  { %3992 = vpow2.f32 %v3766_v53 }
 0x9e4   :  { %v3295_v44 = vpop.f32.mrf.mxu3  ;;  %v3275_v2 = vpop.f32.mrf.mxu2 }
 0x9e5   :  { %v3301_v21 = vadd.f32 %v3295_v44, %v2355_v26  ;;  %v3300_v19 = vadd.f32 %v3275_v2, %v2314_v42  ;;  %v8300_v26 = vld [vmem:[#allocation52_spill] sm:$0xff]  ;;  %v8301_v42 = vld [vmem:[#allocation57_spill] sm:$0xff] }
 0x9e6   :  { %v2358_v44 = vadd.f32 %v8300_v26, %v8294_v38 }
 0x9e7   :  { %v3767_v58 = vmul.f32 -1.442695, %v3301_v21 }
 0x9e8   :  { %v3991_v18 = vpop.eup %3990 }
 0x9e9   :  { %v3993_v9 = vpop.eup %3992  ;;  %v3305_v5 = vadd.f32 1.0, %v3991_v18  ;;  %3994 = vpow2.f32 %v3767_v58 }
 0x9ea   :  { %v3324_v45 = vadd.f32 1.0, %v3993_v9 }
 0x9eb   :  { %3996 = vrcp.f32 %v3305_v5  ;;  %v3317_v11 = vand.u32 2147483648, %v3305_v5  ;;  %v3315_v1 = vand.u32 2147483647, %v3305_v5  ;;  %vm3311_vm6 = vweird.f32 %v3305_v5 }
 0x9ec   :  { %3998 = vrcp.f32 %v3324_v45  ;;  %v3336_v33 = vand.u32 2147483648, %v3324_v45  ;;  %v3334_v35 = vand.u32 2147483647, %v3324_v45  ;;  %vm3330_vm7 = vweird.f32 %v3324_v45 }
 0x9ed   :  { %v3318_v20 = vor.u32 1.1754944e-38, %v3317_v11  ;;  %vm3316_vm10 = vcmp.eq.f32.partialorder %v3315_v1, 8.507059e+37 }
 0x9ee   :  { %v3337_v52 = vor.u32 1.1754944e-38, %v3336_v33  ;;  %vm3335_vm11 = vcmp.eq.f32.partialorder %v3334_v35, 8.507059e+37 }
 0x9ef   :  { %v3995_v40 = vpop.eup %3994 }
 0x9f0   :  { %v3344_v48 = vadd.f32 1.0, %v3995_v40 }
 0x9f1   :  { %v3997_v6 = vpop.eup %3996 }
 0x9f2   :  { %v3999_v51 = vpop.eup %3998  ;;  %v3307_v43 = vmul.f32 %v3997_v6, %v3305_v5  ;;  %4000 = vrcp.f32 %v3344_v48  ;;  %vm3312_vm4 = vweird.f32 %v3997_v6  ;;  %v3356_v0 = vand.u32 2147483648, %v3344_v48 }
 0x9f3   :  { %v3326_v36 = vmul.f32 %v3999_v51, %v3324_v45  ;;  %4002 = vtanh.f32 %v3300_v19  ;;  %vm3331_vm5 = vweird.f32 %v3999_v51  ;;  %vm3313_vm8 = vmor %vm3311_vm6, %vm3312_vm4  ;;  %vm3350_vm13 = vweird.f32 %v3344_v48 }
 0x9f4   :  { %v3308_v4 = vsub.f32 1.0, %v3307_v43  ;;  %vm3332_vm9 = vmor %vm3330_vm7, %vm3331_vm5  ;;  %v3354_v17 = vand.u32 2147483647, %v3344_v48  ;;  %v3357_v24 = vor.u32 1.1754944e-38, %v3356_v0 }
 0x9f5   :  { %v3327_v10 = vsub.f32 1.0, %v3326_v36 }
 0x9f6   :  { %v3309_v30 = vmul.f32 %v3997_v6, %v3308_v4  ;;  %vm3355_vm15 = vcmp.eq.f32.partialorder %v3354_v17, 8.507059e+37 }
 0x9f7   :  { %v3328_v34 = vmul.f32 %v3999_v51, %v3327_v10 }
 0x9f8   :  { %v4001_v3 = vpop.eup %4000  ;;  %v3310_v37 = vadd.f32 %v3997_v6, %v3309_v30 }
 0x9f9   :  { %v3329_v13 = vadd.f32 %v3999_v51, %v3328_v34  ;;  %v3346_v56 = vmul.f32 %v4001_v3, %v3344_v48  ;;  %v4003_v59 = vpop.eup %4002  ;;  %vm3351_vm12 = vweird.f32 %v4001_v3  ;;  %v2317_v48 = vadd.f32 %v8301_v42, %v8296_v14 }
 0x9fa   :  { %v3314_v15 = vsel %vm3313_vm8, %v3997_v6, %v3310_v37  ;;  %vm3352_vm14 = vmor %vm3350_vm13, %vm3351_vm12 }
 0x9fb   :  { %v3319_v62 = vsel %vm3316_vm10, %v3318_v20, %v3314_v15  ;;  %v3333_v29 = vsel %vm3332_vm9, %v3999_v51, %v3329_v13  ;;  %v3347_v23 = vsub.f32 1.0, %v3346_v56 }
 0x9fc   :  { %v3338_v39 = vsel %vm3335_vm11, %v3337_v52, %v3333_v29  ;;  %v3361_v47 = vmul.f32 %v4003_v59, %v3319_v62 }
 0x9fd   :  { %v3360_v8 = vmul.f32 %v3338_v39, %v7612_v12  ;;  %v3348_v16 = vmul.f32 %v4001_v3, %v3347_v23  ;;  %v8298_v12 = vld [vmem:[#allocation37_spill] sm:$0xff] }
 0x9fe   :  { %v2235_v41 = vadd.f32 %v8298_v12, %v8290_v60 }
 0x9ff   :  { %v7688_v54 = vadd.f32 %v3361_v47, %v3360_v8  ;;  %v3349_v63 = vadd.f32 %v4001_v3, %v3348_v16 }
 0xa01   :  { %4004 = vtanh.f32 %v7688_v54  ;;  %v3353_v31 = vsel %vm3352_vm14, %v4001_v3, %v3349_v63 }
 0xa02   :  { %v3358_v61 = vsel %vm3355_vm15, %v3357_v24, %v3353_v31 }
 0xa07   :  { %v4005_v27 = vpop.eup %4004 }
 0xa08   :  { %v3364_v32 = vmul.f32 %v4005_v27, %v3358_v61 }
 0xa0a   :  { %3385 = vmatmul.f32.vlgmr.msra.gmra.mxu0 %v3364_v32  ;;  %3405 = vmatmul.f32.vlgmr.msra.gmra.mxu1 %v3364_v32 }
 0xa0b   :  { %3425 = vmatmul.f32.vlgmr.msra.gmra.mxu2 %v3364_v32  ;;  %3445 = vmatmul.f32.vlgmr.msra.gmra.mxu3 %v3364_v32 }
 0xa87   :  { %v3386_v7 = vpop.f32.mrf.mxu0  ;;  %v3406_v49 = vpop.f32.mrf.mxu1 }
 0xa88   :  { %v3449_v57 = vadd.f32 %v3386_v7, %v2235_v41  ;;  %v3450_v22 = vadd.f32 %v3406_v49, %v2276_v28  ;;  %v8303_v28 = vld [vmem:[#allocation54_spill] sm:$0xff] }
 0xa89   :  { %v2279_v7 = vadd.f32 %v8303_v28, %v8292_v55 }
 0xa8a   :  { %v3768_v53 = vmul.f32 -1.442695, %v3449_v57  ;;  %v3769_v25 = vmul.f32 -1.442695, %v3450_v22 }
 0xa8c   :  { %4006 = vpow2.f32 %v3768_v53 }
 0xa8d   :  { %4008 = vpow2.f32 %v3769_v25 }
 0xa8e   :  { %v3446_v21 = vpop.f32.mrf.mxu3  ;;  %v3426_v40 = vpop.f32.mrf.mxu2 }
 0xa8f   :  { %v3452_v58 = vadd.f32 %v3446_v21, %v2358_v44  ;;  %v3451_v51 = vadd.f32 %v3426_v40, %v2317_v48  ;;  %v8304_v44 = vld [vmem:[#allocation58_spill] sm:$0xff] }
 0xa90   :  { %v2361_v21 = vadd.f32 %v8304_v44, %v8294_v38 }
 0xa91   :  { %v3770_v18 = vmul.f32 -1.442695, %v3452_v58 }
 0xa92   :  { %v4007_v9 = vpop.eup %4006 }
 0xa93   :  { %v4009_v5 = vpop.eup %4008  ;;  %v3456_v45 = vadd.f32 1.0, %v4007_v9  ;;  %4010 = vpow2.f32 %v3770_v18 }
 0xa94   :  { %v3475_v2 = vadd.f32 1.0, %v4009_v5 }
 0xa95   :  { %4012 = vrcp.f32 %v3456_v45  ;;  %v3468_v33 = vand.u32 2147483648, %v3456_v45  ;;  %v3466_v34 = vand.u32 2147483647, %v3456_v45  ;;  %vm3462_vm2 = vweird.f32 %v3456_v45 }
 0xa96   :  { %4014 = vrcp.f32 %v3475_v2  ;;  %v3487_v30 = vand.u32 2147483648, %v3475_v2  ;;  %v3485_v3 = vand.u32 2147483647, %v3475_v2  ;;  %vm3481_vm3 = vweird.f32 %v3475_v2 }
 0xa97   :  { %v3469_v13 = vor.u32 1.1754944e-38, %v3468_v33  ;;  %vm3467_vm6 = vcmp.eq.f32.partialorder %v3466_v34, 8.507059e+37 }
 0xa98   :  { %v3488_v15 = vor.u32 1.1754944e-38, %v3487_v30  ;;  %vm3486_vm7 = vcmp.eq.f32.partialorder %v3485_v3, 8.507059e+37 }
 0xa99   :  { %v4011_v50 = vpop.eup %4010 }
 0xa9a   :  { %v3495_v6 = vadd.f32 1.0, %v4011_v50  ;;  %v8305_v50 = vld [vmem:[#allocation60_spill] sm:$0xff] }
 0xa9b   :  { %v4013_v19 = vpop.eup %4012  ;;  %v2320_v42 = vadd.f32 %v8305_v50, %v8296_v14 }
 0xa9c   :  { %v4015_v43 = vpop.eup %4014  ;;  %v3458_v36 = vmul.f32 %v4013_v19, %v3456_v45  ;;  %4016 = vrcp.f32 %v3495_v6  ;;  %vm3463_vm0 = vweird.f32 %v4013_v19  ;;  %v3507_v31 = vand.u32 2147483648, %v3495_v6 }
 0xa9d   :  { %v3477_v4 = vmul.f32 %v4015_v43, %v3475_v2  ;;  %4018 = vtanh.f32 %v3451_v51  ;;  %vm3482_vm1 = vweird.f32 %v4015_v43  ;;  %vm3464_vm4 = vmor %vm3462_vm2, %vm3463_vm0  ;;  %vm3501_vm9 = vweird.f32 %v3495_v6 }
 0xa9e   :  { %v3459_v10 = vsub.f32 1.0, %v3458_v36  ;;  %vm3483_vm5 = vmor %vm3481_vm3, %vm3482_vm1  ;;  %v3505_v24 = vand.u32 2147483647, %v3495_v6  ;;  %v3508_v61 = vor.u32 1.1754944e-38, %v3507_v31 }
 0xa9f   :  { %v3478_v11 = vsub.f32 1.0, %v3477_v4 }
 0xaa0   :  { %v3460_v1 = vmul.f32 %v4013_v19, %v3459_v10  ;;  %vm3506_vm11 = vcmp.eq.f32.partialorder %v3505_v24, 8.507059e+37 }
 0xaa1   :  { %v3479_v35 = vmul.f32 %v4015_v43, %v3478_v11 }
 0xaa2   :  { %v4017_v37 = vpop.eup %4016  ;;  %v3461_v20 = vadd.f32 %v4013_v19, %v3460_v1 }
 0xaa3   :  { %v3480_v56 = vadd.f32 %v4015_v43, %v3479_v35  ;;  %v3497_v52 = vmul.f32 %v4017_v37, %v3495_v6  ;;  %v4019_v62 = vpop.eup %4018  ;;  %vm3502_vm8 = vweird.f32 %v4017_v37 }
 0xaa4   :  { %v3465_v59 = vsel %vm3464_vm4, %v4013_v19, %v3461_v20  ;;  %vm3503_vm10 = vmor %vm3501_vm9, %vm3502_vm8 }
 0xaa5   :  { %v3470_v29 = vsel %vm3467_vm6, %v3469_v13, %v3465_v59  ;;  %v3484_v23 = vsel %vm3483_vm5, %v4015_v43, %v3480_v56  ;;  %v3498_v39 = vsub.f32 1.0, %v3497_v52 }
 0xaa6   :  { %v3489_v47 = vsel %vm3486_vm7, %v3488_v15, %v3484_v23  ;;  %v3512_v8 = vmul.f32 %v4019_v62, %v3470_v29 }
 0xaa7   :  { %v3511_v16 = vmul.f32 %v3489_v47, %v7688_v54  ;;  %v3499_v63 = vmul.f32 %v4017_v37, %v3498_v39  ;;  %v8302_v54 = vld [vmem:[#allocation53_spill] sm:$0xff] }
 0xaa8   :  { %v2238_v46 = vadd.f32 %v8302_v54, %v8290_v60 }
 0xaa9   :  { %v7700_v0 = vadd.f32 %v3512_v8, %v3511_v16  ;;  %v3500_v17 = vadd.f32 %v4017_v37, %v3499_v63 }
 0xaab   :  { %4020 = vtanh.f32 %v7700_v0  ;;  %v3504_v27 = vsel %vm3503_vm10, %v4017_v37, %v3500_v17 }
 0xaac   :  { %v3509_v12 = vsel %vm3506_vm11, %v3508_v61, %v3504_v27 }
 0xab1   :  { %v4021_v32 = vpop.eup %4020 }
 0xab2   :  { %v3515_v41 = vmul.f32 %v4021_v32, %v3509_v12 }
 0xab4   :  { %3536 = vmatmul.f32.vlgmr.msrb.gmra.mxu0 %v3515_v41  ;;  %3556 = vmatmul.f32.vlgmr.msrb.gmra.mxu1 %v3515_v41 }
 0xab5   :  { %3576 = vmatmul.f32.vlgmr.msrb.gmra.mxu2 %v3515_v41  ;;  %3596 = vmatmul.f32.vlgmr.msrb.gmra.mxu3 %v3515_v41 }
 0xb31   :  { %v3537_v49 = vpop.f32.mrf.mxu0  ;;  %v3557_v57 = vpop.f32.mrf.mxu1 }
 0xb32   :  { %v3600_v22 = vadd.f32 %v3537_v49, %v2238_v46  ;;  %v3601_v53 = vadd.f32 %v3557_v57, %v2279_v7 }
 0xb34   :  { %v3771_v25 = vmul.f32 -1.442695, %v3600_v22  ;;  %v3772_v26 = vmul.f32 -1.442695, %v3601_v53 }
 0xb36   :  { %4022 = vpow2.f32 %v3771_v25 }
 0xb37   :  { %4024 = vpow2.f32 %v3772_v26 }
 0xb38   :  { %v3597_v58 = vpop.f32.mrf.mxu3  ;;  %v3577_v55 = vpop.f32.mrf.mxu2 }
 0xb39   :  { %v3603_v18 = vadd.f32 %v3597_v58, %v2361_v21  ;;  %v3602_v19 = vadd.f32 %v3577_v55, %v2320_v42 }
 0xb3b   :  { %v3773_v9 = vmul.f32 -1.442695, %v3603_v18 }
 0xb3c   :  { %v4023_v5 = vpop.eup %4022 }
 0xb3d   :  { %v4025_v45 = vpop.eup %4024  ;;  %v3607_v60 = vadd.f32 1.0, %v4023_v5  ;;  %4026 = vpow2.f32 %v3773_v9 }
 0xb3e   :  { %v3626_v2 = vadd.f32 1.0, %v4025_v45 }
 0xb3f   :  { %4028 = vrcp.f32 %v3607_v60  ;;  %v3619_v10 = vand.u32 2147483648, %v3607_v60  ;;  %v3617_v30 = vand.u32 2147483647, %v3607_v60  ;;  %vm3613_vm14 = vweird.f32 %v3607_v60 }
 0xb40   :  { %4030 = vrcp.f32 %v3626_v2  ;;  %v3638_v11 = vand.u32 2147483648, %v3626_v2  ;;  %v3636_v34 = vand.u32 2147483647, %v3626_v2  ;;  %vm3632_vm15 = vweird.f32 %v3626_v2 }
 0xb41   :  { %v3620_v3 = vor.u32 1.1754944e-38, %v3619_v10  ;;  %vm3618_vm2 = vcmp.eq.f32.partialorder %v3617_v30, 8.507059e+37 }
 0xb42   :  { %v3639_v13 = vor.u32 1.1754944e-38, %v3638_v11  ;;  %vm3637_vm3 = vcmp.eq.f32.partialorder %v3636_v34, 8.507059e+37 }
 0xb43   :  { %v4027_v40 = vpop.eup %4026 }
 0xb44   :  { %v3646_v48 = vadd.f32 1.0, %v4027_v40 }
 0xb45   :  { %v4029_v6 = vpop.eup %4028 }
 0xb46   :  { %v4031_v38 = vpop.eup %4030  ;;  %v3609_v51 = vmul.f32 %v4029_v6, %v3607_v60  ;;  %4032 = vrcp.f32 %v3646_v48  ;;  %vm3614_vm12 = vweird.f32 %v4029_v6  ;;  %v3658_v63 = vand.u32 2147483648, %v3646_v48 }
 0xb47   :  { %v3628_v43 = vmul.f32 %v4031_v38, %v3626_v2  ;;  %4034 = vtanh.f32 %v3602_v19  ;;  %vm3633_vm13 = vweird.f32 %v4031_v38  ;;  %vm3615_vm0 = vmor %vm3613_vm14, %vm3614_vm12  ;;  %vm3652_vm5 = vweird.f32 %v3646_v48 }
 0xb48   :  { %v3610_v36 = vsub.f32 1.0, %v3609_v51  ;;  %vm3634_vm1 = vmor %vm3632_vm15, %vm3633_vm13  ;;  %v3656_v17 = vand.u32 2147483647, %v3646_v48  ;;  %v3659_v24 = vor.u32 1.1754944e-38, %v3658_v63 }
 0xb49   :  { %v3629_v4 = vsub.f32 1.0, %v3628_v43 }
 0xb4a   :  { %v3611_v33 = vmul.f32 %v4029_v6, %v3610_v36  ;;  %vm3657_vm7 = vcmp.eq.f32.partialorder %v3656_v17, 8.507059e+37 }
 0xb4b   :  { %v3630_v1 = vmul.f32 %v4031_v38, %v3629_v4 }
 0xb4c   :  { %v4033_v35 = vpop.eup %4032  ;;  %v3612_v14 = vadd.f32 %v4029_v6, %v3611_v33 }
 0xb4d   :  { %v3631_v37 = vadd.f32 %v4031_v38, %v3630_v1  ;;  %v3648_v20 = vmul.f32 %v4033_v35, %v3646_v48  ;;  %v4035_v52 = vpop.eup %4034  ;;  %vm3653_vm4 = vweird.f32 %v4033_v35 }
 0xb4e   :  { %v3616_v56 = vsel %vm3615_vm0, %v4029_v6, %v3612_v14  ;;  %vm3654_vm6 = vmor %vm3652_vm5, %vm3653_vm4 }
 0xb4f   :  { %v3621_v15 = vsel %vm3618_vm2, %v3620_v3, %v3616_v56  ;;  %v3635_v59 = vsel %vm3634_vm1, %v4031_v38, %v3631_v37  ;;  %v3649_v62 = vsub.f32 1.0, %v3648_v20 }
 0xb50   :  { %v3640_v29 = vsel %vm3637_vm3, %v3639_v13, %v3635_v59  ;;  %v3663_v23 = vmul.f32 %v4035_v52, %v3621_v15 }
 0xb51   :  { %v3662_v39 = vmul.f32 %v3640_v29, %v7700_v0  ;;  %v3650_v47 = vmul.f32 %v4033_v35, %v3649_v62 }
 0xb53   :  { %v3664_v8 = vadd.f32 %v3663_v23, %v3662_v39  ;;  %v3651_v16 = vadd.f32 %v4033_v35, %v3650_v47 }
 0xb55   :  { %4036 = vtanh.f32 %v3664_v8  ;;  %3775 = vst [vmem:[%s7724_s8 + $0x8] sm:$0xff] %v3664_v8  ;;  %v3655_v31 = vsel %vm3654_vm6, %v4033_v35, %v3651_v16 }
 0xb56   :  { %v3660_v61 = vsel %vm3657_vm7, %v3659_v24, %v3655_v31 }
 0xb5b   :  { %v4037_v27 = vpop.eup %4036 }
 0xb5c   :  { %v3666_v32 = vmul.f32 %v4037_v27, %v3660_v61 }
 0xb5e   :  { %3774 = vst [vmem:[%s7725_s7 + $0x8] sm:$0xff] %v3666_v32 }

</bundles_post_ra>
